<compile_context>
chip_gen: v7x
topology: tpu7x:2x2x1
jax: 0.10.0
libtpu: 0.0.40
codegen_flags: <defaults>
</compile_context>

<pallas_src>
import functools

import jax
import jax.numpy as jnp
from jax.experimental import pallas as pl
from jax.experimental.pallas import tpu as pltpu

LEAKY_SLOPE = 0.01  # PyTorch nn.LeakyReLU() default (used by the spec module)
ACT = {"linear": 0, "leaky": 1, "mish": 2}

# ---------------------------------------------------------------------------
# Embedded config (stand-in for parse_cfg('cfgs/new-darknet.cfg'))
# TODO(synk): original cfg file not available; representative small config used.
# ---------------------------------------------------------------------------
CFG_BLOCKS = [
    {"type": "net"},
    {"type": "convolutional", "batch_normalize": "1", "filters": "8",
     "size": "3", "stride": "1", "pad": "1", "activation": "mish"},
    {"type": "convolutional", "batch_normalize": "1", "filters": "16",
     "size": "3", "stride": "2", "pad": "1", "activation": "mish"},
    {"type": "convolutional", "batch_normalize": "1", "filters": "8",
     "size": "1", "stride": "1", "pad": "1", "activation": "mish"},
    {"type": "deformable", "batch_norm": "1", "filters": "16",
     "size": "3", "stride": "1", "pad": "1", "activation": "mish"},
    {"type": "shortcut", "from": "-3", "activation": "linear"},
    {"type": "convolutional", "batch_normalize": "1", "filters": "32",
     "size": "3", "stride": "2", "pad": "1", "activation": "leaky"},
    {"type": "convolutional", "batch_normalize": "1", "filters": "16",
     "size": "1", "stride": "1", "pad": "1", "activation": "leaky"},
    {"type": "deformable", "batch_norm": "1", "filters": "32",
     "size": "3", "stride": "1", "pad": "1", "activation": "leaky"},
    {"type": "shortcut", "from": "-3", "activation": "linear"},
    {"type": "avgpool"},
]


# ---------------------------------------------------------------------------
# Shared activation (identical code used in-kernel and in the pure-JAX ref)
# ---------------------------------------------------------------------------
def _apply_act(y, act):
    if act == 1:  # LeakyReLU
        return jnp.where(y > 0, y, LEAKY_SLOPE * y)
    if act == 2:  # Mish: x * tanh(softplus(x)); stable, branch-free softplus
        sp = jnp.maximum(y, 0.0) + jnp.log1p(jnp.exp(-jnp.abs(y)))
        return y * jnp.tanh(sp)
    return y


def _round_up(v, m):
    return ((v + m - 1) // m) * m


# ---------------------------------------------------------------------------
# Pallas kernels
# ---------------------------------------------------------------------------
def _fused_matmul_kernel(act, has_res, x_ref, w_ref, s_ref, b_ref, *refs):
    """One M-tile: y = act((x @ w) * scale + bias) [+ residual].

    Single full-K block -> no accumulator scratch, no init/finalize gates.
    x/w tiles are bf16, accumulation and epilogue are f32.
    """
    o_ref = refs[-1]
    y = jnp.dot(x_ref[...], w_ref[...], preferred_element_type=jnp.float32)
    y = y * s_ref[...] + b_ref[...]
    y = _apply_act(y, act)
    if has_res:
        y = y + refs[0][...]          # shortcut fused after activation
    o_ref[...] = y.astype(o_ref.dtype)


def _avgpool_kernel(inv_hw, x_ref, o_ref):
    o_ref[...] = jnp.sum(x_ref[...], axis=1, keepdims=True) * inv_hw


# ---------------------------------------------------------------------------
# Pallas wrappers
# ---------------------------------------------------------------------------
def fused_matmul(x, w, scale, bias, act, residual=None, use_pallas=True,
                 tm=256):
    """y = act((x @ w) * scale + bias) [+ residual]; x:(M,K) w:(K,N)."""
    M, K = x.shape
    N = w.shape[1]
    xb = x.astype(jnp.bfloat16)
    wb = w.astype(jnp.bfloat16)

    if not use_pallas:
        y = jnp.dot(xb, wb, preferred_element_type=jnp.float32)
        y = _apply_act(y * scale[None, :] + bias[None, :], act)
        if residual is not None:
            y = y + residual
        return y

    # K stays a single full-extent block (no 128-padding, no K grid axis);
    # only round to a multiple of 16 for bf16 sublane packing of w.
    Kp = _round_up(K, 16)
    if Kp != K:
        xb = jnp.pad(xb, ((0, 0), (0, Kp - K)))
        wb = jnp.pad(wb, ((0, Kp - K), (0, 0)))

    # Tile only M.  tm<=256 keeps >=2 blocks on the parallel axis at realistic
    # sizes (both v7x TensorCores); tiny layers collapse to a single block.
    tm = min(tm, _round_up(M, 8))
    Mp = _round_up(M, tm)
    if Mp != M:
        xb = jnp.pad(xb, ((0, Mp - M), (0, 0)))

    s2 = scale.reshape(1, N).astype(jnp.float32)
    b2 = bias.reshape(1, N).astype(jnp.float32)

    in_specs = [
        pl.BlockSpec((tm, Kp), lambda i: (i, 0)),
        pl.BlockSpec((Kp, N), lambda i: (0, 0)),
        pl.BlockSpec((1, N), lambda i: (0, 0)),
        pl.BlockSpec((1, N), lambda i: (0, 0)),
    ]
    operands = [xb, wb, s2, b2]
    has_res = residual is not None
    if has_res:
        rp = residual.astype(jnp.float32)
        if Mp != M:
            rp = jnp.pad(rp, ((0, Mp - M), (0, 0)))
        in_specs.append(pl.BlockSpec((tm, N), lambda i: (i, 0)))
        operands.append(rp)

    out = pl.pallas_call(
        functools.partial(_fused_matmul_kernel, act, has_res),
        out_shape=jax.ShapeDtypeStruct((Mp, N), jnp.float32),
        grid_spec=pltpu.PrefetchScalarGridSpec(
            num_scalar_prefetch=0,
            grid=(Mp // tm,),
            in_specs=in_specs,
            out_specs=pl.BlockSpec((tm, N), lambda i: (i, 0)),
        ),
        compiler_params=pltpu.CompilerParams(
            dimension_semantics=("parallel",)),
    )(*operands)
    return out[:M] if Mp != M else out


def global_avgpool(x, use_pallas=True):
    """AdaptiveAvgPool2d((1,1)); NHWC input -> NCHW (B, C, 1, 1) output."""
    B, H, W, C = x.shape
    if not use_pallas:
        return jnp.mean(x, axis=(1, 2)).reshape(B, C, 1, 1)
    xt = x.reshape(B, H * W, C)   # channel-last, no transpose, no padding
    out = pl.pallas_call(
        functools.partial(_avgpool_kernel, 1.0 / float(H * W)),
        out_shape=jax.ShapeDtypeStruct((B, 1, C), jnp.float32),
        grid_spec=pltpu.PrefetchScalarGridSpec(
            num_scalar_prefetch=0,
            grid=(B,),
            in_specs=[pl.BlockSpec((1, H * W, C), lambda b: (b, 0, 0))],
            out_specs=pl.BlockSpec((1, 1, C), lambda b: (b, 0, 0)),
        ),
        compiler_params=pltpu.CompilerParams(dimension_semantics=("parallel",)),
    )(xt)
    return out.reshape(B, C, 1, 1)


# ---------------------------------------------------------------------------
# Conv / deformable-conv glue (im2col + bilinear sampling in plain JAX, NHWC)
# ---------------------------------------------------------------------------
def im2col_nhwc(x, k, stride, pad):
    # TODO(synk): at real image sizes the patch extraction should move inside
    # the kernel (shifted block loads) instead of materializing k*k copies.
    B, H, W, C = x.shape
    xp = jnp.pad(x, ((0, 0), (pad, pad), (pad, pad), (0, 0)))
    Ho = (H + 2 * pad - k) // stride + 1
    Wo = (W + 2 * pad - k) // stride + 1
    cols = []
    for kh in range(k):
        for kw in range(k):
            cols.append(xp[:, kh:kh + stride * Ho:stride,
                           kw:kw + stride * Wo:stride, :])
    p = jnp.concatenate(cols, axis=-1)          # (B, Ho, Wo, k*k*C), (kh,kw,c)
    return p.reshape(B * Ho * Wo, k * k * C), Ho, Wo


def conv_block(x, w, scale, bias, k, stride, pad, act, residual, use_pallas):
    """x NHWC -> NHWC.  w is PyTorch (Cout, Cin, kh, kw)."""
    B = x.shape[0]
    Cout = w.shape[0]
    patches, Ho, Wo = im2col_nhwc(x, k, stride, pad)
    wmat = w.transpose(2, 3, 1, 0).reshape(-1, Cout)      # (kh,kw,cin) x Cout
    res = residual.reshape(-1, Cout) if residual is not None else None
    out = fused_matmul(patches, wmat, scale, bias, act, res, use_pallas)
    return out.reshape(B, Ho, Wo, Cout)


def deform_sample_nhwc(x, offsets, k, stride, pad):
    """Bilinear sampling of deformable taps (torchvision offset order), NHWC.

    TODO(synk): data-dependent bilinear gather kept in plain JAX (no clean
    Pallas equivalent at this granularity); 4 corners fused into one gather.
    """
    B, H, W, C = x.shape
    Ho, Wo = offsets.shape[1], offsets.shape[2]
    kk = k * k
    off = offsets.reshape(B, Ho, Wo, kk, 2)
    kh = (jnp.arange(kk) // k).astype(jnp.float32)
    kw = (jnp.arange(kk) % k).astype(jnp.float32)
    base_y = (jnp.arange(Ho) * stride - pad).astype(jnp.float32)
    base_x = (jnp.arange(Wo) * stride - pad).astype(jnp.float32)
    py = base_y[None, :, None, None] + kh[None, None, None, :] + off[..., 0]
    px = base_x[None, None, :, None] + kw[None, None, None, :] + off[..., 1]
    y0 = jnp.floor(py)
    x0 = jnp.floor(px)
    ly = py - y0
    lx = px - x0
    # 4 corners stacked on a trailing axis -> single gather pass
    yc = jnp.stack([y0, y0, y0 + 1.0, y0 + 1.0], axis=-1)   # (B,Ho,Wo,kk,4)
    xc = jnp.stack([x0, x0 + 1.0, x0, x0 + 1.0], axis=-1)
    wy = jnp.stack([1.0 - ly, 1.0 - ly, ly, ly], axis=-1)
    wx = jnp.stack([1.0 - lx, lx, 1.0 - lx, lx], axis=-1)
    valid = (yc >= 0) & (yc <= H - 1) & (xc >= 0) & (xc <= W - 1)
    wgt = wy * wx * valid.astype(jnp.float32)
    yi = jnp.clip(yc, 0, H - 1).astype(jnp.int32)
    xi = jnp.clip(xc, 0, W - 1).astype(jnp.int32)
    lin = yi * W + xi                                        # (B,Ho,Wo,kk,4)
    x_flat = x.reshape(B, H * W, C)
    gath = jax.vmap(lambda xf, idx: xf[idx])(x_flat, lin)    # (B,Ho,Wo,kk,4,C)
    vals = jnp.sum(gath * wgt[..., None], axis=-2)           # (B,Ho,Wo,kk,C)
    return vals.reshape(B * Ho * Wo, kk * C), Ho, Wo


def deformable_block(x, p, residual, use_pallas):
    # TODO(synk): DeformableConv2d source not provided; DCNv1 style assumed
    # (offset conv -> deform_conv2d with the regular conv weights).
    k, stride, pad, act = p["k"], p["stride"], p["pad"], p["act"]
    B = x.shape[0]
    Cout = p["w"].shape[0]
    off = conv_block(x, p["off_w"],
                     jnp.ones((2 * k * k,), jnp.float32), p["off_b"],
                     k, stride, pad, 0, None, use_pallas)    # (B,Ho,Wo,2kk)
    patches, Ho, Wo = deform_sample_nhwc(x, off, k, stride, pad)
    wmat = p["w"].transpose(2, 3, 1, 0).reshape(-1, Cout)
    res = residual.reshape(-1, Cout) if residual is not None else None
    out = fused_matmul(patches, wmat, p["scale"], p["bias"], act, res,
                       use_pallas)
    return out.reshape(B, Ho, Wo, Cout)


# ---------------------------------------------------------------------------
# Parameter construction (deterministic, mirrors create_blocks shapes)
# ---------------------------------------------------------------------------
def build_params(key):
    params = []
    prev = 3
    bn_eps = 1e-5
    for i, blk in enumerate(CFG_BLOCKS[1:]):
        ki = jax.random.fold_in(key, i)
        t = blk["type"]
        if t == "convolutional":
            f, ks, st = int(blk["filters"]), int(blk["size"]), int(blk["stride"])
            pad = (ks - 1) // 2 if int(blk["pad"]) else 0
            bn = int(blk.get("batch_normalize", 0))
            w = 0.1 * jax.random.normal(jax.random.fold_in(ki, 0),
                                        (f, prev, ks, ks), jnp.float32)
            if bn:  # inference BN (running_mean=0, running_var=1), no conv bias
                gamma = 1.0 + 0.1 * jax.random.normal(jax.random.fold_in(ki, 1),
                                                      (f,), jnp.float32)
                beta = 0.1 * jax.random.normal(jax.random.fold_in(ki, 2),
                                               (f,), jnp.float32)
                scale = gamma / jnp.sqrt(1.0 + bn_eps)
                bias = beta
            else:
                scale = jnp.ones((f,), jnp.float32)
                bias = 0.1 * jax.random.normal(jax.random.fold_in(ki, 3),
                                               (f,), jnp.float32)
            params.append(dict(type=t, w=w, scale=scale, bias=bias, k=ks,
                               stride=st, pad=pad, act=ACT[blk["activation"]]))
            prev = f
        elif t == "deformable":
            f, ks, st = int(blk["filters"]), int(blk["size"]), int(blk["stride"])
            # TODO(synk): pad passed raw (not (k-1)//2) per the module's code.
            pad = int(blk["pad"])
            bn = int(blk.get("batch_norm", 0))
            off_w = 0.05 * jax.random.normal(jax.random.fold_in(ki, 0),
                                             (2 * ks * ks, prev, ks, ks),
                                             jnp.float32)
            off_b = 0.01 * jax.random.normal(jax.random.fold_in(ki, 1),
                                             (2 * ks * ks,), jnp.float32)
            w = 0.1 * jax.random.normal(jax.random.fold_in(ki, 2),
                                        (f, prev, ks, ks), jnp.float32)
            if bn:
                gamma = 1.0 + 0.1 * jax.random.normal(jax.random.fold_in(ki, 3),
                                                      (f,), jnp.float32)
                beta = 0.1 * jax.random.normal(jax.random.fold_in(ki, 4),
                                               (f,), jnp.float32)
                scale = gamma / jnp.sqrt(1.0 + bn_eps)
                bias = beta
            else:
                scale = jnp.ones((f,), jnp.float32)
                bias = jnp.zeros((f,), jnp.float32)
            params.append(dict(type=t, w=w, off_w=off_w, off_b=off_b,
                               scale=scale, bias=bias, k=ks, stride=st,
                               pad=pad, act=ACT[blk["activation"]]))
            prev = f
        elif t == "shortcut":
            params.append(dict(type=t, frm=int(blk["from"])))
        elif t == "avgpool":
            params.append(dict(type=t))
    return params


# ---------------------------------------------------------------------------
# Forward (mirrors Deformed_Darknet53.forward); shortcut is fused into the
# producing conv's epilogue whenever its standalone output is not needed.
# ---------------------------------------------------------------------------
def _shortcut_fusion_plan(params):
    n = len(params)
    refcount = {}
    for s, p in enumerate(params):
        if p["type"] == "shortcut":
            refcount[s - 1] = refcount.get(s - 1, 0) + 1
            refcount[s + p["frm"]] = refcount.get(s + p["frm"], 0) + 1
    fuse = set()
    for i, p in enumerate(params):
        if (p["type"] in ("convolutional", "deformable") and i + 1 < n
                and params[i + 1]["type"] == "shortcut"
                and refcount.get(i, 0) == 1):
            fuse.add(i)
    return fuse


def forward(params, x, use_pallas=True):
    fuse = _shortcut_fusion_plan(params)
    x = jnp.transpose(x, (0, 2, 3, 1))       # NCHW -> NHWC (internal layout)
    outputs = {}
    n = len(params)
    i = 0
    while i < n:
        p = params[i]
        t = p["type"]
        residual = None
        if i in fuse:
            s = i + 1
            residual = outputs[s + params[s]["frm"]]
        if t == "convolutional":
            x = conv_block(x, p["w"], p["scale"], p["bias"], p["k"],
                           p["stride"], p["pad"], p["act"], residual,
                           use_pallas)
        elif t == "deformable":
            x = deformable_block(x, p, residual, use_pallas)
        elif t == "shortcut":
            # unfused fallback: plain add, fused by XLA into its neighbours
            x = outputs[i - 1] + outputs[i + p["frm"]]
        elif t == "avgpool":
            x = global_avgpool(x, use_pallas)   # returns NCHW (B, C, 1, 1)
        outputs[i] = x
        if residual is not None:
            outputs[i + 1] = x                  # the fused shortcut's output
            i += 2
        else:
            i += 1
    return x


if __name__ == "__main__":
    key = jax.random.PRNGKey(0)
    params = build_params(jax.random.fold_in(key, 123))
    x = jax.random.normal(jax.random.fold_in(key, 7), (2, 3, 16, 16),
                          jnp.float32)

    pallas_fwd = jax.jit(lambda v: forward(params, v, use_pallas=True))
    ref_fwd = jax.jit(lambda v: forward(params, v, use_pallas=False))

    out = jax.block_until_ready(pallas_fwd(x))
    ref = jax.block_until_ready(ref_fwd(x))

    assert out.shape == ref.shape == (2, 32, 1, 1), (out.shape, ref.shape)
    err = float(jnp.max(jnp.abs(out - ref)))
    assert err < 2e-3, f"max abs err {err}"
    print("KERNEL_OK")
</pallas_src>

<mosaic_0001>
module attributes {stable_mosaic.version = 11 : i64} {
  func.func @_fused_matmul_kernel(%arg0: i32, %arg1: memref<256x32xbf16, #tpu.memory_space<vmem>>, %arg2: memref<32x8xbf16, #tpu.memory_space<vmem>>, %arg3: memref<1x8xf32, #tpu.memory_space<vmem>>, %arg4: memref<1x8xf32, #tpu.memory_space<vmem>>, %arg5: memref<256x8xf32, #tpu.memory_space<vmem>>) attributes {dimension_semantics = [#tpu.dimension_semantics<parallel>], iteration_bounds = array<i64: 2>, scalar_prefetch = 0 : i64, scratch_operands = 0 : i64, tpu.core_type = #tpu.core_type<tc>, window_params = [{transform_indices = @transform_0, window_bounds = array<i64: 256, 32>}, {pipeline_mode = #tpu.pipeline_mode<synchronous>, transform_indices = @transform_1, window_bounds = array<i64: 32, 8>}, {pipeline_mode = #tpu.pipeline_mode<synchronous>, transform_indices = @transform_2, window_bounds = array<i64: 1, 8>}, {pipeline_mode = #tpu.pipeline_mode<synchronous>, transform_indices = @transform_3, window_bounds = array<i64: 1, 8>}, {transform_indices = @transform_4, window_bounds = array<i64: 256, 8>}]} {
    %c0 = arith.constant 0 : index
    %c0_0 = arith.constant 0 : index
    %0 = vector.load %arg1[%c0, %c0_0] : memref<256x32xbf16, #tpu.memory_space<vmem>>, vector<256x32xbf16>
    %c0_1 = arith.constant 0 : index
    %c0_2 = arith.constant 0 : index
    %1 = vector.load %arg2[%c0_1, %c0_2] : memref<32x8xbf16, #tpu.memory_space<vmem>>, vector<32x8xbf16>
    %cst = arith.constant dense<0.000000e+00> : vector<256x8xf32>
    %2 = tpu.matmul %0, %1, %cst {dimension_numbers = #tpu.dot_dimension_numbers<[1], [0], [0], [1], [0, 0, 1, 1], [], []>} : vector<256x32xbf16>, vector<32x8xbf16>, vector<256x8xf32> -> vector<256x8xf32>
    %c0_3 = arith.constant 0 : index
    %c0_4 = arith.constant 0 : index
    %3 = vector.load %arg3[%c0_3, %c0_4] : memref<1x8xf32, #tpu.memory_space<vmem>>, vector<1x8xf32>
    %4 = vector.broadcast %3 : vector<1x8xf32> to vector<256x8xf32>
    %5 = arith.mulf %2, %4 : vector<256x8xf32>
    %c0_5 = arith.constant 0 : index
    %c0_6 = arith.constant 0 : index
    %6 = vector.load %arg4[%c0_5, %c0_6] : memref<1x8xf32, #tpu.memory_space<vmem>>, vector<1x8xf32>
    %7 = vector.broadcast %6 : vector<1x8xf32> to vector<256x8xf32>
    %8 = arith.addf %5, %7 : vector<256x8xf32>
    %cst_7 = arith.constant 0.000000e+00 : f32
    %9 = vector.broadcast %cst_7 : f32 to vector<256x8xf32>
    %10 = arith.maximumf %8, %9 : vector<256x8xf32>
    %11 = math.absf %8 : vector<256x8xf32>
    %cst_8 = arith.constant 0.000000e+00 : f32
    %12 = vector.broadcast %cst_8 : f32 to vector<256x8xf32>
    %13 = arith.subf %12, %11 : vector<256x8xf32>
    %14 = math.exp %13 : vector<256x8xf32>
    %15 = math.log1p %14 : vector<256x8xf32>
    %16 = arith.addf %10, %15 : vector<256x8xf32>
    %17 = math.tanh %16 : vector<256x8xf32>
    %18 = arith.mulf %8, %17 : vector<256x8xf32>
    %c0_9 = arith.constant 0 : index
    %c0_10 = arith.constant 0 : index
    %19 = vector.load %arg5[%c0_9, %c0_10] : memref<256x8xf32, #tpu.memory_space<vmem>>, vector<256x8xf32>
    tpu.vector_store %arg5[%c0_9, %c0_10], %18 {strides = array<i32>} : memref<256x8xf32, #tpu.memory_space<vmem>>, vector<256x8xf32>,
    return
  }
  func.func @transform_0(%arg0: i32) -> (i32, i32) {
    %c0_i32 = arith.constant 0 : i32
    %c0_i32_0 = arith.constant 0 : i32
    return %arg0, %c0_i32 : i32, i32
  }
  func.func @transform_1(%arg0: i32) -> (i32, i32) {
    %c0_i32 = arith.constant 0 : i32
    %c0_i32_0 = arith.constant 0 : i32
    %c0_i32_1 = arith.constant 0 : i32
    return %c0_i32, %c0_i32_0 : i32, i32
  }
  func.func @transform_2(%arg0: i32) -> (i32, i32) {
    %c0_i32 = arith.constant 0 : i32
    %c0_i32_0 = arith.constant 0 : i32
    %c0_i32_1 = arith.constant 0 : i32
    return %c0_i32, %c0_i32_0 : i32, i32
  }
  func.func @transform_3(%arg0: i32) -> (i32, i32) {
    %c0_i32 = arith.constant 0 : i32
    %c0_i32_0 = arith.constant 0 : i32
    %c0_i32_1 = arith.constant 0 : i32
    return %c0_i32, %c0_i32_0 : i32, i32
  }
  func.func @transform_4(%arg0: i32) -> (i32, i32) {
    %c0_i32 = arith.constant 0 : i32
    %c0_i32_0 = arith.constant 0 : i32
    return %arg0, %c0_i32 : i32, i32
  }
}

module attributes {stable_mosaic.version = 11 : i64} {
  func.func @_fused_matmul_kernel(%arg0: i32, %arg1: memref<128x80xbf16, #tpu.memory_space<vmem>>, %arg2: memref<80x16xbf16, #tpu.memory_space<vmem>>, %arg3: memref<1x16xf32, #tpu.memory_space<vmem>>, %arg4: memref<1x16xf32, #tpu.memory_space<vmem>>, %arg5: memref<128x16xf32, #tpu.memory_space<vmem>>) attributes {dimension_semantics = [#tpu.dimension_semantics<parallel>], iteration_bounds = array<i64: 1>, scalar_prefetch = 0 : i64, scratch_operands = 0 : i64, tpu.core_type = #tpu.core_type<tc>, window_params = [{transform_indices = @transform_0, window_bounds = array<i64: 128, 80>}, {pipeline_mode = #tpu.pipeline_mode<synchronous>, transform_indices = @transform_1, window_bounds = array<i64: 80, 16>}, {pipeline_mode = #tpu.pipeline_mode<synchronous>, transform_indices = @transform_2, window_bounds = array<i64: 1, 16>}, {pipeline_mode = #tpu.pipeline_mode<synchronous>, transform_indices = @transform_3, window_bounds = array<i64: 1, 16>}, {transform_indices = @transform_4, window_bounds = array<i64: 128, 16>}]} {
    %c0 = arith.constant 0 : index
    %c0_0 = arith.constant 0 : index
    %0 = vector.load %arg1[%c0, %c0_0] : memref<128x80xbf16, #tpu.memory_space<vmem>>, vector<128x80xbf16>
    %c0_1 = arith.constant 0 : index
    %c0_2 = arith.constant 0 : index
    %1 = vector.load %arg2[%c0_1, %c0_2] : memref<80x16xbf16, #tpu.memory_space<vmem>>, vector<80x16xbf16>
    %cst = arith.constant dense<0.000000e+00> : vector<128x16xf32>
    %2 = tpu.matmul %0, %1, %cst {dimension_numbers = #tpu.dot_dimension_numbers<[1], [0], [0], [1], [0, 0, 1, 1], [], []>} : vector<128x80xbf16>, vector<80x16xbf16>, vector<128x16xf32> -> vector<128x16xf32>
    %c0_3 = arith.constant 0 : index
    %c0_4 = arith.constant 0 : index
    %3 = vector.load %arg3[%c0_3, %c0_4] : memref<1x16xf32, #tpu.memory_space<vmem>>, vector<1x16xf32>
    %4 = vector.broadcast %3 : vector<1x16xf32> to vector<128x16xf32>
    %5 = arith.mulf %2, %4 : vector<128x16xf32>
    %c0_5 = arith.constant 0 : index
    %c0_6 = arith.constant 0 : index
    %6 = vector.load %arg4[%c0_5, %c0_6] : memref<1x16xf32, #tpu.memory_space<vmem>>, vector<1x16xf32>
    %7 = vector.broadcast %6 : vector<1x16xf32> to vector<128x16xf32>
    %8 = arith.addf %5, %7 : vector<128x16xf32>
    %cst_7 = arith.constant 0.000000e+00 : f32
    %9 = vector.broadcast %cst_7 : f32 to vector<128x16xf32>
    %10 = arith.maximumf %8, %9 : vector<128x16xf32>
    %11 = math.absf %8 : vector<128x16xf32>
    %cst_8 = arith.constant 0.000000e+00 : f32
    %12 = vector.broadcast %cst_8 : f32 to vector<128x16xf32>
    %13 = arith.subf %12, %11 : vector<128x16xf32>
    %14 = math.exp %13 : vector<128x16xf32>
    %15 = math.log1p %14 : vector<128x16xf32>
    %16 = arith.addf %10, %15 : vector<128x16xf32>
    %17 = math.tanh %16 : vector<128x16xf32>
    %18 = arith.mulf %8, %17 : vector<128x16xf32>
    %c0_9 = arith.constant 0 : index
    %c0_10 = arith.constant 0 : index
    %19 = vector.load %arg5[%c0_9, %c0_10] : memref<128x16xf32, #tpu.memory_space<vmem>>, vector<128x16xf32>
    tpu.vector_store %arg5[%c0_9, %c0_10], %18 {strides = array<i32>} : memref<128x16xf32, #tpu.memory_space<vmem>>, vector<128x16xf32>,
    return
  }
  func.func @transform_0(%arg0: i32) -> (i32, i32) {
    %c0_i32 = arith.constant 0 : i32
    %c0_i32_0 = arith.constant 0 : i32
    return %arg0, %c0_i32 : i32, i32
  }
  func.func @transform_1(%arg0: i32) -> (i32, i32) {
    %c0_i32 = arith.constant 0 : i32
    %c0_i32_0 = arith.constant 0 : i32
    %c0_i32_1 = arith.constant 0 : i32
    return %c0_i32, %c0_i32_0 : i32, i32
  }
  func.func @transform_2(%arg0: i32) -> (i32, i32) {
    %c0_i32 = arith.constant 0 : i32
    %c0_i32_0 = arith.constant 0 : i32
    %c0_i32_1 = arith.constant 0 : i32
    return %c0_i32, %c0_i32_0 : i32, i32
  }
  func.func @transform_3(%arg0: i32) -> (i32, i32) {
    %c0_i32 = arith.constant 0 : i32
    %c0_i32_0 = arith.constant 0 : i32
    %c0_i32_1 = arith.constant 0 : i32
    return %c0_i32, %c0_i32_0 : i32, i32
  }
  func.func @transform_4(%arg0: i32) -> (i32, i32) {
    %c0_i32 = arith.constant 0 : i32
    %c0_i32_0 = arith.constant 0 : i32
    return %arg0, %c0_i32 : i32, i32
  }
}

module attributes {stable_mosaic.version = 11 : i64} {
  func.func @_fused_matmul_kernel(%arg0: i32, %arg1: memref<128x16xbf16, #tpu.memory_space<vmem>>, %arg2: memref<16x8xbf16, #tpu.memory_space<vmem>>, %arg3: memref<1x8xf32, #tpu.memory_space<vmem>>, %arg4: memref<1x8xf32, #tpu.memory_space<vmem>>, %arg5: memref<128x8xf32, #tpu.memory_space<vmem>>) attributes {dimension_semantics = [#tpu.dimension_semantics<parallel>], iteration_bounds = array<i64: 1>, scalar_prefetch = 0 : i64, scratch_operands = 0 : i64, tpu.core_type = #tpu.core_type<tc>, window_params = [{transform_indices = @transform_0, window_bounds = array<i64: 128, 16>}, {pipeline_mode = #tpu.pipeline_mode<synchronous>, transform_indices = @transform_1, window_bounds = array<i64: 16, 8>}, {pipeline_mode = #tpu.pipeline_mode<synchronous>, transform_indices = @transform_2, window_bounds = array<i64: 1, 8>}, {pipeline_mode = #tpu.pipeline_mode<synchronous>, transform_indices = @transform_3, window_bounds = array<i64: 1, 8>}, {transform_indices = @transform_4, window_bounds = array<i64: 128, 8>}]} {
    %c0 = arith.constant 0 : index
    %c0_0 = arith.constant 0 : index
    %0 = vector.load %arg1[%c0, %c0_0] : memref<128x16xbf16, #tpu.memory_space<vmem>>, vector<128x16xbf16>
    %c0_1 = arith.constant 0 : index
    %c0_2 = arith.constant 0 : index
    %1 = vector.load %arg2[%c0_1, %c0_2] : memref<16x8xbf16, #tpu.memory_space<vmem>>, vector<16x8xbf16>
    %cst = arith.constant dense<0.000000e+00> : vector<128x8xf32>
    %2 = tpu.matmul %0, %1, %cst {dimension_numbers = #tpu.dot_dimension_numbers<[1], [0], [0], [1], [0, 0, 1, 1], [], []>} : vector<128x16xbf16>, vector<16x8xbf16>, vector<128x8xf32> -> vector<128x8xf32>
    %c0_3 = arith.constant 0 : index
    %c0_4 = arith.constant 0 : index
    %3 = vector.load %arg3[%c0_3, %c0_4] : memref<1x8xf32, #tpu.memory_space<vmem>>, vector<1x8xf32>
    %4 = vector.broadcast %3 : vector<1x8xf32> to vector<128x8xf32>
    %5 = arith.mulf %2, %4 : vector<128x8xf32>
    %c0_5 = arith.constant 0 : index
    %c0_6 = arith.constant 0 : index
    %6 = vector.load %arg4[%c0_5, %c0_6] : memref<1x8xf32, #tpu.memory_space<vmem>>, vector<1x8xf32>
    %7 = vector.broadcast %6 : vector<1x8xf32> to vector<128x8xf32>
    %8 = arith.addf %5, %7 : vector<128x8xf32>
    %cst_7 = arith.constant 0.000000e+00 : f32
    %9 = vector.broadcast %cst_7 : f32 to vector<128x8xf32>
    %10 = arith.maximumf %8, %9 : vector<128x8xf32>
    %11 = math.absf %8 : vector<128x8xf32>
    %cst_8 = arith.constant 0.000000e+00 : f32
    %12 = vector.broadcast %cst_8 : f32 to vector<128x8xf32>
    %13 = arith.subf %12, %11 : vector<128x8xf32>
    %14 = math.exp %13 : vector<128x8xf32>
    %15 = math.log1p %14 : vector<128x8xf32>
    %16 = arith.addf %10, %15 : vector<128x8xf32>
    %17 = math.tanh %16 : vector<128x8xf32>
    %18 = arith.mulf %8, %17 : vector<128x8xf32>
    %c0_9 = arith.constant 0 : index
    %c0_10 = arith.constant 0 : index
    %19 = vector.load %arg5[%c0_9, %c0_10] : memref<128x8xf32, #tpu.memory_space<vmem>>, vector<128x8xf32>
    tpu.vector_store %arg5[%c0_9, %c0_10], %18 {strides = array<i32>} : memref<128x8xf32, #tpu.memory_space<vmem>>, vector<128x8xf32>,
    return
  }
  func.func @transform_0(%arg0: i32) -> (i32, i32) {
    %c0_i32 = arith.constant 0 : i32
    %c0_i32_0 = arith.constant 0 : i32
    return %arg0, %c0_i32 : i32, i32
  }
  func.func @transform_1(%arg0: i32) -> (i32, i32) {
    %c0_i32 = arith.constant 0 : i32
    %c0_i32_0 = arith.constant 0 : i32
    %c0_i32_1 = arith.constant 0 : i32
    return %c0_i32, %c0_i32_0 : i32, i32
  }
  func.func @transform_2(%arg0: i32) -> (i32, i32) {
    %c0_i32 = arith.constant 0 : i32
    %c0_i32_0 = arith.constant 0 : i32
    %c0_i32_1 = arith.constant 0 : i32
    return %c0_i32, %c0_i32_0 : i32, i32
  }
  func.func @transform_3(%arg0: i32) -> (i32, i32) {
    %c0_i32 = arith.constant 0 : i32
    %c0_i32_0 = arith.constant 0 : i32
    %c0_i32_1 = arith.constant 0 : i32
    return %c0_i32, %c0_i32_0 : i32, i32
  }
  func.func @transform_4(%arg0: i32) -> (i32, i32) {
    %c0_i32 = arith.constant 0 : i32
    %c0_i32_0 = arith.constant 0 : i32
    return %arg0, %c0_i32 : i32, i32
  }
}

module attributes {stable_mosaic.version = 11 : i64} {
  func.func @_fused_matmul_kernel(%arg0: i32, %arg1: memref<128x80xbf16, #tpu.memory_space<vmem>>, %arg2: memref<80x18xbf16, #tpu.memory_space<vmem>>, %arg3: memref<1x18xf32, #tpu.memory_space<vmem>>, %arg4: memref<1x18xf32, #tpu.memory_space<vmem>>, %arg5: memref<128x18xf32, #tpu.memory_space<vmem>>) attributes {dimension_semantics = [#tpu.dimension_semantics<parallel>], iteration_bounds = array<i64: 1>, scalar_prefetch = 0 : i64, scratch_operands = 0 : i64, tpu.core_type = #tpu.core_type<tc>, window_params = [{transform_indices = @transform_0, window_bounds = array<i64: 128, 80>}, {pipeline_mode = #tpu.pipeline_mode<synchronous>, transform_indices = @transform_1, window_bounds = array<i64: 80, 18>}, {pipeline_mode = #tpu.pipeline_mode<synchronous>, transform_indices = @transform_2, window_bounds = array<i64: 1, 18>}, {pipeline_mode = #tpu.pipeline_mode<synchronous>, transform_indices = @transform_3, window_bounds = array<i64: 1, 18>}, {transform_indices = @transform_4, window_bounds = array<i64: 128, 18>}]} {
    %c0 = arith.constant 0 : index
    %c0_0 = arith.constant 0 : index
    %0 = vector.load %arg1[%c0, %c0_0] : memref<128x80xbf16, #tpu.memory_space<vmem>>, vector<128x80xbf16>
    %c0_1 = arith.constant 0 : index
    %c0_2 = arith.constant 0 : index
    %1 = vector.load %arg2[%c0_1, %c0_2] : memref<80x18xbf16, #tpu.memory_space<vmem>>, vector<80x18xbf16>
    %cst = arith.constant dense<0.000000e+00> : vector<128x18xf32>
    %2 = tpu.matmul %0, %1, %cst {dimension_numbers = #tpu.dot_dimension_numbers<[1], [0], [0], [1], [0, 0, 1, 1], [], []>} : vector<128x80xbf16>, vector<80x18xbf16>, vector<128x18xf32> -> vector<128x18xf32>
    %c0_3 = arith.constant 0 : index
    %c0_4 = arith.constant 0 : index
    %3 = vector.load %arg3[%c0_3, %c0_4] : memref<1x18xf32, #tpu.memory_space<vmem>>, vector<1x18xf32>
    %4 = vector.broadcast %3 : vector<1x18xf32> to vector<128x18xf32>
    %5 = arith.mulf %2, %4 : vector<128x18xf32>
    %c0_5 = arith.constant 0 : index
    %c0_6 = arith.constant 0 : index
    %6 = vector.load %arg4[%c0_5, %c0_6] : memref<1x18xf32, #tpu.memory_space<vmem>>, vector<1x18xf32>
    %7 = vector.broadcast %6 : vector<1x18xf32> to vector<128x18xf32>
    %8 = arith.addf %5, %7 : vector<128x18xf32>
    %c0_7 = arith.constant 0 : index
    %c0_8 = arith.constant 0 : index
    %9 = vector.load %arg5[%c0_7, %c0_8] : memref<128x18xf32, #tpu.memory_space<vmem>>, vector<128x18xf32>
    tpu.vector_store %arg5[%c0_7, %c0_8], %8 {strides = array<i32>} : memref<128x18xf32, #tpu.memory_space<vmem>>, vector<128x18xf32>,
    return
  }
  func.func @transform_0(%arg0: i32) -> (i32, i32) {
    %c0_i32 = arith.constant 0 : i32
    %c0_i32_0 = arith.constant 0 : i32
    return %arg0, %c0_i32 : i32, i32
  }
  func.func @transform_1(%arg0: i32) -> (i32, i32) {
    %c0_i32 = arith.constant 0 : i32
    %c0_i32_0 = arith.constant 0 : i32
    %c0_i32_1 = arith.constant 0 : i32
    return %c0_i32, %c0_i32_0 : i32, i32
  }
  func.func @transform_2(%arg0: i32) -> (i32, i32) {
    %c0_i32 = arith.constant 0 : i32
    %c0_i32_0 = arith.constant 0 : i32
    %c0_i32_1 = arith.constant 0 : i32
    return %c0_i32, %c0_i32_0 : i32, i32
  }
  func.func @transform_3(%arg0: i32) -> (i32, i32) {
    %c0_i32 = arith.constant 0 : i32
    %c0_i32_0 = arith.constant 0 : i32
    %c0_i32_1 = arith.constant 0 : i32
    return %c0_i32, %c0_i32_0 : i32, i32
  }
  func.func @transform_4(%arg0: i32) -> (i32, i32) {
    %c0_i32 = arith.constant 0 : i32
    %c0_i32_0 = arith.constant 0 : i32
    return %arg0, %c0_i32 : i32, i32
  }
}

module attributes {stable_mosaic.version = 11 : i64} {
  func.func @_fused_matmul_kernel(%arg0: i32, %arg1: memref<128x80xbf16, #tpu.memory_space<vmem>>, %arg2: memref<80x16xbf16, #tpu.memory_space<vmem>>, %arg3: memref<1x16xf32, #tpu.memory_space<vmem>>, %arg4: memref<1x16xf32, #tpu.memory_space<vmem>>, %arg5: memref<128x16xf32, #tpu.memory_space<vmem>>, %arg6: memref<128x16xf32, #tpu.memory_space<vmem>>) attributes {dimension_semantics = [#tpu.dimension_semantics<parallel>], iteration_bounds = array<i64: 1>, scalar_prefetch = 0 : i64, scratch_operands = 0 : i64, tpu.core_type = #tpu.core_type<tc>, window_params = [{transform_indices = @transform_0, window_bounds = array<i64: 128, 80>}, {pipeline_mode = #tpu.pipeline_mode<synchronous>, transform_indices = @transform_1, window_bounds = array<i64: 80, 16>}, {pipeline_mode = #tpu.pipeline_mode<synchronous>, transform_indices = @transform_2, window_bounds = array<i64: 1, 16>}, {pipeline_mode = #tpu.pipeline_mode<synchronous>, transform_indices = @transform_3, window_bounds = array<i64: 1, 16>}, {transform_indices = @transform_4, window_bounds = array<i64: 128, 16>}, {transform_indices = @transform_5, window_bounds = array<i64: 128, 16>}]} {
    %c0 = arith.constant 0 : index
    %c0_0 = arith.constant 0 : index
    %0 = vector.load %arg1[%c0, %c0_0] : memref<128x80xbf16, #tpu.memory_space<vmem>>, vector<128x80xbf16>
    %c0_1 = arith.constant 0 : index
    %c0_2 = arith.constant 0 : index
    %1 = vector.load %arg2[%c0_1, %c0_2] : memref<80x16xbf16, #tpu.memory_space<vmem>>, vector<80x16xbf16>
    %cst = arith.constant dense<0.000000e+00> : vector<128x16xf32>
    %2 = tpu.matmul %0, %1, %cst {dimension_numbers = #tpu.dot_dimension_numbers<[1], [0], [0], [1], [0, 0, 1, 1], [], []>} : vector<128x80xbf16>, vector<80x16xbf16>, vector<128x16xf32> -> vector<128x16xf32>
    %c0_3 = arith.constant 0 : index
    %c0_4 = arith.constant 0 : index
    %3 = vector.load %arg3[%c0_3, %c0_4] : memref<1x16xf32, #tpu.memory_space<vmem>>, vector<1x16xf32>
    %4 = vector.broadcast %3 : vector<1x16xf32> to vector<128x16xf32>
    %5 = arith.mulf %2, %4 : vector<128x16xf32>
    %c0_5 = arith.constant 0 : index
    %c0_6 = arith.constant 0 : index
    %6 = vector.load %arg4[%c0_5, %c0_6] : memref<1x16xf32, #tpu.memory_space<vmem>>, vector<1x16xf32>
    %7 = vector.broadcast %6 : vector<1x16xf32> to vector<128x16xf32>
    %8 = arith.addf %5, %7 : vector<128x16xf32>
    %cst_7 = arith.constant 0.000000e+00 : f32
    %9 = vector.broadcast %cst_7 : f32 to vector<128x16xf32>
    %10 = arith.maximumf %8, %9 : vector<128x16xf32>
    %11 = math.absf %8 : vector<128x16xf32>
    %cst_8 = arith.constant 0.000000e+00 : f32
    %12 = vector.broadcast %cst_8 : f32 to vector<128x16xf32>
    %13 = arith.subf %12, %11 : vector<128x16xf32>
    %14 = math.exp %13 : vector<128x16xf32>
    %15 = math.log1p %14 : vector<128x16xf32>
    %16 = arith.addf %10, %15 : vector<128x16xf32>
    %17 = math.tanh %16 : vector<128x16xf32>
    %18 = arith.mulf %8, %17 : vector<128x16xf32>
    %c0_9 = arith.constant 0 : index
    %c0_10 = arith.constant 0 : index
    %19 = vector.load %arg5[%c0_9, %c0_10] : memref<128x16xf32, #tpu.memory_space<vmem>>, vector<128x16xf32>
    %20 = arith.addf %18, %19 : vector<128x16xf32>
    %c0_11 = arith.constant 0 : index
    %c0_12 = arith.constant 0 : index
    %21 = vector.load %arg6[%c0_11, %c0_12] : memref<128x16xf32, #tpu.memory_space<vmem>>, vector<128x16xf32>
    tpu.vector_store %arg6[%c0_11, %c0_12], %20 {strides = array<i32>} : memref<128x16xf32, #tpu.memory_space<vmem>>, vector<128x16xf32>,
    return
  }
  func.func @transform_0(%arg0: i32) -> (i32, i32) {
    %c0_i32 = arith.constant 0 : i32
    %c0_i32_0 = arith.constant 0 : i32
    return %arg0, %c0_i32 : i32, i32
  }
  func.func @transform_1(%arg0: i32) -> (i32, i32) {
    %c0_i32 = arith.constant 0 : i32
    %c0_i32_0 = arith.constant 0 : i32
    %c0_i32_1 = arith.constant 0 : i32
    return %c0_i32, %c0_i32_0 : i32, i32
  }
  func.func @transform_2(%arg0: i32) -> (i32, i32) {
    %c0_i32 = arith.constant 0 : i32
    %c0_i32_0 = arith.constant 0 : i32
    %c0_i32_1 = arith.constant 0 : i32
    return %c0_i32, %c0_i32_0 : i32, i32
  }
  func.func @transform_3(%arg0: i32) -> (i32, i32) {
    %c0_i32 = arith.constant 0 : i32
    %c0_i32_0 = arith.constant 0 : i32
    %c0_i32_1 = arith.constant 0 : i32
    return %c0_i32, %c0_i32_0 : i32, i32
  }
  func.func @transform_4(%arg0: i32) -> (i32, i32) {
    %c0_i32 = arith.constant 0 : i32
    %c0_i32_0 = arith.constant 0 : i32
    return %arg0, %c0_i32 : i32, i32
  }
  func.func @transform_5(%arg0: i32) -> (i32, i32) {
    %c0_i32 = arith.constant 0 : i32
    %c0_i32_0 = arith.constant 0 : i32
    return %arg0, %c0_i32 : i32, i32
  }
}

module attributes {stable_mosaic.version = 11 : i64} {
  func.func @_fused_matmul_kernel(%arg0: i32, %arg1: memref<32x144xbf16, #tpu.memory_space<vmem>>, %arg2: memref<144x32xbf16, #tpu.memory_space<vmem>>, %arg3: memref<1x32xf32, #tpu.memory_space<vmem>>, %arg4: memref<1x32xf32, #tpu.memory_space<vmem>>, %arg5: memref<32x32xf32, #tpu.memory_space<vmem>>) attributes {dimension_semantics = [#tpu.dimension_semantics<parallel>], iteration_bounds = array<i64: 1>, scalar_prefetch = 0 : i64, scratch_operands = 0 : i64, tpu.core_type = #tpu.core_type<tc>, window_params = [{transform_indices = @transform_0, window_bounds = array<i64: 32, 144>}, {pipeline_mode = #tpu.pipeline_mode<synchronous>, transform_indices = @transform_1, window_bounds = array<i64: 144, 32>}, {pipeline_mode = #tpu.pipeline_mode<synchronous>, transform_indices = @transform_2, window_bounds = array<i64: 1, 32>}, {pipeline_mode = #tpu.pipeline_mode<synchronous>, transform_indices = @transform_3, window_bounds = array<i64: 1, 32>}, {transform_indices = @transform_4, window_bounds = array<i64: 32, 32>}]} {
    %c0 = arith.constant 0 : index
    %c0_0 = arith.constant 0 : index
    %0 = vector.load %arg1[%c0, %c0_0] : memref<32x144xbf16, #tpu.memory_space<vmem>>, vector<32x144xbf16>
    %c0_1 = arith.constant 0 : index
    %c0_2 = arith.constant 0 : index
    %1 = vector.load %arg2[%c0_1, %c0_2] : memref<144x32xbf16, #tpu.memory_space<vmem>>, vector<144x32xbf16>
    %cst = arith.constant dense<0.000000e+00> : vector<32x32xf32>
    %2 = tpu.matmul %0, %1, %cst {dimension_numbers = #tpu.dot_dimension_numbers<[1], [0], [0], [1], [0, 0, 1, 1], [], []>} : vector<32x144xbf16>, vector<144x32xbf16>, vector<32x32xf32> -> vector<32x32xf32>
    %c0_3 = arith.constant 0 : index
    %c0_4 = arith.constant 0 : index
    %3 = vector.load %arg3[%c0_3, %c0_4] : memref<1x32xf32, #tpu.memory_space<vmem>>, vector<1x32xf32>
    %4 = vector.broadcast %3 : vector<1x32xf32> to vector<32x32xf32>
    %5 = arith.mulf %2, %4 : vector<32x32xf32>
    %c0_5 = arith.constant 0 : index
    %c0_6 = arith.constant 0 : index
    %6 = vector.load %arg4[%c0_5, %c0_6] : memref<1x32xf32, #tpu.memory_space<vmem>>, vector<1x32xf32>
    %7 = vector.broadcast %6 : vector<1x32xf32> to vector<32x32xf32>
    %8 = arith.addf %5, %7 : vector<32x32xf32>
    %cst_7 = arith.constant 0.000000e+00 : f32
    %9 = vector.broadcast %cst_7 : f32 to vector<32x32xf32>
    %10 = arith.cmpf ogt, %8, %9 : vector<32x32xf32>
    %cst_8 = arith.constant 0.00999999977 : f32
    %11 = vector.broadcast %cst_8 : f32 to vector<32x32xf32>
    %12 = arith.mulf %11, %8 : vector<32x32xf32>
    %13 = arith.select %10, %8, %12 : vector<32x32xi1>, vector<32x32xf32>
    %c0_9 = arith.constant 0 : index
    %c0_10 = arith.constant 0 : index
    %14 = vector.load %arg5[%c0_9, %c0_10] : memref<32x32xf32, #tpu.memory_space<vmem>>, vector<32x32xf32>
    tpu.vector_store %arg5[%c0_9, %c0_10], %13 {strides = array<i32>} : memref<32x32xf32, #tpu.memory_space<vmem>>, vector<32x32xf32>,
    return
  }
  func.func @transform_0(%arg0: i32) -> (i32, i32) {
    %c0_i32 = arith.constant 0 : i32
    %c0_i32_0 = arith.constant 0 : i32
    return %arg0, %c0_i32 : i32, i32
  }
  func.func @transform_1(%arg0: i32) -> (i32, i32) {
    %c0_i32 = arith.constant 0 : i32
    %c0_i32_0 = arith.constant 0 : i32
    %c0_i32_1 = arith.constant 0 : i32
    return %c0_i32, %c0_i32_0 : i32, i32
  }
  func.func @transform_2(%arg0: i32) -> (i32, i32) {
    %c0_i32 = arith.constant 0 : i32
    %c0_i32_0 = arith.constant 0 : i32
    %c0_i32_1 = arith.constant 0 : i32
    return %c0_i32, %c0_i32_0 : i32, i32
  }
  func.func @transform_3(%arg0: i32) -> (i32, i32) {
    %c0_i32 = arith.constant 0 : i32
    %c0_i32_0 = arith.constant 0 : i32
    %c0_i32_1 = arith.constant 0 : i32
    return %c0_i32, %c0_i32_0 : i32, i32
  }
  func.func @transform_4(%arg0: i32) -> (i32, i32) {
    %c0_i32 = arith.constant 0 : i32
    %c0_i32_0 = arith.constant 0 : i32
    return %arg0, %c0_i32 : i32, i32
  }
}

module attributes {stable_mosaic.version = 11 : i64} {
  func.func @_fused_matmul_kernel(%arg0: i32, %arg1: memref<32x32xbf16, #tpu.memory_space<vmem>>, %arg2: memref<32x16xbf16, #tpu.memory_space<vmem>>, %arg3: memref<1x16xf32, #tpu.memory_space<vmem>>, %arg4: memref<1x16xf32, #tpu.memory_space<vmem>>, %arg5: memref<32x16xf32, #tpu.memory_space<vmem>>) attributes {dimension_semantics = [#tpu.dimension_semantics<parallel>], iteration_bounds = array<i64: 1>, scalar_prefetch = 0 : i64, scratch_operands = 0 : i64, tpu.core_type = #tpu.core_type<tc>, window_params = [{transform_indices = @transform_0, window_bounds = array<i64: 32, 32>}, {pipeline_mode = #tpu.pipeline_mode<synchronous>, transform_indices = @transform_1, window_bounds = array<i64: 32, 16>}, {pipeline_mode = #tpu.pipeline_mode<synchronous>, transform_indices = @transform_2, window_bounds = array<i64: 1, 16>}, {pipeline_mode = #tpu.pipeline_mode<synchronous>, transform_indices = @transform_3, window_bounds = array<i64: 1, 16>}, {transform_indices = @transform_4, window_bounds = array<i64: 32, 16>}]} {
    %c0 = arith.constant 0 : index
    %c0_0 = arith.constant 0 : index
    %0 = vector.load %arg1[%c0, %c0_0] : memref<32x32xbf16, #tpu.memory_space<vmem>>, vector<32x32xbf16>
    %c0_1 = arith.constant 0 : index
    %c0_2 = arith.constant 0 : index
    %1 = vector.load %arg2[%c0_1, %c0_2] : memref<32x16xbf16, #tpu.memory_space<vmem>>, vector<32x16xbf16>
    %cst = arith.constant dense<0.000000e+00> : vector<32x16xf32>
    %2 = tpu.matmul %0, %1, %cst {dimension_numbers = #tpu.dot_dimension_numbers<[1], [0], [0], [1], [0, 0, 1, 1], [], []>} : vector<32x32xbf16>, vector<32x16xbf16>, vector<32x16xf32> -> vector<32x16xf32>
    %c0_3 = arith.constant 0 : index
    %c0_4 = arith.constant 0 : index
    %3 = vector.load %arg3[%c0_3, %c0_4] : memref<1x16xf32, #tpu.memory_space<vmem>>, vector<1x16xf32>
    %4 = vector.broadcast %3 : vector<1x16xf32> to vector<32x16xf32>
    %5 = arith.mulf %2, %4 : vector<32x16xf32>
    %c0_5 = arith.constant 0 : index
    %c0_6 = arith.constant 0 : index
    %6 = vector.load %arg4[%c0_5, %c0_6] : memref<1x16xf32, #tpu.memory_space<vmem>>, vector<1x16xf32>
    %7 = vector.broadcast %6 : vector<1x16xf32> to vector<32x16xf32>
    %8 = arith.addf %5, %7 : vector<32x16xf32>
    %cst_7 = arith.constant 0.000000e+00 : f32
    %9 = vector.broadcast %cst_7 : f32 to vector<32x16xf32>
    %10 = arith.cmpf ogt, %8, %9 : vector<32x16xf32>
    %cst_8 = arith.constant 0.00999999977 : f32
    %11 = vector.broadcast %cst_8 : f32 to vector<32x16xf32>
    %12 = arith.mulf %11, %8 : vector<32x16xf32>
    %13 = arith.select %10, %8, %12 : vector<32x16xi1>, vector<32x16xf32>
    %c0_9 = arith.constant 0 : index
    %c0_10 = arith.constant 0 : index
    %14 = vector.load %arg5[%c0_9, %c0_10] : memref<32x16xf32, #tpu.memory_space<vmem>>, vector<32x16xf32>
    tpu.vector_store %arg5[%c0_9, %c0_10], %13 {strides = array<i32>} : memref<32x16xf32, #tpu.memory_space<vmem>>, vector<32x16xf32>,
    return
  }
  func.func @transform_0(%arg0: i32) -> (i32, i32) {
    %c0_i32 = arith.constant 0 : i32
    %c0_i32_0 = arith.constant 0 : i32
    return %arg0, %c0_i32 : i32, i32
  }
  func.func @transform_1(%arg0: i32) -> (i32, i32) {
    %c0_i32 = arith.constant 0 : i32
    %c0_i32_0 = arith.constant 0 : i32
    %c0_i32_1 = arith.constant 0 : i32
    return %c0_i32, %c0_i32_0 : i32, i32
  }
  func.func @transform_2(%arg0: i32) -> (i32, i32) {
    %c0_i32 = arith.constant 0 : i32
    %c0_i32_0 = arith.constant 0 : i32
    %c0_i32_1 = arith.constant 0 : i32
    return %c0_i32, %c0_i32_0 : i32, i32
  }
  func.func @transform_3(%arg0: i32) -> (i32, i32) {
    %c0_i32 = arith.constant 0 : i32
    %c0_i32_0 = arith.constant 0 : i32
    %c0_i32_1 = arith.constant 0 : i32
    return %c0_i32, %c0_i32_0 : i32, i32
  }
  func.func @transform_4(%arg0: i32) -> (i32, i32) {
    %c0_i32 = arith.constant 0 : i32
    %c0_i32_0 = arith.constant 0 : i32
    return %arg0, %c0_i32 : i32, i32
  }
}

module attributes {stable_mosaic.version = 11 : i64} {
  func.func @_fused_matmul_kernel(%arg0: i32, %arg1: memref<32x144xbf16, #tpu.memory_space<vmem>>, %arg2: memref<144x18xbf16, #tpu.memory_space<vmem>>, %arg3: memref<1x18xf32, #tpu.memory_space<vmem>>, %arg4: memref<1x18xf32, #tpu.memory_space<vmem>>, %arg5: memref<32x18xf32, #tpu.memory_space<vmem>>) attributes {dimension_semantics = [#tpu.dimension_semantics<parallel>], iteration_bounds = array<i64: 1>, scalar_prefetch = 0 : i64, scratch_operands = 0 : i64, tpu.core_type = #tpu.core_type<tc>, window_params = [{transform_indices = @transform_0, window_bounds = array<i64: 32, 144>}, {pipeline_mode = #tpu.pipeline_mode<synchronous>, transform_indices = @transform_1, window_bounds = array<i64: 144, 18>}, {pipeline_mode = #tpu.pipeline_mode<synchronous>, transform_indices = @transform_2, window_bounds = array<i64: 1, 18>}, {pipeline_mode = #tpu.pipeline_mode<synchronous>, transform_indices = @transform_3, window_bounds = array<i64: 1, 18>}, {transform_indices = @transform_4, window_bounds = array<i64: 32, 18>}]} {
    %c0 = arith.constant 0 : index
    %c0_0 = arith.constant 0 : index
    %0 = vector.load %arg1[%c0, %c0_0] : memref<32x144xbf16, #tpu.memory_space<vmem>>, vector<32x144xbf16>
    %c0_1 = arith.constant 0 : index
    %c0_2 = arith.constant 0 : index
    %1 = vector.load %arg2[%c0_1, %c0_2] : memref<144x18xbf16, #tpu.memory_space<vmem>>, vector<144x18xbf16>
    %cst = arith.constant dense<0.000000e+00> : vector<32x18xf32>
    %2 = tpu.matmul %0, %1, %cst {dimension_numbers = #tpu.dot_dimension_numbers<[1], [0], [0], [1], [0, 0, 1, 1], [], []>} : vector<32x144xbf16>, vector<144x18xbf16>, vector<32x18xf32> -> vector<32x18xf32>
    %c0_3 = arith.constant 0 : index
    %c0_4 = arith.constant 0 : index
    %3 = vector.load %arg3[%c0_3, %c0_4] : memref<1x18xf32, #tpu.memory_space<vmem>>, vector<1x18xf32>
    %4 = vector.broadcast %3 : vector<1x18xf32> to vector<32x18xf32>
    %5 = arith.mulf %2, %4 : vector<32x18xf32>
    %c0_5 = arith.constant 0 : index
    %c0_6 = arith.constant 0 : index
    %6 = vector.load %arg4[%c0_5, %c0_6] : memref<1x18xf32, #tpu.memory_space<vmem>>, vector<1x18xf32>
    %7 = vector.broadcast %6 : vector<1x18xf32> to vector<32x18xf32>
    %8 = arith.addf %5, %7 : vector<32x18xf32>
    %c0_7 = arith.constant 0 : index
    %c0_8 = arith.constant 0 : index
    %9 = vector.load %arg5[%c0_7, %c0_8] : memref<32x18xf32, #tpu.memory_space<vmem>>, vector<32x18xf32>
    tpu.vector_store %arg5[%c0_7, %c0_8], %8 {strides = array<i32>} : memref<32x18xf32, #tpu.memory_space<vmem>>, vector<32x18xf32>,
    return
  }
  func.func @transform_0(%arg0: i32) -> (i32, i32) {
    %c0_i32 = arith.constant 0 : i32
    %c0_i32_0 = arith.constant 0 : i32
    return %arg0, %c0_i32 : i32, i32
  }
  func.func @transform_1(%arg0: i32) -> (i32, i32) {
    %c0_i32 = arith.constant 0 : i32
    %c0_i32_0 = arith.constant 0 : i32
    %c0_i32_1 = arith.constant 0 : i32
    return %c0_i32, %c0_i32_0 : i32, i32
  }
  func.func @transform_2(%arg0: i32) -> (i32, i32) {
    %c0_i32 = arith.constant 0 : i32
    %c0_i32_0 = arith.constant 0 : i32
    %c0_i32_1 = arith.constant 0 : i32
    return %c0_i32, %c0_i32_0 : i32, i32
  }
  func.func @transform_3(%arg0: i32) -> (i32, i32) {
    %c0_i32 = arith.constant 0 : i32
    %c0_i32_0 = arith.constant 0 : i32
    %c0_i32_1 = arith.constant 0 : i32
    return %c0_i32, %c0_i32_0 : i32, i32
  }
  func.func @transform_4(%arg0: i32) -> (i32, i32) {
    %c0_i32 = arith.constant 0 : i32
    %c0_i32_0 = arith.constant 0 : i32
    return %arg0, %c0_i32 : i32, i32
  }
}

module attributes {stable_mosaic.version = 11 : i64} {
  func.func @_fused_matmul_kernel(%arg0: i32, %arg1: memref<32x144xbf16, #tpu.memory_space<vmem>>, %arg2: memref<144x32xbf16, #tpu.memory_space<vmem>>, %arg3: memref<1x32xf32, #tpu.memory_space<vmem>>, %arg4: memref<1x32xf32, #tpu.memory_space<vmem>>, %arg5: memref<32x32xf32, #tpu.memory_space<vmem>>, %arg6: memref<32x32xf32, #tpu.memory_space<vmem>>) attributes {dimension_semantics = [#tpu.dimension_semantics<parallel>], iteration_bounds = array<i64: 1>, scalar_prefetch = 0 : i64, scratch_operands = 0 : i64, tpu.core_type = #tpu.core_type<tc>, window_params = [{transform_indices = @transform_0, window_bounds = array<i64: 32, 144>}, {pipeline_mode = #tpu.pipeline_mode<synchronous>, transform_indices = @transform_1, window_bounds = array<i64: 144, 32>}, {pipeline_mode = #tpu.pipeline_mode<synchronous>, transform_indices = @transform_2, window_bounds = array<i64: 1, 32>}, {pipeline_mode = #tpu.pipeline_mode<synchronous>, transform_indices = @transform_3, window_bounds = array<i64: 1, 32>}, {transform_indices = @transform_4, window_bounds = array<i64: 32, 32>}, {transform_indices = @transform_5, window_bounds = array<i64: 32, 32>}]} {
    %c0 = arith.constant 0 : index
    %c0_0 = arith.constant 0 : index
    %0 = vector.load %arg1[%c0, %c0_0] : memref<32x144xbf16, #tpu.memory_space<vmem>>, vector<32x144xbf16>
    %c0_1 = arith.constant 0 : index
    %c0_2 = arith.constant 0 : index
    %1 = vector.load %arg2[%c0_1, %c0_2] : memref<144x32xbf16, #tpu.memory_space<vmem>>, vector<144x32xbf16>
    %cst = arith.constant dense<0.000000e+00> : vector<32x32xf32>
    %2 = tpu.matmul %0, %1, %cst {dimension_numbers = #tpu.dot_dimension_numbers<[1], [0], [0], [1], [0, 0, 1, 1], [], []>} : vector<32x144xbf16>, vector<144x32xbf16>, vector<32x32xf32> -> vector<32x32xf32>
    %c0_3 = arith.constant 0 : index
    %c0_4 = arith.constant 0 : index
    %3 = vector.load %arg3[%c0_3, %c0_4] : memref<1x32xf32, #tpu.memory_space<vmem>>, vector<1x32xf32>
    %4 = vector.broadcast %3 : vector<1x32xf32> to vector<32x32xf32>
    %5 = arith.mulf %2, %4 : vector<32x32xf32>
    %c0_5 = arith.constant 0 : index
    %c0_6 = arith.constant 0 : index
    %6 = vector.load %arg4[%c0_5, %c0_6] : memref<1x32xf32, #tpu.memory_space<vmem>>, vector<1x32xf32>
    %7 = vector.broadcast %6 : vector<1x32xf32> to vector<32x32xf32>
    %8 = arith.addf %5, %7 : vector<32x32xf32>
    %cst_7 = arith.constant 0.000000e+00 : f32
    %9 = vector.broadcast %cst_7 : f32 to vector<32x32xf32>
    %10 = arith.cmpf ogt, %8, %9 : vector<32x32xf32>
    %cst_8 = arith.constant 0.00999999977 : f32
    %11 = vector.broadcast %cst_8 : f32 to vector<32x32xf32>
    %12 = arith.mulf %11, %8 : vector<32x32xf32>
    %13 = arith.select %10, %8, %12 : vector<32x32xi1>, vector<32x32xf32>
    %c0_9 = arith.constant 0 : index
    %c0_10 = arith.constant 0 : index
    %14 = vector.load %arg5[%c0_9, %c0_10] : memref<32x32xf32, #tpu.memory_space<vmem>>, vector<32x32xf32>
    %15 = arith.addf %13, %14 : vector<32x32xf32>
    %c0_11 = arith.constant 0 : index
    %c0_12 = arith.constant 0 : index
    %16 = vector.load %arg6[%c0_11, %c0_12] : memref<32x32xf32, #tpu.memory_space<vmem>>, vector<32x32xf32>
    tpu.vector_store %arg6[%c0_11, %c0_12], %15 {strides = array<i32>} : memref<32x32xf32, #tpu.memory_space<vmem>>, vector<32x32xf32>,
    return
  }
  func.func @transform_0(%arg0: i32) -> (i32, i32) {
    %c0_i32 = arith.constant 0 : i32
    %c0_i32_0 = arith.constant 0 : i32
    return %arg0, %c0_i32 : i32, i32
  }
  func.func @transform_1(%arg0: i32) -> (i32, i32) {
    %c0_i32 = arith.constant 0 : i32
    %c0_i32_0 = arith.constant 0 : i32
    %c0_i32_1 = arith.constant 0 : i32
    return %c0_i32, %c0_i32_0 : i32, i32
  }
  func.func @transform_2(%arg0: i32) -> (i32, i32) {
    %c0_i32 = arith.constant 0 : i32
    %c0_i32_0 = arith.constant 0 : i32
    %c0_i32_1 = arith.constant 0 : i32
    return %c0_i32, %c0_i32_0 : i32, i32
  }
  func.func @transform_3(%arg0: i32) -> (i32, i32) {
    %c0_i32 = arith.constant 0 : i32
    %c0_i32_0 = arith.constant 0 : i32
    %c0_i32_1 = arith.constant 0 : i32
    return %c0_i32, %c0_i32_0 : i32, i32
  }
  func.func @transform_4(%arg0: i32) -> (i32, i32) {
    %c0_i32 = arith.constant 0 : i32
    %c0_i32_0 = arith.constant 0 : i32
    return %arg0, %c0_i32 : i32, i32
  }
  func.func @transform_5(%arg0: i32) -> (i32, i32) {
    %c0_i32 = arith.constant 0 : i32
    %c0_i32_0 = arith.constant 0 : i32
    return %arg0, %c0_i32 : i32, i32
  }
}

module attributes {stable_mosaic.version = 11 : i64} {
  func.func @_avgpool_kernel(%arg0: i32, %arg1: memref<1x16x32xf32, #tpu.memory_space<vmem>>, %arg2: memref<1x1x32xf32, #tpu.memory_space<vmem>>) attributes {dimension_semantics = [#tpu.dimension_semantics<parallel>], iteration_bounds = array<i64: 2>, scalar_prefetch = 0 : i64, scratch_operands = 0 : i64, tpu.core_type = #tpu.core_type<tc>, window_params = [{transform_indices = @transform_0, window_bounds = array<i64: 1, 16, 32>}, {transform_indices = @transform_1, window_bounds = array<i64: 1, 1, 32>}]} {
    %c0 = arith.constant 0 : index
    %c0_0 = arith.constant 0 : index
    %c0_1 = arith.constant 0 : index
    %0 = vector.load %arg1[%c0, %c0_0, %c0_1] : memref<1x16x32xf32, #tpu.memory_space<vmem>>, vector<1x16x32xf32>
    %cst = arith.constant dense<0.000000e+00> : vector<1x32xf32>
    %1 = vector.multi_reduction <add>, %0, %cst [1] : vector<1x16x32xf32> to vector<1x32xf32>
    %2 = vector.shape_cast %1 : vector<1x32xf32> to vector<1x1x32xf32>
    %cst_2 = arith.constant 6.250000e-02 : f32
    %3 = vector.broadcast %cst_2 : f32 to vector<1x1x32xf32>
    %4 = arith.mulf %2, %3 : vector<1x1x32xf32>
    %c0_3 = arith.constant 0 : index
    %c0_4 = arith.constant 0 : index
    %c0_5 = arith.constant 0 : index
    %5 = vector.load %arg2[%c0_3, %c0_4, %c0_5] : memref<1x1x32xf32, #tpu.memory_space<vmem>>, vector<1x1x32xf32>
    tpu.vector_store %arg2[%c0_3, %c0_4, %c0_5], %4 {strides = array<i32>} : memref<1x1x32xf32, #tpu.memory_space<vmem>>, vector<1x1x32xf32>,
    return
  }
  func.func @transform_0(%arg0: i32) -> (i32, i32, i32) {
    %c0_i32 = arith.constant 0 : i32
    %c0_i32_0 = arith.constant 0 : i32
    %c0_i32_1 = arith.constant 0 : i32
    return %arg0, %c0_i32, %c0_i32_0 : i32, i32, i32
  }
  func.func @transform_1(%arg0: i32) -> (i32, i32, i32) {
    %c0_i32 = arith.constant 0 : i32
    %c0_i32_0 = arith.constant 0 : i32
    %c0_i32_1 = arith.constant 0 : i32
    return %arg0, %c0_i32, %c0_i32_0 : i32, i32, i32
  }
}

</mosaic_0001>

<bundles_post_ra>
// kernel: _lambda_.10
= control target key start
LH: loop header
LB: loop body
LE: loop exit
PB: predicated region body
PF: predicated region fallthrough
CT: control target
= control target key end

     0   :  { %9 = vsyncpa [#allocation3], 0  ;;  %s2563_s0 = inlined_call_operand.vmem [shape: bf16[512,32], index: 0, kind: input, shape index: {}]   ;;  %s2564_s1 = inlined_call_operand.hbm [shape: bf16[32,8], index: 1, kind: input, shape index: {}]   ;;  %s2565_s2 = inlined_call_operand.hbm [shape: f32[1,8], index: 2, kind: input, shape index: {}]   ;;  %s2566_s3 = inlined_call_operand.hbm [shape: f32[1,8], index: 3, kind: input, shape index: {}]   ;;  %s2567_s4 = inlined_call_operand.vmem [shape: f32[512,8], index: 4, kind: output, shape index: {}]  }
   0x1   :  { %10 = vsyncpa [#allocation5], 0  ;;  %s1816_s15 = smov 0  }
   0x2 LB: > { %s1786_s16 = smov [#allocation4]   ;;  %s1322_s18 = sadd.s32 4294967295, %s1784_s15   ;;  %s1784_s15 = sphi %s1816_s15, %s16_s15  }
   0x3   : > { %s162_s17 = sshll.u32 %s1786_s16, 4  ;;  %p1324_p0 = scmp.ge.s32.totalorder %s1784_s15, 1  ;;  %s163_s17 = int_to_ptr.vmem [resolvable:$true] %s162_s17 }
   0x4   : > { %p136_p1 = scmp.lt.s32.totalorder %s1784_s15, 3  ;;  %p1826_p2 = scmp.eq.s32.totalorder %s1322_s18, 0 }
   0x5   : > { %s1787_s21 = smov [#allocation2]   ;;  %s1788_s24 = smov [#allocation6]  }
   0x6   : > { %s2571_s19 = scalar_select %p1826_p2, 1, 0 }
   0x7   : > { %p1830_p3 = pnand %p1324_p0, %p136_p1  ;;  %s148_s22 = sshll.u32 %s1787_s21, 4  ;;  %s1842_s22 = int_to_ptr.vmem [resolvable:$true] %s148_s22 }
   0x8   : > { %s173_s25 = sshll.u32 %s1788_s24, 4  ;;  %s1686_s28 = scalar_lea.hbm %s2565_s2, 16  ;;  %s1844_s25 = int_to_ptr.vmem [resolvable:$true] %s173_s25 }
   0x9   : > { %s2572_s20 = scalar_select %p1830_p3, 1, 0 }
   0xa   : > { %p1445_p4 = pneg %p1830_p3  ;;  %p1687_p6 = scmp.ne.s32.totalorder %s2565_s2, %s1686_s28 }
   0xb   : > { %p1693_p10 = scmp.lt.u32.totalorder %s1686_s28, %s2565_s2 }
   0xc   : > { %p1838_p5 = pnand %p1826_p2, %p1445_p4 }
   0xe   : > { %p1854_p7 = pneg %p1838_p5 }
  0x10   : > { %p1689_p8 = pnand %p1854_p7, %p1687_p6 }
  0x12   : > { %p1690_p9 = pneg %p1689_p8 }
  0x14   : > { %p1695_p11 = pnand %p1693_p10, %p1690_p9 }
  0x16   : > { %1698 = shalt.err (!%p1695_p11)
}
  0x17   : > { %s1699_s8 = scalar_lea.vmem %s163_s17, 16  ;;  %s1706_s9 = scalar_lea.vmem %s163_s17, 32 }
  0x18   : > { %p1700_p12 = scmp.ne.s32.totalorder %s163_s17, %s1699_s8  ;;  %p1707_p1 = scmp.lt.s32.totalorder %s163_s17, %s163_s17 }
  0x19   : > { %p1708_p4 = scmp.lt.s32.totalorder %s1706_s9, %s1699_s8 }
  0x1a   : > { %p1702_p13 = pnand %p1700_p12, %p1854_p7 }
  0x1b   : > { %p1709_p2 = por %p1708_p4, %p1707_p1 }
  0x1c   : > { %p1703_p0 = pneg %p1702_p13 }
  0x1e   : > { %p1710_p3 = pnand %p1709_p2, %p1703_p0 }
  0x20   : > { %1713 = shalt.err (!%p1710_p3)
}
  0x21   : > { %1451 = dma.hbm_to_vmem [thread:$0]  (!%p1838_p5), %s2565_s2, 16, %s163_s17, [#allocation5]  }
  0x22   : > { %s1714_s14 = scalar_lea.hbm %s2564_s1, 256 }
  0x23   : > { %p1715_p6 = scmp.ne.s32.totalorder %s2564_s1, %s1714_s14  ;;  %p1721_p2 = scmp.lt.u32.totalorder %s1714_s14, %s2564_s1 }
  0x25   : > { %p1717_p8 = pnand %p1715_p6, %p1854_p7 }
  0x27   : > { %p1718_p9 = pneg %p1717_p8 }
  0x29   : > { %p1723_p3 = pnand %p1721_p2, %p1718_p9 }
  0x2b   : > { %1726 = shalt.err (!%p1723_p3)
}
  0x2c   : > { %s1727_s17 = scalar_lea.vmem %s1842_s22, 256  ;;  %p1735_p13 = scmp.lt.s32.totalorder %s1842_s22, %s1842_s22 }
  0x2d   : > { %p1728_p10 = scmp.ne.s32.totalorder %s1842_s22, %s1727_s17  ;;  %p1736_p0 = scmp.lt.s32.totalorder %s1727_s17, %s1727_s17 }
  0x2f   : > { %p1730_p11 = pnand %p1728_p10, %p1854_p7  ;;  %p1737_p1 = por %p1736_p0, %p1735_p13 }
  0x31   : > { %p1731_p12 = pneg %p1730_p11 }
  0x33   : > { %p1738_p4 = pnand %p1737_p1, %p1731_p12 }
  0x35   : > { %1741 = shalt.err (!%p1738_p4)
}
  0x36   : > { %s1789_s27 = smov 64   ;;  %s1790_s28 = smov 4  }
  0x37   : > { %1448 = dma.hbm_to_vmem [thread:$0]  (!%p1838_p5), %s2564_s1, 256, %s1842_s22, [#allocation3], %s1789_s27, %s1789_s27, %s1790_s28  }
  0x38   : > { %s1742_s8 = scalar_lea.hbm %s2566_s3, 16 }
  0x39   : > { %p1743_p6 = scmp.ne.s32.totalorder %s2566_s3, %s1742_s8  ;;  %p1749_p2 = scmp.lt.u32.totalorder %s1742_s8, %s2566_s3 }
  0x3b   : > { %p1745_p8 = pnand %p1743_p6, %p1854_p7 }
  0x3d   : > { %p1746_p9 = pneg %p1745_p8 }
  0x3f   : > { %p1751_p3 = pnand %p1749_p2, %p1746_p9 }
  0x41   : > { %1754 = shalt.err (!%p1751_p3)
}
  0x42   : > { %s1755_s22 = scalar_lea.vmem %s1844_s25, 16  ;;  %s1762_s13 = scalar_lea.vmem %s1844_s25, 32 }
  0x43   : > { %p1756_p10 = scmp.ne.s32.totalorder %s1844_s25, %s1755_s22  ;;  %p1763_p13 = scmp.lt.s32.totalorder %s1844_s25, %s1844_s25 }
  0x44   : > { %p1764_p0 = scmp.lt.s32.totalorder %s1762_s13, %s1755_s22 }
  0x45   : > { %p1758_p11 = pnand %p1756_p10, %p1854_p7 }
  0x46   : > { %p1765_p1 = por %p1764_p0, %p1763_p13 }
  0x47   : > { %p1759_p12 = pneg %p1758_p11 }
  0x49   : > { %p1766_p4 = pnand %p1765_p1, %p1759_p12 }
  0x4b   : > { %1769 = shalt.err (!%p1766_p4)
}
  0x4c   : > { %1454 = dma.hbm_to_vmem [thread:$0]  (!%p1838_p5), %s2566_s3, 16, %s1844_s25, [#allocation5]  }
  0x4d   : > { %p2575_p6 = scmp.ne.s32.totalorder %s2572_s20, 0 }
  0x4f   : > { %195 = sbr.rel (%p2575_p6) target bundleno = 498 (0x1f2), region = 36 }
  0x56   : > { %p2576_p7 = scmp.ne.s32.totalorder %s2571_s19, 0 }
  0x58   : > { %1775 = dma.done.wait (%p2576_p7), [#allocation3], 256  }
  0x59   : > { %1777 = vsyncadd (%p2576_p7), [#allocation3], 4294967040 }
  0x5a   : > { %1779 = dma.done.wait (%p2576_p7), [#allocation5], 32  }
  0x5b   : > { %1781 = vsyncadd (%p2576_p7), [#allocation5], 4294967264  ;;  %s1333_s23 = sshll.u32 %s1322_s18, 5  ;;  %v1474_v0 = vld [vmem:[#allocation2] sm:$0xff]   ;;  %v1475_v1 = vld [vmem:[#allocation2 + $0x8] sm:$0xff]   ;;  %vm370_vm0 = vcmask 261120  }
  0x5c   : > { %p230_p8 = scmp.lt.s32.totalorder %s1333_s23, 63  ;;  %1393 = vmatprep.subr.bf16.mxu0 %v1474_v0  ;;  %1429 = vmatprep.subr.bf16.mxu1 %v1474_v0  ;;  %v1969_v18 = vld [vmem:[#allocation4] ss:$0 sm:$0xff]  ;;  %v1971_v20 = vld [vmem:[#allocation6] ss:$0 sm:$0xff]  ;;  %vm1202_vm10 = vcmask 64512  }
  0x5d   : > { %1394 = vmatpush3.bf16.msra.mxu0 %v1474_v0  ;;  %1431 = vmatpush3.bf16.msra.mxu1 %v1474_v0 }
  0x5e   : > { %s2634_s23 = smov (!%p230_p8, %s1333_s23), 63  ;;  %1395 = vmatprep.subr.bf16.mxu0 %v1475_v1  ;;  %1430 = vmatprep.subr.bf16.mxu1 %v1475_v1 }
  0x5f   : > { %s1334_s20 = sshll.u32 %s2634_s23, 2  ;;  %s1336_s18 = sshll.u32 %s2634_s23, 3 }
  0x60   : > { %s1935_s21 = scalar_lea.vmem %s2563_s0, %s1334_s20  ;;  %s2187_s26 = scalar_lea.vmem %s2567_s4, %s1336_s18 }
  0x61   : > { %v1476_v2 = vld [vmem:[%s1935_s21] sm:$0xff]   ;;  %v1478_v4 = vld [vmem:[%s1935_s21 + $0x8] sm:$0xff]   ;;  %v1480_v6 = vld [vmem:[%s1935_s21 + $0x10] sm:$0xff]   ;;  %1396 = vmatpush3.bf16.msra.mxu0 %v1475_v1  ;;  %1432 = vmatpush3.bf16.msra.mxu1 %v1475_v1 }
  0x62   : > { %v1477_v3 = vld [vmem:[%s1935_s21 + $0x40] sm:$0xff]   ;;  %1397 = vmatprep.mubr.msk.bf16.mxu0 %vm370_vm0, %v1476_v2  ;;  %v1479_v5 = vld [vmem:[%s1935_s21 + $0x48] sm:$0xff]   ;;  %v1481_v7 = vld [vmem:[%s1935_s21 + $0x50] sm:$0xff]  }
  0x63   : > { %1413 = vmatprep.mubr.msk.bf16.mxu1 %vm370_vm0, %v1477_v3  ;;  %v1482_v8 = vld [vmem:[%s1935_s21 + $0x18] sm:$0xff]   ;;  %v1484_v10 = vld [vmem:[%s1935_s21 + $0x20] sm:$0xff]   ;;  %v1486_v12 = vld [vmem:[%s1935_s21 + $0x28] sm:$0xff]  }
  0x64   : > { %1398 = vmatmul.mubr.msk.bf16.vlgmr.msra.gmra.mrb[0].mxu0 %vm370_vm0, %v1478_v4  ;;  %1414 = vmatmul.mubr.msk.bf16.vlgmr.msra.gmra.mrb[0].mxu1 %vm370_vm0, %v1479_v5  ;;  %v1483_v9 = vld [vmem:[%s1935_s21 + $0x58] sm:$0xff]   ;;  %v1485_v11 = vld [vmem:[%s1935_s21 + $0x60] sm:$0xff]   ;;  %v1487_v13 = vld [vmem:[%s1935_s21 + $0x68] sm:$0xff]  }
  0x65   : > { %1401 = vmatprep.mubr.msk.bf16.mxu0 %vm370_vm0, %v1480_v6  ;;  %1417 = vmatprep.mubr.msk.bf16.mxu1 %vm370_vm0, %v1481_v7  ;;  %v1488_v14 = vld [vmem:[%s1935_s21 + $0x30] sm:$0xff]   ;;  %v1490_v16 = vld [vmem:[%s1935_s21 + $0x38] sm:$0xff]  }
  0x66   : > { %v1489_v15 = vld [vmem:[%s1935_s21 + $0x70] sm:$0xff]   ;;  %v1491_v17 = vld [vmem:[%s1935_s21 + $0x78] sm:$0xff]  }
  0x6c   : > { %1402 = vmatmul.mubr.msk.bf16.gmra.mrb[4].mxu0 %vm370_vm0, %v1482_v8  ;;  %1418 = vmatmul.mubr.msk.bf16.gmra.mrb[4].mxu1 %vm370_vm0, %v1483_v9 }
  0x6d   : > { %1405 = vmatprep.mubr.msk.bf16.mxu0 %vm370_vm0, %v1484_v10  ;;  %1421 = vmatprep.mubr.msk.bf16.mxu1 %vm370_vm0, %v1485_v11 }
  0x74   : > { %1406 = vmatmul.mubr.msk.bf16.gmra.mrb[8].mxu0 %vm370_vm0, %v1486_v12  ;;  %1422 = vmatmul.mubr.msk.bf16.gmra.mrb[8].mxu1 %vm370_vm0, %v1487_v13 }
  0x75   : > { %1409 = vmatprep.mubr.msk.bf16.mxu0 %vm370_vm0, %v1488_v14  ;;  %1425 = vmatprep.mubr.msk.bf16.mxu1 %vm370_vm0, %v1489_v15 }
  0x7c   : > { %1410 = vmatmul.mubr.msk.bf16.gmra.mrb[12].mxu0 %vm370_vm0, %v1490_v16  ;;  %1426 = vmatmul.mubr.msk.bf16.gmra.mrb[12].mxu1 %vm370_vm0, %v1491_v17 }
 0x137   : > { %v1399_v19 = vpop.f32.mrb[0].mxu0  ;;  %v1415_v21 = vpop.f32.mrb[0].mxu1 }
 0x138   : > { %v589_v22 = vmul.f32 %v1399_v19, %v1969_v18  ;;  %v605_v23 = vmul.f32 %v1415_v21, %v1969_v18  ;;  %v453_v24 = vpop.f32.mrb[1].mxu0  ;;  %v517_v25 = vpop.f32.mrb[1].mxu1 }
 0x139   : > { %v587_v26 = vmul.f32 %v1969_v18, %v453_v24  ;;  %v603_v27 = vmul.f32 %v1969_v18, %v517_v25  ;;  %v1400_v28 = vpop.f32.mrb[2].mxu0  ;;  %v1416_v29 = vpop.f32.mrb[2].mxu1 }
 0x13a   : > { %v1978_v30 = vadd.f32 %v1971_v20, %v589_v22  ;;  %v1981_v31 = vadd.f32 %v1971_v20, %v605_v23  ;;  %v590_v32 = vmul.f32 %v1400_v28, %v1969_v18  ;;  %v606_v33 = vmul.f32 %v1416_v29, %v1969_v18  ;;  %v456_v34 = vpop.f32.mrb[3].mxu0  ;;  %v520_v35 = vpop.f32.mrb[3].mxu1 }
 0x13b   : > { %v1986_v36 = vadd.f32 %v1971_v20, %v587_v26  ;;  %v1989_v37 = vadd.f32 %v1971_v20, %v603_v27  ;;  %v588_v38 = vmul.f32 %v1969_v18, %v456_v34  ;;  %v604_v39 = vmul.f32 %v1969_v18, %v520_v35 }
 0x13c   : > { %v692_v40 = vand.u32 2147483647, %v1978_v30  ;;  %v708_v41 = vand.u32 2147483647, %v1981_v31  ;;  %v1998_v46 = vadd.f32 %v1971_v20, %v590_v32  ;;  %v2001_v47 = vadd.f32 %v1971_v20, %v606_v33 }
 0x13d   : > { %v690_v42 = vand.u32 2147483647, %v1986_v36  ;;  %v706_v43 = vand.u32 2147483647, %v1989_v37  ;;  %v2004_v50 = vadd.f32 %v1971_v20, %v588_v38  ;;  %v2007_v51 = vadd.f32 %v1971_v20, %v604_v39 }
 0x13e   : > { %v724_v44 = vsub.f32 0.0, %v692_v40  ;;  %v740_v45 = vsub.f32 0.0, %v708_v41  ;;  %v693_v58 = vand.u32 2147483647, %v1998_v46  ;;  %v709_v60 = vand.u32 2147483647, %v2001_v47 }
 0x13f   : > { %v722_v48 = vsub.f32 0.0, %v690_v42  ;;  %v738_v49 = vsub.f32 0.0, %v706_v43  ;;  %v1403_v52 = vpop.f32.mrb[4].mxu0  ;;  %v1419_v53 = vpop.f32.mrb[4].mxu1  ;;  %v691_v61 = vand.u32 2147483647, %v2004_v50 }
 0x140   : > { %v758_v54 = vmul.f32 1.442695, %v724_v44  ;;  %v790_v55 = vmul.f32 1.442695, %v740_v45  ;;  %v593_v59 = vmul.f32 %v1403_v52, %v1969_v18  ;;  %v469_v62 = vpop.f32.mrb[5].mxu0  ;;  %v725_v63 = vsub.f32 0.0, %v693_v58 }
 0x141   : > { %v754_v56 = vmul.f32 1.442695, %v722_v48  ;;  %v786_v57 = vmul.f32 1.442695, %v738_v49  ;;  %v707_v0 = vand.u32 2147483647, %v2007_v51  ;;  %v609_v10 = vmul.f32 %v1419_v53, %v1969_v18 }
 0x142   : > { %1492 = vpow2.f32 %v758_v54  ;;  %v533_v1 = vpop.f32.mrb[5].mxu1  ;;  %v1404_v2 = vpop.f32.mrb[6].mxu0  ;;  %v741_v3 = vsub.f32 0.0, %v709_v60  ;;  %v723_v4 = vsub.f32 0.0, %v691_v61  ;;  %v2015_v5 = vadd.f32 %v1971_v20, %v593_v59 }
 0x143   : > { %1494 = vpow2.f32 %v790_v55  ;;  %v1420_v6 = vpop.f32.mrb[6].mxu1  ;;  %v2017_v7 = vpop.f32.mrb[7].mxu0  ;;  %v760_v8 = vmul.f32 1.442695, %v725_v63  ;;  %v739_v9 = vsub.f32 0.0, %v707_v0  ;;  %v591_v15 = vmul.f32 %v1969_v18, %v469_v62 }
 0x144   : > { %1496 = vpow2.f32 %v754_v56  ;;  %v2020_v11 = vpop.f32.mrb[7].mxu1  ;;  %v792_v13 = vmul.f32 1.442695, %v741_v3  ;;  %v756_v14 = vmul.f32 1.442695, %v723_v4  ;;  %v2026_v19 = vadd.f32 %v1971_v20, %v609_v10 }
 0x145   : > { %1498 = vpow2.f32 %v786_v57  ;;  %v788_v16 = vmul.f32 1.442695, %v739_v9  ;;  %v696_v17 = vand.u32 2147483647, %v2015_v5  ;;  %v2034_v24 = vadd.f32 %v1971_v20, %v591_v15 }
 0x146   : > { %1500 = vpow2.f32 %v760_v8  ;;  %v607_v25 = vmul.f32 %v1969_v18, %v533_v1  ;;  %v712_v29 = vand.u32 2147483647, %v2026_v19  ;;  %v594_v32 = vmul.f32 %v1404_v2, %v1969_v18 }
 0x147   : > { %v2028_v21 = vpop.f32.mrb[8].mxu0  ;;  %v2030_v22 = vpop.f32.mrb[8].mxu1  ;;  %1502 = vpow2.f32 %v792_v13  ;;  %v728_v28 = vsub.f32 0.0, %v696_v17  ;;  %v694_v45 = vand.u32 2147483647, %v2034_v24  ;;  %v2067_v63 = vmul.f32 %v1420_v6, %v1969_v18 }
 0x148   : > { %v2037_v26 = vpop.f32.mrb[9].mxu0  ;;  %v2039_v27 = vpop.f32.mrb[9].mxu1  ;;  %1504 = vpow2.f32 %v756_v14  ;;  %v2051_v40 = vadd.f32 %v1971_v20, %v607_v25  ;;  %v744_v54 = vsub.f32 0.0, %v712_v29  ;;  %v2063_v58 = vadd.f32 %v1971_v20, %v594_v32 }
 0x149   : > { %v2043_v33 = vpop.f32.mrb[10].mxu0  ;;  %v2045_v34 = vpop.f32.mrb[10].mxu1  ;;  %1506 = vpow2.f32 %v788_v16  ;;  %v766_v44 = vmul.f32 1.442695, %v728_v28  ;;  %v2069_v3 = vsub.f32 0.0, %v694_v45 }
 0x14a   : > { %v2053_v41 = vpop.f32.mrb[11].mxu0  ;;  %v2055_v42 = vpop.f32.mrb[11].mxu1  ;;  %v2079_v25 = vmul.f32 1.442695, %v744_v54 }
 0x14b   : > { %1508 = vpow2.f32 %v766_v44 }
 0x14c   : > { %v1493_v48 = vpop.eup %1492 }
 0x14d   : > { %v1495_v55 = vpop.eup %1494  ;;  %v836_v56 = vadd.f32 1.0, %v1493_v48  ;;  %v839_v57 = vmul.f32 -0.5, %v1493_v48  ;;  %v842_v1 = vand.u32 2147483647, %v1493_v48 }
 0x14e   : > { %v1497_v59 = vpop.eup %1496  ;;  %v980_v60 = vadd.f32 1.0, %v1495_v55  ;;  %v983_v61 = vmul.f32 -0.5, %v1495_v55  ;;  %v986_v10 = vand.u32 2147483647, %v1495_v55 }
 0x14f   : > { %v1499_v0 = vpop.eup %1498  ;;  %1510 = vlog2.f32 %v836_v56  ;;  %v818_v2 = vadd.f32 1.0, %v1497_v59  ;;  %v2071_v4 = vpop.f32.mrb[12].mxu0  ;;  %v840_v9 = vadd.f32 1.0, %v839_v57  ;;  %v821_v13 = vmul.f32 -0.5, %v1497_v59 }
 0x150   : > { %v2073_v8 = vpop.f32.mrb[12].mxu1  ;;  %1512 = vlog2.f32 %v980_v60  ;;  %v2075_v14 = vpop.f32.mrb[13].mxu0  ;;  %v984_v16 = vadd.f32 1.0, %v983_v61  ;;  %v962_v17 = vadd.f32 1.0, %v1499_v0  ;;  %v824_v45 = vand.u32 2147483647, %v1497_v59 }
 0x151   : > { %2577 = vst [vmem:[#allocation9_spill] sm:$0xff] %v2075_v14  ;;  %v2077_v15 = vpop.f32.mrb[13].mxu1  ;;  %v1501_v6 = vpop.eup %1500  ;;  %1514 = vlog2.f32 %v818_v2  ;;  %v822_v44 = vadd.f32 1.0, %v821_v13  ;;  %v965_v56 = vmul.f32 -0.5, %v1499_v0  ;;  %v2087_v57 = vmul.f32 %v1969_v18, %v2017_v7 }
 0x152   : > { %2578 = vst [vmem:[#allocation10_spill] sm:$0xff] %v2077_v15  ;;  %v2081_v28 = vpop.f32.mrb[14].mxu0  ;;  %v2083_v29 = vpop.f32.mrb[14].mxu1  ;;  %vm2093_vm1 = vcmp.lt.f32.partialorder %v842_v1, 0.0004427343  ;;  %1516 = vlog2.f32 %v962_v17  ;;  %v845_v52 = vadd.f32 1.0, %v1501_v6  ;;  %v841_v13 = vmul.f32 %v1493_v48, %v840_v9 }
 0x153   : > { %2579 = vst [vmem:[#allocation11_spill] sm:$0xff] %v2081_v28  ;;  %2580 = vst [vmem:[#allocation12_spill] sm:$0xff] %v2083_v29  ;;  %v1503_v32 = vpop.eup %1502  ;;  %v2089_v60 = vpop.f32.mrb[15].mxu0  ;;  %v968_v2 = vand.u32 2147483647, %v1499_v0  ;;  %v848_v49 = vmul.f32 -0.5, %v1501_v6  ;;  %v985_v1 = vmul.f32 %v1495_v55, %v984_v16  ;;  %v823_v12 = vmul.f32 %v1497_v59, %v822_v44 }
 0x154   : > { %2581 = vst [vmem:[#allocation13_spill] sm:$0xff] %v2089_v60  ;;  %v2091_v53 = vpop.f32.mrb[15].mxu1  ;;  %v1505_v61 = vpop.eup %1504  ;;  %vm2097_vm2 = vcmp.lt.f32.partialorder %v986_v10, 0.0004427343  ;;  %v966_v7 = vadd.f32 1.0, %v965_v56  ;;  %1518 = vlog2.f32 %v845_v52  ;;  %v989_v35 = vadd.f32 1.0, %v1503_v32 }
 0x155   : > { %2582 = vst [vmem:[#allocation14_spill] sm:$0xff] %v2091_v53  ;;  %v851_v39 = vand.u32 2147483647, %v1501_v6  ;;  %v1507_v62 = vpop.eup %1506  ;;  %v849_v38 = vadd.f32 1.0, %v848_v49  ;;  %v992_v23 = vmul.f32 -0.5, %v1503_v32  ;;  %v827_v17 = vadd.f32 1.0, %v1505_v61 }
 0x156   : > { %vm2101_vm3 = vcmp.lt.f32.partialorder %v824_v45, 0.0004427343  ;;  %v2105_v60 = vpop.eup %1508  ;;  %vm2107_vm4 = vcmp.lt.f32.partialorder %v968_v2, 0.0004427343  ;;  %1520 = vlog2.f32 %v989_v35  ;;  %v995_v10 = vand.u32 2147483647, %v1503_v32 }
 0x157   : > { %v993_v9 = vadd.f32 1.0, %v992_v23  ;;  %v830_v52 = vmul.f32 -0.5, %v1505_v61  ;;  %v967_v49 = vmul.f32 %v1499_v0, %v966_v7  ;;  %1522 = vlog2.f32 %v827_v17 }
 0x158   : > { %v833_v56 = vand.u32 2147483647, %v1505_v61  ;;  %v971_v55 = vadd.f32 1.0, %v1507_v62  ;;  %v850_v16 = vmul.f32 %v1501_v6, %v849_v38  ;;  %vm2111_vm5 = vcmp.lt.f32.partialorder %v851_v39, 0.0004427343 }
 0x159   : > { %v1511_v59 = vpop.eup %1510  ;;  %v831_v45 = vadd.f32 1.0, %v830_v52  ;;  %v974_v29 = vmul.f32 -0.5, %v1507_v62  ;;  %v977_v15 = vand.u32 2147483647, %v1507_v62  ;;  %v872_v23 = vadd.f32 1.0, %v2105_v60 }
 0x15a   : > { %v1513_v2 = vpop.eup %1512  ;;  %v838_v28 = vmul.f32 0.6931472, %v1511_v59  ;;  %1524 = vlog2.f32 %v971_v55  ;;  %v994_v0 = vmul.f32 %v1503_v32, %v993_v9  ;;  %vm2116_vm6 = vcmp.lt.f32.partialorder %v995_v10, 0.0004427343 }
 0x15b   : > { %v1515_v35 = vpop.eup %1514  ;;  %v982_v14 = vmul.f32 0.6931472, %v1513_v2  ;;  %v975_v38 = vadd.f32 1.0, %v974_v29  ;;  %vm2122_vm7 = vcmp.lt.f32.partialorder %v833_v56, 0.0004427343  ;;  %1526 = vlog2.f32 %v872_v23 }
 0x15c   : > { %v844_v39 = vsel %vm2093_vm1, %v841_v13, %v838_v28  ;;  %v820_v6 = vmul.f32 0.6931472, %v1515_v35  ;;  %v875_v52 = vmul.f32 -0.5, %v2105_v60  ;;  %v1517_v55 = vpop.eup %1516  ;;  %v2597_v59 = vmax.f32 %v1978_v30, 0.0 }
 0x15d   : > { %v988_v9 = vsel %vm2097_vm2, %v985_v1, %v982_v14  ;;  %v832_v10 = vmul.f32 %v1505_v61, %v831_v45  ;;  %v878_v29 = vand.u32 2147483647, %v2105_v60  ;;  %v2598_v28 = vmax.f32 %v1981_v31, 0.0 }
 0x15e   : > { %v1108_v32 = vadd.f32 %v844_v39, %v2597_v59  ;;  %v826_v13 = vsel %vm2101_vm3, %v823_v12, %v820_v6  ;;  %v964_v56 = vmul.f32 0.6931472, %v1517_v55  ;;  %vm2136_vm8 = vcmp.lt.f32.partialorder %v977_v15, 0.0004427343  ;;  %v1519_v23 = vpop.eup %1518 }
 0x15f   : > { %v1124_v54 = vadd.f32 %v988_v9, %v2598_v28  ;;  %v2601_v35 = vmax.f32 %v1986_v36, 0.0  ;;  %v976_v14 = vmul.f32 %v1507_v62, %v975_v38  ;;  %v876_v61 = vadd.f32 1.0, %v875_v52 }
 0x160   : > { %1528 = vtanh.f32 %v1108_v32  ;;  %v970_v1 = vsel %vm2107_vm4, %v967_v49, %v964_v56  ;;  %v847_v45 = vmul.f32 0.6931472, %v1519_v23  ;;  %v762_v53 = vmul.f32 1.442695, %v2069_v3  ;;  %v1521_v12 = vpop.eup %1520 }
 0x161   : > { %v1106_v43 = vadd.f32 %v826_v13, %v2601_v35  ;;  %1530 = vtanh.f32 %v1124_v54  ;;  %v2602_v15 = vmax.f32 %v1989_v37, 0.0  ;;  %vm2147_vm9 = vcmp.lt.f32.partialorder %v878_v29, 0.0004427343  ;;  %v1523_v38 = vpop.eup %1522 }
 0x162   : > { %v2605_v55 = vand.u32 2147483647, %v2051_v40  ;;  %v853_v48 = vsel %vm2111_vm5, %v850_v16, %v847_v45  ;;  %v991_v49 = vmul.f32 0.6931472, %v1521_v12  ;;  %v697_v3 = vand.u32 2147483647, %v2063_v58 }
 0x163   : > { %1532 = vtanh.f32 %v1106_v43  ;;  %v1122_v39 = vadd.f32 %v970_v1, %v2602_v15  ;;  %v2606_v52 = vmax.f32 %v1998_v46, 0.0  ;;  %v829_v32 = vmul.f32 0.6931472, %v1523_v38 }
 0x164   : > { %v742_v62 = vsub.f32 0.0, %v2605_v55  ;;  %1534 = vpow2.f32 %v2079_v25  ;;  %v1525_v29 = vpop.eup %1524  ;;  %v997_v28 = vsel %vm2116_vm6, %v994_v0, %v991_v49  ;;  %v729_v54 = vsub.f32 0.0, %v697_v3 }
 0x165   : > { %1536 = vtanh.f32 %v1122_v39  ;;  %v1109_v59 = vadd.f32 %v853_v48, %v2606_v52  ;;  %v2163_v16 = vadd.f32 %v1971_v20, %v2067_v63  ;;  %v2607_v25 = vmax.f32 %v2001_v47, 0.0  ;;  %v1527_v23 = vpop.eup %1526 }
 0x166   : > { %v794_v9 = vmul.f32 1.442695, %v742_v62  ;;  %1538 = vpow2.f32 %v762_v53  ;;  %v835_v13 = vsel %vm2122_vm7, %v832_v10, %v829_v32  ;;  %v973_v56 = vmul.f32 0.6931472, %v1525_v29 }
 0x167   : > { %1540 = vtanh.f32 %v1109_v59  ;;  %v1125_v44 = vadd.f32 %v997_v28, %v2607_v25  ;;  %v2608_v35 = vmax.f32 %v2004_v50, 0.0  ;;  %v877_v0 = vmul.f32 %v2105_v60, %v876_v61 }
 0x168   : > { %1542 = vpow2.f32 %v794_v9  ;;  %v768_v43 = vmul.f32 1.442695, %v729_v54  ;;  %v979_v63 = vsel %vm2136_vm8, %v976_v14, %v973_v56  ;;  %v874_v1 = vmul.f32 0.6931472, %v1527_v23 }
 0x169   : > { %v1107_v7 = vadd.f32 %v835_v13, %v2608_v35  ;;  %1544 = vtanh.f32 %v1125_v44  ;;  %v713_v45 = vand.u32 2147483647, %v2163_v16  ;;  %v2609_v17 = vmax.f32 %v2007_v51, 0.0 }
 0x16a   : > { %v2180_v53 = vadd.f32 %v1971_v20, %v2087_v57  ;;  %v608_v60 = vmul.f32 %v1969_v18, %v2020_v11  ;;  %v1529_v61 = vpop.eup %1528  ;;  %v880_v2 = vsel %vm2147_vm9, %v877_v0, %v874_v1  ;;  %v2610_v11 = vmax.f32 %v2015_v5, 0.0 }
 0x16b   : > { %1546 = vtanh.f32 %v1107_v7  ;;  %v1123_v10 = vadd.f32 %v979_v63, %v2609_v17  ;;  %v745_v14 = vsub.f32 0.0, %v713_v45  ;;  %v1531_v12 = vpop.eup %1530  ;;  %v1172_v57 = vmul.f32 %v1529_v61, %v1978_v30 }
 0x16c   : > { %1548 = vpow2.f32 %v768_v43  ;;  %v1112_v15 = vadd.f32 %v880_v2, %v2610_v11  ;;  %v1188_v55 = vmul.f32 %v1531_v12, %v1981_v31  ;;  %v695_v38 = vand.u32 2147483647, %v2180_v53 }
 0x16d   : > { %1550 = vtanh.f32 %v1123_v10  ;;  %v1533_v39 = vpop.eup %1532  ;;  %v800_v62 = vmul.f32 1.442695, %v745_v14  ;;  %v2197_v6 = vadd.f32 %v1971_v20, %v608_v60  ;;  %1205 = vst.msk [vmem:[%s2187_s26 + $0x10] sm:$0xff] %vm1202_vm10, %v1172_v57  ;;  %v597_v32 = vmul.f32 %v2028_v21, %v1969_v18 }
 0x16e   : > { %v1535_v48 = vpop.eup %1534  ;;  %v1170_v49 = vmul.f32 %v1533_v39, %v1986_v36  ;;  %1552 = vtanh.f32 %v1112_v15  ;;  %1221 = vst.msk [vmem:[%s2187_s26 + $0x90] sm:$0xff] %vm1202_vm10, %v1188_v55  ;;  %v727_v59 = vsub.f32 0.0, %v695_v38  ;;  %v680_v25 = vmax.f32 %v2026_v19, 0.0 }
 0x16f   : > { %v1537_v30 = vpop.eup %1536  ;;  %v1016_v3 = vadd.f32 1.0, %v1535_v48  ;;  %1554 = vpow2.f32 %v800_v62  ;;  %v711_v29 = vand.u32 2147483647, %v2197_v6  ;;  %v1019_v44 = vmul.f32 -0.5, %v1535_v48 }
 0x170   : > { %v1539_v52 = vpop.eup %1538  ;;  %1203 = vst.msk [vmem:[%s2187_s26] sm:$0xff] %vm1202_vm10, %v1170_v49  ;;  %v1186_v31 = vmul.f32 %v1537_v30, %v1989_v37  ;;  %v662_v37 = vmax.f32 %v2034_v24, 0.0  ;;  %v764_v23 = vmul.f32 1.442695, %v727_v59  ;;  %v678_v0 = vmax.f32 %v2051_v40, 0.0 }
 0x171   : > { %v1541_v9 = vpop.eup %1540  ;;  %1556 = vlog2.f32 %v1016_v3  ;;  %v854_v36 = vadd.f32 1.0, %v1539_v52  ;;  %v857_v21 = vmul.f32 -0.5, %v1539_v52  ;;  %v613_v43 = vmul.f32 %v2030_v22, %v1969_v18 }
 0x172   : > { %v1543_v28 = vpop.eup %1542  ;;  %1219 = vst.msk [vmem:[%s2187_s26 + $0x80] sm:$0xff] %vm1202_vm10, %v1186_v31  ;;  %v1173_v54 = vmul.f32 %v1541_v9, %v1998_v46  ;;  %v2220_v46 = vadd.f32 %v1971_v20, %v597_v32  ;;  %v743_v17 = vsub.f32 0.0, %v711_v29  ;;  %v1022_v60 = vand.u32 2147483647, %v1535_v48 }
 0x173   : > { %v1545_v13 = vpop.eup %1544  ;;  %1558 = vlog2.f32 %v854_v36  ;;  %v998_v56 = vadd.f32 1.0, %v1543_v28  ;;  %v1001_v45 = vmul.f32 -0.5, %v1543_v28  ;;  %v860_v61 = vand.u32 2147483647, %v1539_v52 }
 0x174   : > { %1206 = vst.msk [vmem:[%s2187_s26 + $0x18] sm:$0xff] %vm1202_vm10, %v1173_v54  ;;  %v1189_v7 = vmul.f32 %v1545_v13, %v2001_v47  ;;  %v1020_v47 = vadd.f32 1.0, %v1019_v44  ;;  %v858_v14 = vadd.f32 1.0, %v857_v21  ;;  %v665_v12 = vmax.f32 %v2063_v58, 0.0 }
 0x175   : > { %v1547_v35 = vpop.eup %1546  ;;  %1560 = vlog2.f32 %v998_v56  ;;  %v1004_v57 = vand.u32 2147483647, %v1543_v28  ;;  %v796_v15 = vmul.f32 1.442695, %v743_v17  ;;  %v1002_v62 = vadd.f32 1.0, %v1001_v45 }
 0x176   : > { %v2224_v63 = vpop.eup %1548  ;;  %v1171_v1 = vmul.f32 %v1547_v35, %v2004_v50  ;;  %1222 = vst.msk [vmem:[%s2187_s26 + $0x98] sm:$0xff] %vm1202_vm10, %v1189_v7  ;;  %1562 = vpow2.f32 %v764_v23  ;;  %v2242_v38 = vadd.f32 %v1971_v20, %v613_v43  ;;  %v1021_v49 = vmul.f32 %v1535_v48, %v1020_v47 }
 0x177   : > { %v1551_v10 = vpop.eup %1550  ;;  %v881_v2 = vadd.f32 1.0, %v2224_v63  ;;  %v884_v11 = vmul.f32 -0.5, %v2224_v63  ;;  %vm2244_vm11 = vcmp.lt.f32.partialorder %v1022_v60, 0.0004427343  ;;  %vm2248_vm12 = vcmp.lt.f32.partialorder %v860_v61, 0.0004427343 }
 0x178   : > { %1204 = vst.msk [vmem:[%s2187_s26 + $0x8] sm:$0xff] %vm1202_vm10, %v1171_v1  ;;  %v1187_v22 = vmul.f32 %v1551_v10, %v2007_v51  ;;  %v1553_v50 = vpop.eup %1552  ;;  %v700_v51 = vand.u32 2147483647, %v2220_v46  ;;  %v716_v9 = vand.u32 2147483647, %v2242_v38  ;;  %v1003_v44 = vmul.f32 %v1543_v28, %v1002_v62 }
 0x179   : > { %1564 = vlog2.f32 %v881_v2  ;;  %v2235_v39 = vpop.eup %1554  ;;  %v1176_v55 = vmul.f32 %v1553_v50, %v2015_v5  ;;  %v859_v5 = vmul.f32 %v1539_v52, %v858_v14  ;;  %vm2256_vm13 = vcmp.lt.f32.partialorder %v1004_v57, 0.0004427343 }
 0x17a   : > { %1220 = vst.msk [vmem:[%s2187_s26 + $0x88] sm:$0xff] %vm1202_vm10, %v1187_v22  ;;  %v1025_v31 = vadd.f32 1.0, %v2235_v39  ;;  %1566 = vpow2.f32 %v796_v15  ;;  %v732_v32 = vsub.f32 0.0, %v700_v51  ;;  %v885_v29 = vadd.f32 1.0, %v884_v11 }
 0x17b   : > { %v1557_v59 = vpop.eup %1556  ;;  %1209 = vst.msk [vmem:[%s2187_s26 + $0x30] sm:$0xff] %vm1202_vm10, %v1176_v55  ;;  %v595_v21 = vmul.f32 %v1969_v18, %v2037_v26  ;;  %v611_v52 = vmul.f32 %v1969_v18, %v2039_v27  ;;  %v1028_v35 = vmul.f32 -0.5, %v2235_v39  ;;  %v748_v7 = vsub.f32 0.0, %v716_v9 }
 0x17c   : > { %v1018_v36 = vmul.f32 0.6931472, %v1557_v59  ;;  %1568 = vlog2.f32 %v1025_v31  ;;  %v774_v13 = vmul.f32 1.442695, %v732_v32  ;;  %v887_v28 = vand.u32 2147483647, %v2224_v63 }
 0x17d   : > { %v1559_v54 = vpop.eup %1558  ;;  %v2271_v45 = vadd.f32 %v1971_v20, %v595_v21  ;;  %v886_v17 = vmul.f32 %v2224_v63, %v885_v29  ;;  %v598_v10 = vmul.f32 %v2043_v33, %v1969_v18  ;;  %v2284_v61 = vadd.f32 %v1971_v20, %v611_v52 }
 0x17e   : > { %v1024_v56 = vsel %vm2244_vm11, %v1021_v49, %v1018_v36  ;;  %v856_v23 = vmul.f32 0.6931472, %v1559_v54  ;;  %1570 = vpow2.f32 %v774_v13  ;;  %v1029_v14 = vadd.f32 1.0, %v1028_v35 }
 0x17f   : > { %v1561_v43 = vpop.eup %1560  ;;  %v1128_v1 = vadd.f32 %v1024_v56, %v680_v25  ;;  %v698_v60 = vand.u32 2147483647, %v2271_v45  ;;  %v806_v50 = vmul.f32 1.442695, %v748_v7  ;;  %vm888_vm14 = vcmp.lt.f32.partialorder %v887_v28, 0.0004427343 }
 0x180   : > { %v862_v26 = vsel %vm2248_vm12, %v859_v5, %v856_v23  ;;  %v1000_v27 = vmul.f32 0.6931472, %v1561_v43  ;;  %v2278_v47 = vpop.eup %1562  ;;  %v2293_v15 = vadd.f32 %v1971_v20, %v598_v10  ;;  %v681_v51 = vmax.f32 %v2163_v16, 0.0 }
 0x181   : > { %1572 = vtanh.f32 %v1128_v1  ;;  %v1110_v25 = vadd.f32 %v862_v26, %v662_v37  ;;  %v863_v63 = vadd.f32 1.0, %v2278_v47  ;;  %v730_v11 = vsub.f32 0.0, %v698_v60 }
 0x182   : > { %v1006_v22 = vsel %vm2256_vm13, %v1003_v44, %v1000_v27  ;;  %v1031_v37 = vand.u32 2147483647, %v2235_v39  ;;  %v714_v49 = vand.u32 2147483647, %v2284_v61  ;;  %v1030_v3 = vmul.f32 %v2235_v39, %v1029_v14 }
 0x183   : > { %v1565_v2 = vpop.eup %1564  ;;  %1574 = vtanh.f32 %v1110_v25  ;;  %v1126_v33 = vadd.f32 %v1006_v22, %v678_v0  ;;  %v866_v31 = vmul.f32 -0.5, %v2278_v47  ;;  %v770_v32 = vmul.f32 1.442695, %v730_v11 }
 0x184   : > { %v883_v57 = vmul.f32 0.6931472, %v1565_v2  ;;  %1576 = vlog2.f32 %v863_v63  ;;  %v2295_v55 = vpop.eup %1566  ;;  %v746_v9 = vsub.f32 0.0, %v714_v49  ;;  %vm1032_vm15 = vcmp.lt.f32.partialorder %v1031_v37, 0.0004427343 }
 0x185   : > { %1578 = vtanh.f32 %v1126_v33  ;;  %v1007_v59 = vadd.f32 1.0, %v2295_v55  ;;  %v663_v36 = vmax.f32 %v2180_v53, 0.0  ;;  %v701_v48 = vand.u32 2147483647, %v2293_v15 }
 0x186   : > { %v889_v62 = vsel %vm888_vm14, %v886_v17, %v883_v57  ;;  %v1569_v30 = vpop.eup %1568  ;;  %1580 = vpow2.f32 %v806_v50  ;;  %v668_v39 = vmax.f32 %v2220_v46, 0.0  ;;  %v869_v13 = vand.u32 2147483647, %v2278_v47 }
 0x187   : > { %v1113_v0 = vadd.f32 %v889_v62, %v665_v12  ;;  %v1027_v5 = vmul.f32 0.6931472, %v1569_v30  ;;  %v679_v12 = vmax.f32 %v2197_v6, 0.0  ;;  %v802_v52 = vmul.f32 1.442695, %v746_v9 }
 0x188   : > { %v2306_v29 = vpop.eup %1570  ;;  %v867_v23 = vadd.f32 1.0, %v866_v31  ;;  %v733_v35 = vsub.f32 0.0, %v701_v48  ;;  %v614_v7 = vmul.f32 %v2045_v34, %v1969_v18  ;;  %v1010_v1 = vmul.f32 -0.5, %v2295_v55 }
 0x189   : > { %1582 = vtanh.f32 %v1113_v0  ;;  %v1033_v54 = vsel %vm1032_vm15, %v1030_v3, %v1027_v5  ;;  %v908_v21 = vadd.f32 1.0, %v2306_v29  ;;  %v596_v28 = vmul.f32 %v1969_v18, %v2053_v41 }
 0x18a   : > { %1584 = vlog2.f32 %v1007_v59  ;;  %v1129_v44 = vadd.f32 %v1033_v54, %v681_v51  ;;  %v684_v27 = vmax.f32 %v2242_v38, 0.0  ;;  %v776_v17 = vmul.f32 1.442695, %v733_v35 }
 0x18b   : > { %v1573_v56 = vpop.eup %1572  ;;  %1586 = vpow2.f32 %v770_v32  ;;  %v2320_v10 = vadd.f32 %v1971_v20, %v614_v7  ;;  %v911_v34 = vmul.f32 -0.5, %v2306_v29  ;;  %v2327_v60 = vadd.f32 %v1971_v20, %v596_v28 }
 0x18c   : > { %v1192_v43 = vmul.f32 %v1573_v56, %v2026_v19  ;;  %1588 = vtanh.f32 %v1129_v44  ;;  %v868_v22 = vmul.f32 %v2278_v47, %v867_v23  ;;  %vm870_vm0 = vcmp.lt.f32.partialorder %v869_v13, 0.0004427343 }
 0x18d   : > { %v1575_v26 = vpop.eup %1574  ;;  %1590 = vlog2.f32 %v908_v21  ;;  %v717_v14 = vand.u32 2147483647, %v2320_v10  ;;  %v612_v50 = vmul.f32 %v1969_v18, %v2055_v42  ;;  %v1013_v11 = vand.u32 2147483647, %v2295_v55 }
 0x18e   : > { %v1577_v25 = vpop.eup %1576  ;;  %1225 = vst.msk [vmem:[%s2187_s26 + $0xb0] sm:$0xff] %vm1202_vm10, %v1192_v43  ;;  %v1174_v19 = vmul.f32 %v1575_v26, %v2034_v24  ;;  %1592 = vpow2.f32 %v802_v52  ;;  %v1011_v24 = vadd.f32 1.0, %v1010_v1  ;;  %v914_v37 = vand.u32 2147483647, %v2306_v29 }
 0x18f   : > { %v1579_v41 = vpop.eup %1578  ;;  %v865_v2 = vmul.f32 0.6931472, %v1577_v25  ;;  %1594 = vpow2.f32 %v776_v17  ;;  %v749_v47 = vsub.f32 0.0, %v717_v14  ;;  %v912_v49 = vadd.f32 1.0, %v911_v34 }
 0x190   : > { %1207 = vst.msk [vmem:[%s2187_s26 + $0x20] sm:$0xff] %vm1202_vm10, %v1174_v19  ;;  %v1190_v63 = vmul.f32 %v1579_v41, %v2051_v40  ;;  %v2336_v33 = vpop.eup %1580  ;;  %v699_v30 = vand.u32 2147483647, %v2327_v60  ;;  %v666_v3 = vmax.f32 %v2271_v45, 0.0  ;;  %v2347_v59 = vadd.f32 %v1971_v20, %v612_v50 }
 0x191   : > { %v871_v57 = vsel %vm870_vm0, %v868_v22, %v865_v2  ;;  %v1052_v40 = vadd.f32 1.0, %v2336_v33  ;;  %v808_v31 = vmul.f32 1.442695, %v749_v47  ;;  %v1012_v32 = vmul.f32 %v2295_v55, %v1011_v24 }
 0x192   : > { %1223 = vst.msk [vmem:[%s2187_s26 + $0xa0] sm:$0xff] %vm1202_vm10, %v1190_v63  ;;  %v1111_v51 = vadd.f32 %v871_v57, %v663_v36  ;;  %v682_v9 = vmax.f32 %v2284_v61, 0.0  ;;  %vm1014_vm1 = vcmp.lt.f32.partialorder %v1013_v11, 0.0004427343  ;;  %vm2353_vm2 = vcmp.lt.f32.partialorder %v914_v37, 0.0004427343 }
 0x193   : > { %v1583_v62 = vpop.eup %1582  ;;  %v913_v13 = vmul.f32 %v2306_v29, %v912_v49  ;;  %v731_v55 = vsub.f32 0.0, %v699_v30  ;;  %v1055_v35 = vmul.f32 -0.5, %v2336_v33  ;;  %v601_v28 = vmul.f32 %v2071_v4, %v1969_v18 }
 0x194   : > { %v1585_v0 = vpop.eup %1584  ;;  %v1177_v42 = vmul.f32 %v1583_v62, %v2063_v58  ;;  %1596 = vtanh.f32 %v1111_v51  ;;  %v715_v58 = vand.u32 2147483647, %v2347_v59  ;;  %v1058_v4 = vand.u32 2147483647, %v2336_v33 }
 0x195   : > { %v1009_v5 = vmul.f32 0.6931472, %v1585_v0  ;;  %v1587_v36 = vpop.eup %1586  ;;  %1598 = vlog2.f32 %v1052_v40  ;;  %v772_v34 = vmul.f32 1.442695, %v731_v55  ;;  %v1056_v2 = vadd.f32 1.0, %v1055_v35 }
 0x196   : > { %1210 = vst.msk [vmem:[%s2187_s26 + $0x38] sm:$0xff] %vm1202_vm10, %v1177_v42  ;;  %v1589_v54 = vpop.eup %1588  ;;  %v890_v21 = vadd.f32 1.0, %v1587_v36  ;;  %1600 = vpow2.f32 %v808_v31  ;;  %v747_v1 = vsub.f32 0.0, %v715_v58  ;;  %v893_v29 = vmul.f32 -0.5, %v1587_v36 }
 0x197   : > { %v1015_v44 = vsel %vm1014_vm1, %v1012_v32, %v1009_v5  ;;  %v1591_v52 = vpop.eup %1590  ;;  %v1193_v56 = vmul.f32 %v1589_v54, %v2163_v16  ;;  %v617_v16 = vmul.f32 %v2073_v8, %v1969_v18  ;;  %v896_v22 = vand.u32 2147483647, %v1587_v36 }
 0x198   : > { %v1127_v23 = vadd.f32 %v1015_v44, %v679_v12  ;;  %v1593_v7 = vpop.eup %1592  ;;  %v910_v43 = vmul.f32 0.6931472, %v1591_v52  ;;  %1602 = vlog2.f32 %v890_v21  ;;  %v804_v63 = vmul.f32 1.442695, %v747_v1  ;;  %v2412_v1 = vld [vmem:[#allocation4] ss:$0 sm:$0xff] }
 0x199   : > { %v1595_v26 = vpop.eup %1594  ;;  %1226 = vst.msk [vmem:[%s2187_s26 + $0xb8] sm:$0xff] %vm1202_vm10, %v1193_v56  ;;  %v1034_v17 = vadd.f32 1.0, %v1593_v7  ;;  %v1037_v25 = vmul.f32 -0.5, %v1593_v7  ;;  %v894_v24 = vadd.f32 1.0, %v893_v29  ;;  %v1040_v8 = vand.u32 2147483647, %v1593_v7 }
 0x19a   : > { %1604 = vtanh.f32 %v1127_v23  ;;  %v916_v12 = vsel %vm2353_vm2, %v913_v13, %v910_v43  ;;  %v917_v19 = vadd.f32 1.0, %v1595_v26  ;;  %v920_v14 = vmul.f32 -0.5, %v1595_v26 }
 0x19b   : > { %v1116_v41 = vadd.f32 %v916_v12, %v668_v39  ;;  %1606 = vlog2.f32 %v1034_v17  ;;  %v2375_v50 = vadd.f32 %v1971_v20, %v601_v28  ;;  %v1038_v11 = vadd.f32 1.0, %v1037_v25  ;;  %v2619_v39 = vld [vmem:[#allocation9_spill] sm:$0xff] }
 0x19c   : > { %1608 = vlog2.f32 %v917_v19  ;;  %v669_v37 = vmax.f32 %v2293_v15, 0.0  ;;  %v599_v47 = vmul.f32 %v1969_v18, %v2619_v39  ;;  %v923_v49 = vand.u32 2147483647, %v1595_v26 }
 0x19d   : > { %1610 = vtanh.f32 %v1116_v41  ;;  %v2382_v40 = vadd.f32 %v1971_v20, %v617_v16  ;;  %v1057_v0 = vmul.f32 %v2336_v33, %v1056_v2  ;;  %v921_v42 = vadd.f32 1.0, %v920_v14  ;;  %v2627_v16 = vld [vmem:[#allocation11_spill] sm:$0xff] }
 0x19e   : > { %v1597_v57 = vpop.eup %1596  ;;  %1612 = vpow2.f32 %v772_v34  ;;  %v704_v31 = vand.u32 2147483647, %v2375_v50  ;;  %vm1059_vm3 = vcmp.lt.f32.partialorder %v1058_v4, 0.0004427343  ;;  %v895_v18 = vmul.f32 %v1587_v36, %v894_v24 }
 0x19f   : > { %v1599_v62 = vpop.eup %1598  ;;  %v1175_v51 = vmul.f32 %v1597_v57, %v2180_v53  ;;  %1614 = vpow2.f32 %v804_v63  ;;  %vm2390_vm4 = vcmp.lt.f32.partialorder %v896_v22, 0.0004427343  ;;  %vm2394_vm5 = vcmp.lt.f32.partialorder %v1040_v8, 0.0004427343  ;;  %v2628_v22 = vld [vmem:[#allocation12_spill] sm:$0xff] }
 0x1a0   : > { %v1054_v30 = vmul.f32 0.6931472, %v1599_v62  ;;  %v2386_v5 = vpop.eup %1600  ;;  %v1039_v33 = vmul.f32 %v1593_v7, %v1038_v11  ;;  %v2400_v44 = vadd.f32 %v1971_v20, %v599_v47  ;;  %v736_v55 = vsub.f32 0.0, %v704_v31  ;;  %v1685_v62 = vld [vmem:[#allocation6] ss:$0 sm:$0xff] }
 0x1a1   : > { %1208 = vst.msk [vmem:[%s2187_s26 + $0x28] sm:$0xff] %vm1202_vm10, %v1175_v51  ;;  %v1061_v54 = vadd.f32 1.0, %v2386_v5  ;;  %v720_v52 = vand.u32 2147483647, %v2382_v40  ;;  %v922_v23 = vmul.f32 %v1595_v26, %v921_v42  ;;  %vm2406_vm6 = vcmp.lt.f32.partialorder %v923_v49, 0.0004427343 }
 0x1a2   : > { %v1603_v48 = vpop.eup %1602  ;;  %v1060_v58 = vsel %vm1059_vm3, %v1057_v0, %v1054_v30  ;;  %v782_v43 = vmul.f32 1.442695, %v736_v55  ;;  %v1064_v17 = vmul.f32 -0.5, %v2386_v5  ;;  %v602_v12 = vmul.f32 %v2412_v1, %v2627_v16 }
 0x1a3   : > { %v1132_v36 = vadd.f32 %v1060_v58, %v684_v27  ;;  %v892_v21 = vmul.f32 0.6931472, %v1603_v48  ;;  %1616 = vlog2.f32 %v1061_v54  ;;  %v2626_v27 = vld [vmem:[#allocation10_spill] sm:$0xff]  ;;  %v752_v34 = vsub.f32 0.0, %v720_v52 }
 0x1a4   : > { %v1605_v13 = vpop.eup %1604  ;;  %v615_v28 = vmul.f32 %v2412_v1, %v2626_v27  ;;  %v702_v41 = vand.u32 2147483647, %v2400_v44  ;;  %v618_v14 = vmul.f32 %v2412_v1, %v2628_v22  ;;  %v1067_v57 = vand.u32 2147483647, %v2386_v5 }
 0x1a5   : > { %v1191_v56 = vmul.f32 %v1605_v13, %v2197_v6  ;;  %v1607_v7 = vpop.eup %1606  ;;  %1618 = vtanh.f32 %v1132_v36  ;;  %v898_v20 = vsel %vm2390_vm4, %v895_v18, %v892_v21  ;;  %v1065_v39 = vadd.f32 1.0, %v1064_v17  ;;  %v2631_v21 = vld [vmem:[#allocation13_spill] sm:$0xff] }
 0x1a6   : > { %v1609_v29 = vpop.eup %1608  ;;  %v1114_v6 = vadd.f32 %v898_v20, %v666_v3  ;;  %v1036_v26 = vmul.f32 0.6931472, %v1607_v7  ;;  %1620 = vpow2.f32 %v782_v43  ;;  %v2442_v51 = vadd.f32 %v1685_v62, %v615_v28 }
 0x1a7   : > { %1224 = vst.msk [vmem:[%s2187_s26 + $0xa8] sm:$0xff] %vm1202_vm10, %v1191_v56  ;;  %v1611_v25 = vpop.eup %1610  ;;  %v919_v19 = vmul.f32 0.6931472, %v1609_v29  ;;  %v814_v49 = vmul.f32 1.442695, %v752_v34  ;;  %v734_v30 = vsub.f32 0.0, %v702_v41  ;;  %v1066_v18 = vmul.f32 %v2386_v5, %v1065_v39 }
 0x1a8   : > { %v2424_v2 = vpop.eup %1612  ;;  %v1180_v4 = vmul.f32 %v1611_v25, %v2220_v46  ;;  %1622 = vtanh.f32 %v1114_v6  ;;  %v1042_v3 = vsel %vm2394_vm5, %v1039_v33, %v1036_v26  ;;  %v685_v0 = vmax.f32 %v2320_v10, 0.0 }
 0x1a9   : > { %v2431_v63 = vpop.eup %1614  ;;  %v1130_v24 = vadd.f32 %v1042_v3, %v682_v9  ;;  %v925_v8 = vsel %vm2406_vm6, %v922_v23, %v919_v19  ;;  %v899_v11 = vadd.f32 1.0, %v2424_v2  ;;  %v2444_v9 = vadd.f32 %v1685_v62, %v602_v12  ;;  %v2632_v19 = vld [vmem:[#allocation14_spill] sm:$0xff] }
 0x1aa   : > { %1213 = vst.msk [vmem:[%s2187_s26 + $0x50] sm:$0xff] %vm1202_vm10, %v1180_v4  ;;  %v1117_v46 = vadd.f32 %v925_v8, %v669_v37  ;;  %v1043_v47 = vadd.f32 1.0, %v2431_v63  ;;  %vm2447_vm7 = vcmp.lt.f32.partialorder %v1067_v57, 0.0004427343  ;;  %v778_v37 = vmul.f32 1.442695, %v734_v30 }
 0x1ab   : > { %1624 = vtanh.f32 %v1130_v24  ;;  %v902_v32 = vmul.f32 -0.5, %v2424_v2  ;;  %v718_v53 = vand.u32 2147483647, %v2442_v51  ;;  %v705_v33 = vand.u32 2147483647, %v2444_v9 }
 0x1ac   : > { %1626 = vtanh.f32 %v1117_v46  ;;  %v2455_v54 = vadd.f32 %v1685_v62, %v618_v14  ;;  %v600_v5 = vmul.f32 %v2412_v1, %v2631_v21  ;;  %v1046_v56 = vmul.f32 -0.5, %v2431_v63 }
 0x1ad   : > { %1628 = vlog2.f32 %v899_v11  ;;  %v1617_v31 = vpop.eup %1616  ;;  %v750_v36 = vsub.f32 0.0, %v718_v53  ;;  %v737_v23 = vsub.f32 0.0, %v705_v33  ;;  %v903_v6 = vadd.f32 1.0, %v902_v32 }
 0x1ae   : > { %1630 = vlog2.f32 %v1043_v47  ;;  %v1063_v58 = vmul.f32 0.6931472, %v1617_v31  ;;  %v721_v35 = vand.u32 2147483647, %v2455_v54  ;;  %v905_v26 = vand.u32 2147483647, %v2424_v2 }
 0x1af   : > { %v1619_v48 = vpop.eup %1618  ;;  %1632 = vpow2.f32 %v814_v49  ;;  %v810_v27 = vmul.f32 1.442695, %v750_v36  ;;  %v784_v28 = vmul.f32 1.442695, %v737_v23  ;;  %v2471_v17 = vadd.f32 %v1685_v62, %v600_v5 }
 0x1b0   : > { %v1196_v13 = vmul.f32 %v1619_v48, %v2242_v38  ;;  %1634 = vpow2.f32 %v778_v37  ;;  %v2460_v55 = vpop.eup %1620  ;;  %v1069_v52 = vsel %vm2447_vm7, %v1066_v18, %v1063_v58  ;;  %v753_v29 = vsub.f32 0.0, %v721_v35 }
 0x1b1   : > { %v1133_v38 = vadd.f32 %v1069_v52, %v685_v0  ;;  %v944_v20 = vadd.f32 1.0, %v2460_v55  ;;  %v1047_v12 = vadd.f32 1.0, %v1046_v56  ;;  %v616_v34 = vmul.f32 %v2412_v1, %v2632_v19 }
 0x1b2   : > { %v1623_v7 = vpop.eup %1622  ;;  %1229 = vst.msk [vmem:[%s2187_s26 + $0xd0] sm:$0xff] %vm1202_vm10, %v1196_v13  ;;  %v816_v25 = vmul.f32 1.442695, %v753_v29  ;;  %v667_v4 = vmax.f32 %v2327_v60, 0.0  ;;  %v1049_v3 = vand.u32 2147483647, %v2431_v63 }
 0x1b3   : > { %v1178_v43 = vmul.f32 %v1623_v7, %v2271_v45  ;;  %1636 = vtanh.f32 %v1133_v38  ;;  %v703_v24 = vand.u32 2147483647, %v2471_v17  ;;  %v2482_v8 = vadd.f32 %v1685_v62, %v616_v34 }
 0x1b4   : > { %1638 = vlog2.f32 %v944_v20  ;;  %v947_v11 = vmul.f32 -0.5, %v2460_v55  ;;  %vm906_vm8 = vcmp.lt.f32.partialorder %v905_v26, 0.0004427343  ;;  %v683_v30 = vmax.f32 %v2347_v59, 0.0 }
 0x1b5   : > { %v1625_v16 = vpop.eup %1624  ;;  %1211 = vst.msk [vmem:[%s2187_s26 + $0x40] sm:$0xff] %vm1202_vm10, %v1178_v43  ;;  %1640 = vpow2.f32 %v810_v27  ;;  %v735_v47 = vsub.f32 0.0, %v703_v24  ;;  %vm1050_vm9 = vcmp.lt.f32.partialorder %v1049_v3, 0.0004427343  ;;  %v719_v31 = vand.u32 2147483647, %v2482_v8 }
 0x1b6   : > { %v1627_v45 = vpop.eup %1626  ;;  %v1194_v41 = vmul.f32 %v1625_v16, %v2284_v61  ;;  %1642 = vpow2.f32 %v784_v28  ;;  %v904_v61 = vmul.f32 %v2424_v2, %v903_v6  ;;  %v948_v32 = vadd.f32 1.0, %v947_v11 }
 0x1b7   : > { %v1629_v22 = vpop.eup %1628  ;;  %v1181_v14 = vmul.f32 %v1627_v45, %v2293_v15  ;;  %1644 = vpow2.f32 %v816_v25  ;;  %v1048_v15 = vmul.f32 %v2431_v63, %v1047_v12  ;;  %v950_v63 = vand.u32 2147483647, %v2460_v55 }
 0x1b8   : > { %v1631_v57 = vpop.eup %1630  ;;  %1227 = vst.msk [vmem:[%s2187_s26 + $0xc0] sm:$0xff] %vm1202_vm10, %v1194_v41  ;;  %v901_v1 = vmul.f32 0.6931472, %v1629_v22  ;;  %v780_v53 = vmul.f32 1.442695, %v735_v47  ;;  %v751_v36 = vsub.f32 0.0, %v719_v31  ;;  %v949_v52 = vmul.f32 %v2460_v55, %v948_v32 }
 0x1b9   : > { %v1633_v46 = vpop.eup %1632  ;;  %1214 = vst.msk [vmem:[%s2187_s26 + $0x58] sm:$0xff] %vm1202_vm10, %v1181_v14  ;;  %v1045_v39 = vmul.f32 0.6931472, %v1631_v57  ;;  %v672_v23 = vmax.f32 %v2375_v50, 0.0  ;;  %vm951_vm11 = vcmp.lt.f32.partialorder %v950_v63, 0.0004427343 }
 0x1ba   : > { %v2491_v49 = vpop.eup %1634  ;;  %v907_v62 = vsel %vm906_vm8, %v904_v61, %v901_v1  ;;  %v1088_v0 = vadd.f32 1.0, %v1633_v46  ;;  %v1091_v13 = vmul.f32 -0.5, %v1633_v46  ;;  %v812_v55 = vmul.f32 1.442695, %v751_v36 }
 0x1bb   : > { %v1115_v42 = vadd.f32 %v907_v62, %v667_v4  ;;  %v1051_v2 = vsel %vm1050_vm9, %v1048_v15, %v1045_v39  ;;  %v926_v37 = vadd.f32 1.0, %v2491_v49  ;;  %v929_v38 = vmul.f32 -0.5, %v2491_v49 }
 0x1bc   : > { %v1131_v18 = vadd.f32 %v1051_v2, %v683_v30  ;;  %1646 = vlog2.f32 %v1088_v0  ;;  %v1092_v27 = vadd.f32 1.0, %v1091_v13  ;;  %v1094_v28 = vand.u32 2147483647, %v1633_v46 }
 0x1bd   : > { %1648 = vtanh.f32 %v1115_v42  ;;  %v1637_v48 = vpop.eup %1636  ;;  %v930_v26 = vadd.f32 1.0, %v929_v38  ;;  %v932_v16 = vand.u32 2147483647, %v2491_v49  ;;  %v688_v3 = vmax.f32 %v2382_v40, 0.0 }
 0x1be   : > { %1650 = vtanh.f32 %v1131_v18  ;;  %v1639_v58 = vpop.eup %1638  ;;  %v1197_v33 = vmul.f32 %v1637_v48, %v2320_v10  ;;  %v1093_v34 = vmul.f32 %v1633_v46, %v1092_v27  ;;  %vm1095_vm12 = vcmp.lt.f32.partialorder %v1094_v28, 0.0004427343 }
 0x1bf   : > { %1652 = vlog2.f32 %v926_v37  ;;  %v2498_v21 = vpop.eup %1640  ;;  %v946_v5 = vmul.f32 0.6931472, %v1639_v58  ;;  %v670_v57 = vmax.f32 %v2400_v44, 0.0  ;;  %v931_v39 = vmul.f32 %v2491_v49, %v930_v26 }
 0x1c0   : > { %1654 = vpow2.f32 %v780_v53  ;;  %v2501_v56 = vpop.eup %1642  ;;  %1230 = vst.msk [vmem:[%s2187_s26 + $0xd8] sm:$0xff] %vm1202_vm10, %v1197_v33  ;;  %v1070_v35 = vadd.f32 1.0, %v2498_v21  ;;  %v1073_v12 = vmul.f32 -0.5, %v2498_v21  ;;  %vm933_vm13 = vcmp.lt.f32.partialorder %v932_v16, 0.0004427343 }
 0x1c1   : > { %v2507_v7 = vpop.eup %1644  ;;  %v952_v10 = vsel %vm951_vm11, %v949_v52, %v946_v5  ;;  %v953_v20 = vadd.f32 1.0, %v2501_v56  ;;  %v956_v45 = vmul.f32 -0.5, %v2501_v56  ;;  %v959_v30 = vand.u32 2147483647, %v2501_v56 }
 0x1c2   : > { %v1120_v43 = vadd.f32 %v952_v10, %v672_v23  ;;  %1656 = vlog2.f32 %v1070_v35  ;;  %v1097_v29 = vadd.f32 1.0, %v2507_v7  ;;  %v1100_v1 = vmul.f32 -0.5, %v2507_v7 }
 0x1c3   : > { %1658 = vlog2.f32 %v953_v20  ;;  %v1074_v15 = vadd.f32 1.0, %v1073_v12  ;;  %v957_v47 = vadd.f32 1.0, %v956_v45  ;;  %v686_v2 = vmax.f32 %v2442_v51, 0.0 }
 0x1c4   : > { %1660 = vtanh.f32 %v1120_v43  ;;  %v1101_v37 = vadd.f32 1.0, %v1100_v1  ;;  %v673_v32 = vmax.f32 %v2444_v9, 0.0  ;;  %v1103_v63 = vand.u32 2147483647, %v2507_v7 }
 0x1c5   : > { %1662 = vlog2.f32 %v1097_v29  ;;  %v1075_v18 = vmul.f32 %v2498_v21, %v1074_v15  ;;  %v958_v58 = vmul.f32 %v2501_v56, %v957_v47  ;;  %vm960_vm15 = vcmp.lt.f32.partialorder %v959_v30, 0.0004427343 }
 0x1c6   : > { %v1647_v6 = vpop.eup %1646  ;;  %1664 = vpow2.f32 %v812_v55  ;;  %v1102_v10 = vmul.f32 %v2507_v7, %v1101_v37  ;;  %v689_v20 = vmax.f32 %v2455_v54, 0.0  ;;  %vm1104_vm0 = vcmp.lt.f32.partialorder %v1103_v63, 0.0004427343 }
 0x1c7   : > { %v1649_v25 = vpop.eup %1648  ;;  %v1090_v19 = vmul.f32 0.6931472, %v1647_v6 }
 0x1c8   : > { %v1651_v41 = vpop.eup %1650  ;;  %v1179_v4 = vmul.f32 %v1649_v25, %v2327_v60  ;;  %v1076_v60 = vand.u32 2147483647, %v2498_v21  ;;  %v671_v25 = vmax.f32 %v2471_v17, 0.0 }
 0x1c9   : > { %v1653_v22 = vpop.eup %1652  ;;  %v1195_v14 = vmul.f32 %v1651_v41, %v2347_v59  ;;  %v1096_v24 = vsel %vm1095_vm12, %v1093_v34, %v1090_v19 }
 0x1ca   : > { %v1655_v61 = vpop.eup %1654  ;;  %1212 = vst.msk [vmem:[%s2187_s26 + $0x48] sm:$0xff] %vm1202_vm10, %v1179_v4  ;;  %v1136_v11 = vadd.f32 %v1096_v24, %v688_v3  ;;  %v928_v46 = vmul.f32 0.6931472, %v1653_v22  ;;  %vm1077_vm14 = vcmp.lt.f32.partialorder %v1076_v60, 0.0004427343 }
 0x1cb   : > { %1228 = vst.msk [vmem:[%s2187_s26 + $0xc8] sm:$0xff] %vm1202_vm10, %v1195_v14  ;;  %v935_v59 = vadd.f32 1.0, %v1655_v61  ;;  %v938_v5 = vmul.f32 -0.5, %v1655_v61  ;;  %v941_v55 = vand.u32 2147483647, %v1655_v61 }
 0x1cc   : > { %1666 = vtanh.f32 %v1136_v11  ;;  %v934_v62 = vsel %vm933_vm13, %v931_v39, %v928_v46  ;;  %v1657_v0 = vpop.eup %1656  ;;  %v687_v11 = vmax.f32 %v2482_v8, 0.0 }
 0x1cd   : > { %v1118_v42 = vadd.f32 %v934_v62, %v670_v57  ;;  %1668 = vlog2.f32 %v935_v59  ;;  %v1659_v31 = vpop.eup %1658  ;;  %v1072_v49 = vmul.f32 0.6931472, %v1657_v0  ;;  %v939_v27 = vadd.f32 1.0, %v938_v5 }
 0x1ce   : > { %v1661_v53 = vpop.eup %1660  ;;  %v955_v48 = vmul.f32 0.6931472, %v1659_v31  ;;  %vm942_vm1 = vcmp.lt.f32.partialorder %v941_v55, 0.0004427343 }
 0x1cf   : > { %1670 = vtanh.f32 %v1118_v42  ;;  %v1663_v33 = vpop.eup %1662  ;;  %v1184_v13 = vmul.f32 %v1661_v53, %v2375_v50  ;;  %v1078_v36 = vsel %vm1077_vm14, %v1075_v18, %v1072_v49  ;;  %v940_v26 = vmul.f32 %v1655_v61, %v939_v27 }
 0x1d0   : > { %v1665_v52 = vpop.eup %1664  ;;  %v1134_v23 = vadd.f32 %v1078_v36, %v686_v2  ;;  %v961_v21 = vsel %vm960_vm15, %v958_v58, %v955_v48  ;;  %v1099_v35 = vmul.f32 0.6931472, %v1663_v33 }
 0x1d1   : > { %1217 = vst.msk [vmem:[%s2187_s26 + $0x70] sm:$0xff] %vm1202_vm10, %v1184_v13  ;;  %v1121_v38 = vadd.f32 %v961_v21, %v673_v32  ;;  %v1079_v43 = vadd.f32 1.0, %v1665_v52  ;;  %v1082_v16 = vmul.f32 -0.5, %v1665_v52 }
 0x1d2   : > { %1672 = vtanh.f32 %v1134_v23  ;;  %v1105_v56 = vsel %vm1104_vm0, %v1102_v10, %v1099_v35 }
 0x1d3   : > { %1674 = vtanh.f32 %v1121_v38  ;;  %v1137_v50 = vadd.f32 %v1105_v56, %v689_v20  ;;  %v1083_v41 = vadd.f32 1.0, %v1082_v16 }
 0x1d4   : > { %1676 = vlog2.f32 %v1079_v43 }
 0x1d5   : > { %1678 = vtanh.f32 %v1137_v50  ;;  %v1084_v1 = vmul.f32 %v1665_v52, %v1083_v41 }
 0x1d6   : > { %v1667_v28 = vpop.eup %1666 }
 0x1d7   : > { %v1669_v29 = vpop.eup %1668  ;;  %v1200_v7 = vmul.f32 %v1667_v28, %v2382_v40  ;;  %v1085_v40 = vand.u32 2147483647, %v1665_v52 }
 0x1d8   : > { %v937_v6 = vmul.f32 0.6931472, %v1669_v29 }
 0x1d9   : > { %v1671_v12 = vpop.eup %1670  ;;  %1233 = vst.msk [vmem:[%s2187_s26 + $0xf0] sm:$0xff] %vm1202_vm10, %v1200_v7  ;;  %vm1086_vm2 = vcmp.lt.f32.partialorder %v1085_v40, 0.0004427343 }
 0x1da   : > { %v1182_v19 = vmul.f32 %v1671_v12, %v2400_v44  ;;  %v943_v34 = vsel %vm942_vm1, %v940_v26, %v937_v6 }
 0x1db   : > { %v1119_v45 = vadd.f32 %v943_v34, %v671_v25 }
 0x1dc   : > { %1215 = vst.msk [vmem:[%s2187_s26 + $0x60] sm:$0xff] %vm1202_vm10, %v1182_v19  ;;  %v1673_v4 = vpop.eup %1672 }
 0x1dd   : > { %1680 = vtanh.f32 %v1119_v45  ;;  %v1675_v3 = vpop.eup %1674  ;;  %v1198_v22 = vmul.f32 %v1673_v4, %v2442_v51 }
 0x1de   : > { %v1677_v14 = vpop.eup %1676  ;;  %v1185_v24 = vmul.f32 %v1675_v3, %v2444_v9 }
 0x1df   : > { %v1679_v57 = vpop.eup %1678  ;;  %1231 = vst.msk [vmem:[%s2187_s26 + $0xe0] sm:$0xff] %vm1202_vm10, %v1198_v22  ;;  %v1081_v44 = vmul.f32 0.6931472, %v1677_v14 }
 0x1e0   : > { %1218 = vst.msk [vmem:[%s2187_s26 + $0x78] sm:$0xff] %vm1202_vm10, %v1185_v24  ;;  %v1201_v61 = vmul.f32 %v1679_v57, %v2455_v54 }
 0x1e1   : > { %v1087_v46 = vsel %vm1086_vm2, %v1084_v1, %v1081_v44 }
 0x1e2   : > { %1234 = vst.msk [vmem:[%s2187_s26 + $0xf8] sm:$0xff] %vm1202_vm10, %v1201_v61  ;;  %v1135_v51 = vadd.f32 %v1087_v46, %v687_v11 }
 0x1e4   : > { %1682 = vtanh.f32 %v1135_v51 }
 0x1e7   : > { %v1681_v39 = vpop.eup %1680 }
 0x1e8   : > { %v1183_v9 = vmul.f32 %v1681_v39, %v2471_v17 }
 0x1ea   : > { %1216 = vst.msk [vmem:[%s2187_s26 + $0x68] sm:$0xff] %vm1202_vm10, %v1183_v9 }
 0x1ee   : > { %v1683_v15 = vpop.eup %1682 }
 0x1ef   : > { %v1199_v60 = vmul.f32 %v1683_v15, %v2482_v8 }
 0x1f1   : > { %1232 = vst.msk [vmem:[%s2187_s26 + $0xe8] sm:$0xff] %vm1202_vm10, %v1199_v60 }
 0x1f2 PF: > { %s16_s15 = sadd.s32 1, %s1784_s15  }
 0x1f3   : > { %p13_p5 = scmp.ge.s32.totalorder %s16_s15, 4  }
 0x1f5   :  { %15 = sbr.rel (!%p13_p5) target bundleno = 2 (0x2), region = 79 }
 0x1fc   :  { %1257 = vsyncpa [#allocation3], 1 }
 0x1fd   :  { %1259 = vsyncpa [#allocation3 + $0x1], 1 }
 0x1fe   :  { %1260 = vsyncpa [#allocation5], 1 }

// kernel: _lambda_.11
= control target key start
LH: loop header
LB: loop body
LE: loop exit
PB: predicated region body
PF: predicated region fallthrough
CT: control target
= control target key end

     0   :  { %vm114_vm0 = vcmask 654336   ;;  %vm554_vm10 = vcmask 130048   ;;  %s1115_s1 = inlined_call_operand.vmem [shape: bf16[80,16], index: 1, kind: input, shape index: {}]   ;;  %s1116_s0 = inlined_call_operand.vmem [shape: bf16[128,80], index: 0, kind: input, shape index: {}]   ;;  %s1117_s2 = inlined_call_operand.vmem [shape: f32[1,16], index: 2, kind: input, shape index: {}]   ;;  %s1118_s3 = inlined_call_operand.vmem [shape: f32[1,16], index: 3, kind: input, shape index: {}]   ;;  %s1119_s4 = inlined_call_operand.vmem [shape: f32[128,16], index: 4, kind: output, shape index: {}]  }
   0x1   :  { %v647_v0 = vld [vmem:[%s1115_s1] sm:$0xff]   ;;  %v648_v1 = vld [vmem:[%s1115_s1 + $0x8] sm:$0xff]   ;;  %v649_v2 = vld [vmem:[%s1115_s1 + $0x10] sm:$0xff]  }
   0x2   :  { %611 = vmatprep.subr.bf16.mxu0 %v647_v0  ;;  %637 = vmatprep.subr.bf16.mxu1 %v647_v0  ;;  %v652_v3 = vld [vmem:[%s1116_s0] sm:$0xff]   ;;  %v650_v5 = vld [vmem:[%s1115_s1 + $0x18] sm:$0xff]   ;;  %v654_v7 = vld [vmem:[%s1116_s0 + $0x8] sm:$0xff]  }
   0x3   :  { %612 = vmatpush3.bf16.msra.mxu0 %v647_v0  ;;  %642 = vmatpush3.bf16.msra.mxu1 %v647_v0  ;;  %v653_v4 = vld [vmem:[%s1116_s0 + $0x20] sm:$0xff]   ;;  %v655_v8 = vld [vmem:[%s1116_s0 + $0x28] sm:$0xff]   ;;  %v656_v9 = vld [vmem:[%s1116_s0 + $0x10] sm:$0xff]  }
   0x4   :  { %613 = vmatprep.subr.bf16.mxu0 %v648_v1  ;;  %638 = vmatprep.subr.bf16.mxu1 %v648_v1  ;;  %v651_v6 = vld [vmem:[%s1115_s1 + $0x20] sm:$0xff]   ;;  %v657_v10 = vld [vmem:[%s1116_s0 + $0x30] sm:$0xff]   ;;  %v658_v11 = vld [vmem:[%s1116_s0 + $0x18] sm:$0xff]  }
   0x5   :  { %621 = vmatprep.mubr.msk.bf16.mxu0 %vm114_vm0, %v652_v3  ;;  %629 = vmatprep.mubr.msk.bf16.mxu1 %vm114_vm0, %v653_v4  ;;  %v659_v12 = vld [vmem:[%s1116_s0 + $0x38] sm:$0xff]   ;;  %v831_v13 = vld [vmem:[%s1117_s2] ss:$0 sm:$0xff] }
   0x6   :  { %v836_v15 = vld [vmem:[%s1118_s3] ss:$0 sm:$0xff] }
   0x7   :  { %614 = vmatpush3.bf16.msra.mxu0 %v648_v1  ;;  %643 = vmatpush3.bf16.msra.mxu1 %v648_v1 }
   0x8   :  { %615 = vmatprep.subr.bf16.mxu0 %v649_v2  ;;  %639 = vmatprep.subr.bf16.mxu1 %v649_v2 }
   0xb   :  { %616 = vmatpush3.bf16.msra.mxu0 %v649_v2  ;;  %644 = vmatpush3.bf16.msra.mxu1 %v649_v2 }
   0xc   :  { %617 = vmatprep.subr.bf16.mxu0 %v650_v5  ;;  %640 = vmatprep.subr.bf16.mxu1 %v650_v5 }
   0xf   :  { %618 = vmatpush3.bf16.msra.mxu0 %v650_v5  ;;  %645 = vmatpush3.bf16.msra.mxu1 %v650_v5 }
  0x10   :  { %619 = vmatprep.subr.bf16.mxu0 %v651_v6  ;;  %641 = vmatprep.subr.bf16.mxu1 %v651_v6 }
  0x13   :  { %620 = vmatpush3.bf16.msra.mxu0 %v651_v6  ;;  %646 = vmatpush3.bf16.msra.mxu1 %v651_v6 }
  0x16   :  { %622 = vmatmul.mubr.msk.bf16.vlgmr.msra.gmra.mrb[0].mxu0 %vm114_vm0, %v654_v7  ;;  %630 = vmatmul.mubr.msk.bf16.vlgmr.msra.gmra.mrb[0].mxu1 %vm114_vm0, %v655_v8 }
  0x17   :  { %625 = vmatprep.mubr.msk.bf16.mxu0 %vm114_vm0, %v656_v9  ;;  %633 = vmatprep.mubr.msk.bf16.mxu1 %vm114_vm0, %v657_v10 }
  0x1e   :  { %626 = vmatmul.mubr.msk.bf16.gmra.mrb[4].mxu0 %vm114_vm0, %v658_v11  ;;  %634 = vmatmul.mubr.msk.bf16.gmra.mrb[4].mxu1 %vm114_vm0, %v659_v12 }
  0xe9   :  { %v623_v14 = vpop.f32.mrb[0].mxu0  ;;  %v631_v16 = vpop.f32.mrb[0].mxu1 }
  0xea   :  { %v245_v17 = vmul.f32 %v623_v14, %v831_v13  ;;  %v253_v18 = vmul.f32 %v631_v16, %v831_v13  ;;  %v173_v19 = vpop.f32.mrb[1].mxu0  ;;  %v205_v20 = vpop.f32.mrb[1].mxu1 }
  0xeb   :  { %v243_v21 = vmul.f32 %v831_v13, %v173_v19  ;;  %v251_v22 = vmul.f32 %v831_v13, %v205_v20  ;;  %v624_v23 = vpop.f32.mrb[2].mxu0  ;;  %v632_v24 = vpop.f32.mrb[2].mxu1 }
  0xec   :  { %v843_v25 = vadd.f32 %v836_v15, %v245_v17  ;;  %v846_v26 = vadd.f32 %v836_v15, %v253_v18  ;;  %v246_v27 = vmul.f32 %v624_v23, %v831_v13  ;;  %v254_v28 = vmul.f32 %v632_v24, %v831_v13  ;;  %v176_v29 = vpop.f32.mrb[3].mxu0  ;;  %v208_v30 = vpop.f32.mrb[3].mxu1 }
  0xed   :  { %v851_v31 = vadd.f32 %v836_v15, %v243_v21  ;;  %v854_v32 = vadd.f32 %v836_v15, %v251_v22  ;;  %v244_v33 = vmul.f32 %v831_v13, %v176_v29  ;;  %v252_v34 = vmul.f32 %v831_v13, %v208_v30 }
  0xee   :  { %v300_v35 = vand.u32 2147483647, %v843_v25  ;;  %v308_v36 = vand.u32 2147483647, %v846_v26  ;;  %v863_v41 = vadd.f32 %v836_v15, %v246_v27  ;;  %v866_v42 = vadd.f32 %v836_v15, %v254_v28 }
  0xef   :  { %v298_v37 = vand.u32 2147483647, %v851_v31  ;;  %v306_v38 = vand.u32 2147483647, %v854_v32  ;;  %v869_v45 = vadd.f32 %v836_v15, %v244_v33  ;;  %v872_v46 = vadd.f32 %v836_v15, %v252_v34 }
  0xf0   :  { %v316_v39 = vsub.f32 0.0, %v300_v35  ;;  %v324_v40 = vsub.f32 0.0, %v308_v36  ;;  %v301_v53 = vand.u32 2147483647, %v863_v41  ;;  %v309_v55 = vand.u32 2147483647, %v866_v42 }
  0xf1   :  { %v314_v43 = vsub.f32 0.0, %v298_v37  ;;  %v322_v44 = vsub.f32 0.0, %v306_v38  ;;  %v627_v47 = vpop.f32.mrb[4].mxu0  ;;  %v635_v48 = vpop.f32.mrb[4].mxu1  ;;  %v299_v56 = vand.u32 2147483647, %v869_v45 }
  0xf2   :  { %v334_v49 = vmul.f32 1.442695, %v316_v39  ;;  %v350_v50 = vmul.f32 1.442695, %v324_v40  ;;  %v249_v54 = vmul.f32 %v627_v47, %v831_v13  ;;  %v189_v57 = vpop.f32.mrb[5].mxu0  ;;  %v317_v58 = vsub.f32 0.0, %v301_v53 }
  0xf3   :  { %v330_v51 = vmul.f32 1.442695, %v314_v43  ;;  %v346_v52 = vmul.f32 1.442695, %v322_v44  ;;  %v307_v59 = vand.u32 2147483647, %v872_v46  ;;  %v257_v5 = vmul.f32 %v635_v48, %v831_v13 }
  0xf4   :  { %660 = vpow2.f32 %v334_v49  ;;  %v221_v60 = vpop.f32.mrb[5].mxu1  ;;  %v628_v61 = vpop.f32.mrb[6].mxu0  ;;  %v325_v62 = vsub.f32 0.0, %v309_v55  ;;  %v315_v63 = vsub.f32 0.0, %v299_v56  ;;  %v880_v0 = vadd.f32 %v836_v15, %v249_v54 }
  0xf5   :  { %662 = vpow2.f32 %v350_v50  ;;  %v636_v1 = vpop.f32.mrb[6].mxu1  ;;  %v192_v2 = vpop.f32.mrb[7].mxu0  ;;  %v336_v3 = vmul.f32 1.442695, %v317_v58  ;;  %v323_v4 = vsub.f32 0.0, %v307_v59  ;;  %v284_v7 = vmax.f32 %v843_v25, 0.0 }
  0xf6   :  { %664 = vpow2.f32 %v330_v51  ;;  %v883_v6 = vpop.f32.mrb[7].mxu1  ;;  %v352_v8 = vmul.f32 1.442695, %v325_v62  ;;  %v332_v9 = vmul.f32 1.442695, %v315_v63  ;;  %v247_v10 = vmul.f32 %v831_v13, %v189_v57 }
  0xf7   :  { %666 = vpow2.f32 %v346_v52  ;;  %v348_v11 = vmul.f32 1.442695, %v323_v4  ;;  %v304_v12 = vand.u32 2147483647, %v880_v0  ;;  %v889_v14 = vadd.f32 %v836_v15, %v257_v5 }
  0xf8   :  { %668 = vpow2.f32 %v336_v3  ;;  %v292_v16 = vmax.f32 %v846_v26, 0.0  ;;  %v893_v17 = vadd.f32 %v836_v15, %v247_v10  ;;  %v255_v18 = vmul.f32 %v831_v13, %v221_v60 }
  0xf9   :  { %670 = vpow2.f32 %v352_v8  ;;  %v320_v19 = vsub.f32 0.0, %v304_v12  ;;  %v312_v20 = vand.u32 2147483647, %v889_v14  ;;  %v250_v21 = vmul.f32 %v628_v61, %v831_v13 }
  0xfa   :  { %672 = vpow2.f32 %v332_v9  ;;  %v282_v22 = vmax.f32 %v851_v31, 0.0  ;;  %v290_v23 = vmax.f32 %v854_v32, 0.0  ;;  %v285_v24 = vmax.f32 %v863_v41, 0.0 }
  0xfb   :  { %v302_v27 = vand.u32 2147483647, %v893_v17  ;;  %v293_v28 = vmax.f32 %v866_v42, 0.0  ;;  %674 = vpow2.f32 %v348_v11  ;;  %v342_v29 = vmul.f32 1.442695, %v320_v19 }
  0xfc   :  { %v904_v30 = vadd.f32 %v836_v15, %v255_v18  ;;  %v283_v34 = vmax.f32 %v869_v45, 0.0  ;;  %v291_v35 = vmax.f32 %v872_v46, 0.0  ;;  %v288_v36 = vmax.f32 %v880_v0, 0.0 }
  0xfd   :  { %v328_v37 = vsub.f32 0.0, %v312_v20  ;;  %676 = vpow2.f32 %v342_v29  ;;  %v910_v43 = vadd.f32 %v836_v15, %v250_v21  ;;  %v912_v49 = vsub.f32 0.0, %v302_v27 }
  0xfe   :  { %v661_v33 = vpop.eup %660  ;;  %v915_v50 = vmul.f32 %v636_v1, %v831_v13  ;;  %v310_v54 = vand.u32 2147483647, %v904_v30  ;;  %v921_v61 = vmul.f32 %v831_v13, %v192_v2 }
  0xff   :  { %v663_v38 = vpop.eup %662  ;;  %v380_v39 = vadd.f32 1.0, %v661_v33  ;;  %v383_v40 = vmul.f32 -0.5, %v661_v33  ;;  %v386_v52 = vand.u32 2147483647, %v661_v33  ;;  %v918_v60 = vmul.f32 1.442695, %v328_v37 }
 0x100   :  { %v665_v44 = vpop.eup %664  ;;  %v452_v47 = vadd.f32 1.0, %v663_v38  ;;  %v455_v48 = vmul.f32 -0.5, %v663_v38  ;;  %v458_v56 = vand.u32 2147483647, %v663_v38 }
 0x101   :  { %v667_v51 = vpop.eup %666  ;;  %678 = vlog2.f32 %v380_v39  ;;  %v362_v53 = vadd.f32 1.0, %v665_v44  ;;  %v384_v55 = vadd.f32 1.0, %v383_v40  ;;  %v365_v57 = vmul.f32 -0.5, %v665_v44 }
 0x102   :  { %680 = vlog2.f32 %v452_v47  ;;  %v669_v58 = vpop.eup %668  ;;  %v434_v59 = vadd.f32 1.0, %v667_v51  ;;  %v456_v63 = vadd.f32 1.0, %v455_v48  ;;  %v368_v3 = vand.u32 2147483647, %v665_v44 }
 0x103   :  { %682 = vlog2.f32 %v362_v53  ;;  %v671_v62 = vpop.eup %670  ;;  %v366_v1 = vadd.f32 1.0, %v365_v57  ;;  %v437_v4 = vmul.f32 -0.5, %v667_v51  ;;  %vm923_vm1 = vcmp.lt.f32.partialorder %v386_v52, 0.0004427343 }
 0x104   :  { %v673_v5 = vpop.eup %672  ;;  %684 = vlog2.f32 %v434_v59  ;;  %v440_v9 = vand.u32 2147483647, %v667_v51  ;;  %v389_v10 = vadd.f32 1.0, %v669_v58  ;;  %v392_v11 = vmul.f32 -0.5, %v669_v58 }
 0x105   :  { %v385_v12 = vmul.f32 %v661_v33, %v384_v55  ;;  %vm927_vm2 = vcmp.lt.f32.partialorder %v458_v56, 0.0004427343  ;;  %v438_v2 = vadd.f32 1.0, %v437_v4  ;;  %v395_v19 = vand.u32 2147483647, %v669_v58  ;;  %v675_v20 = vpop.eup %674 }
 0x106   :  { %686 = vlog2.f32 %v389_v10  ;;  %v393_v21 = vadd.f32 1.0, %v392_v11  ;;  %v461_v27 = vadd.f32 1.0, %v671_v62  ;;  %v464_v29 = vmul.f32 -0.5, %v671_v62 }
 0x107   :  { %v457_v37 = vmul.f32 %v663_v38, %v456_v63  ;;  %v367_v39 = vmul.f32 %v665_v44, %v366_v1  ;;  %vm931_vm3 = vcmp.lt.f32.partialorder %v368_v3, 0.0004427343  ;;  %v371_v47 = vadd.f32 1.0, %v673_v5  ;;  %v935_v48 = vpop.eup %676 }
 0x108   :  { %vm937_vm4 = vcmp.lt.f32.partialorder %v440_v9, 0.0004427343  ;;  %688 = vlog2.f32 %v461_v27  ;;  %v465_v52 = vadd.f32 1.0, %v464_v29  ;;  %v467_v53 = vand.u32 2147483647, %v671_v62 }
 0x109   :  { %v374_v55 = vmul.f32 -0.5, %v673_v5  ;;  %v439_v56 = vmul.f32 %v667_v51, %v438_v2  ;;  %690 = vlog2.f32 %v371_v47  ;;  %v377_v57 = vand.u32 2147483647, %v673_v5 }
 0x10a   :  { %v443_v38 = vadd.f32 1.0, %v675_v20  ;;  %v394_v59 = vmul.f32 %v669_v58, %v393_v21  ;;  %vm941_vm5 = vcmp.lt.f32.partialorder %v395_v19, 0.0004427343  ;;  %v446_v3 = vmul.f32 -0.5, %v675_v20 }
 0x10b   :  { %v679_v44 = vpop.eup %678  ;;  %v375_v1 = vadd.f32 1.0, %v374_v55  ;;  %v449_v10 = vand.u32 2147483647, %v675_v20  ;;  %v416_v11 = vadd.f32 1.0, %v935_v48  ;;  %v466_v51 = vmul.f32 %v671_v62, %v465_v52 }
 0x10c   :  { %v681_v4 = vpop.eup %680  ;;  %v382_v9 = vmul.f32 0.6931472, %v679_v44  ;;  %692 = vlog2.f32 %v443_v38  ;;  %vm946_vm6 = vcmp.lt.f32.partialorder %v467_v53, 0.0004427343  ;;  %v447_v58 = vadd.f32 1.0, %v446_v3 }
 0x10d   :  { %v683_v27 = vpop.eup %682  ;;  %v454_v29 = vmul.f32 0.6931472, %v681_v4  ;;  %vm952_vm7 = vcmp.lt.f32.partialorder %v377_v57, 0.0004427343  ;;  %694 = vlog2.f32 %v416_v11  ;;  %v419_v55 = vmul.f32 -0.5, %v935_v48 }
 0x10e   :  { %v388_v19 = vsel %vm923_vm1, %v385_v12, %v382_v9  ;;  %v364_v21 = vmul.f32 0.6931472, %v683_v27  ;;  %v685_v38 = vpop.eup %684  ;;  %v376_v53 = vmul.f32 %v673_v5, %v375_v1  ;;  %v422_v44 = vand.u32 2147483647, %v935_v48 }
 0x10f   :  { %v508_v62 = vadd.f32 %v388_v19, %v284_v7  ;;  %v460_v52 = vsel %vm927_vm2, %v457_v37, %v454_v29  ;;  %v436_v57 = vmul.f32 0.6931472, %v685_v38  ;;  %vm966_vm8 = vcmp.lt.f32.partialorder %v449_v10, 0.0004427343 }
 0x110   :  { %v516_v8 = vadd.f32 %v460_v52, %v292_v16  ;;  %v370_v12 = vsel %vm931_vm3, %v367_v39, %v364_v21  ;;  %v687_v4 = vpop.eup %686  ;;  %v448_v18 = vmul.f32 %v675_v20, %v447_v58  ;;  %v420_v5 = vadd.f32 1.0, %v419_v55 }
 0x111   :  { %696 = vtanh.f32 %v508_v62  ;;  %v506_v7 = vadd.f32 %v370_v12, %v282_v22  ;;  %v442_v37 = vsel %vm937_vm4, %v439_v56, %v436_v57  ;;  %v391_v16 = vmul.f32 0.6931472, %v687_v4 }
 0x112   :  { %698 = vtanh.f32 %v516_v8  ;;  %v338_v40 = vmul.f32 1.442695, %v912_v49  ;;  %v689_v39 = vpop.eup %688  ;;  %v514_v1 = vadd.f32 %v442_v37, %v290_v23  ;;  %vm977_vm9 = vcmp.lt.f32.partialorder %v422_v44, 0.0004427343 }
 0x113   :  { %700 = vtanh.f32 %v506_v7  ;;  %v326_v22 = vsub.f32 0.0, %v310_v54  ;;  %v691_v20 = vpop.eup %690  ;;  %v397_v33 = vsel %vm941_vm5, %v394_v59, %v391_v16  ;;  %v463_v56 = vmul.f32 0.6931472, %v689_v39 }
 0x114   :  { %702 = vpow2.f32 %v918_v60  ;;  %v305_v49 = vand.u32 2147483647, %v910_v43  ;;  %v509_v23 = vadd.f32 %v397_v33, %v285_v24  ;;  %v373_v10 = vmul.f32 0.6931472, %v691_v20 }
 0x115   :  { %704 = vtanh.f32 %v514_v1  ;;  %v354_v11 = vmul.f32 1.442695, %v326_v22  ;;  %v469_v29 = vsel %vm946_vm6, %v466_v51, %v463_v56  ;;  %v993_v59 = vadd.f32 %v836_v15, %v915_v50 }
 0x116   :  { %v693_v27 = vpop.eup %692  ;;  %706 = vpow2.f32 %v338_v40  ;;  %v321_v54 = vsub.f32 0.0, %v305_v49  ;;  %v517_v60 = vadd.f32 %v469_v29, %v293_v28  ;;  %v379_v63 = vsel %vm952_vm7, %v376_v53, %v373_v10 }
 0x117   :  { %708 = vtanh.f32 %v509_v23  ;;  %v445_v24 = vmul.f32 0.6931472, %v693_v27  ;;  %v695_v58 = vpop.eup %694  ;;  %v507_v19 = vadd.f32 %v379_v63, %v283_v34  ;;  %v421_v51 = vmul.f32 %v935_v48, %v420_v5 }
 0x118   :  { %710 = vpow2.f32 %v354_v11  ;;  %v344_v2 = vmul.f32 1.442695, %v321_v54  ;;  %v418_v21 = vmul.f32 0.6931472, %v695_v58  ;;  %v313_v55 = vand.u32 2147483647, %v993_v59 }
 0x119   :  { %712 = vtanh.f32 %v517_v60  ;;  %v451_v50 = vsel %vm966_vm8, %v448_v18, %v445_v24  ;;  %v1009_v47 = vadd.f32 %v836_v15, %v921_v61  ;;  %v256_v34 = vmul.f32 %v831_v13, %v883_v6 }
 0x11a   :  { %714 = vtanh.f32 %v507_v19  ;;  %v515_v28 = vadd.f32 %v451_v50, %v291_v35  ;;  %v424_v38 = vsel %vm977_vm9, %v421_v51, %v418_v21  ;;  %v329_v62 = vsub.f32 0.0, %v313_v55 }
 0x11b   :  { %v697_v48 = vpop.eup %696  ;;  %716 = vpow2.f32 %v344_v2  ;;  %v512_v35 = vadd.f32 %v424_v38, %v288_v36  ;;  %v303_v13 = vand.u32 2147483647, %v1009_v47  ;;  %v1021_v6 = vadd.f32 %v836_v15, %v256_v34 }
 0x11c   :  { %v699_v52 = vpop.eup %698  ;;  %v540_v53 = vmul.f32 %v697_v48, %v843_v25  ;;  %718 = vtanh.f32 %v515_v28  ;;  %v360_v8 = vmul.f32 1.442695, %v329_v62  ;;  %v296_v50 = vmax.f32 %v889_v14, 0.0 }
 0x11d   :  { %v701_v44 = vpop.eup %700  ;;  %v548_v61 = vmul.f32 %v699_v52, %v846_v26  ;;  %720 = vtanh.f32 %v512_v35  ;;  %v319_v3 = vsub.f32 0.0, %v303_v13  ;;  %v311_v7 = vand.u32 2147483647, %v1021_v6 }
 0x11e   :  { %v703_v12 = vpop.eup %702  ;;  %557 = vst.msk [vmem:[%s1119_s4 + $0x10] sm:$0xff] %vm554_vm10, %v540_v53  ;;  %v538_v25 = vmul.f32 %v701_v44, %v851_v31  ;;  %722 = vpow2.f32 %v360_v8  ;;  %v286_v62 = vmax.f32 %v893_v17, 0.0 }
 0x11f   :  { %v705_v57 = vpop.eup %704  ;;  %565 = vst.msk [vmem:[%s1119_s4 + $0x50] sm:$0xff] %vm554_vm10, %v548_v61  ;;  %v488_v26 = vadd.f32 1.0, %v703_v12  ;;  %v491_v1 = vmul.f32 -0.5, %v703_v12  ;;  %v327_v20 = vsub.f32 0.0, %v311_v7  ;;  %v494_v29 = vand.u32 2147483647, %v703_v12 }
 0x120   :  { %v707_v36 = vpop.eup %706  ;;  %555 = vst.msk [vmem:[%s1119_s4] sm:$0xff] %vm554_vm10, %v538_v25  ;;  %v546_v15 = vmul.f32 %v705_v57, %v854_v32  ;;  %v340_v32 = vmul.f32 1.442695, %v319_v3 }
 0x121   :  { %v709_v4 = vpop.eup %708  ;;  %724 = vlog2.f32 %v488_v26  ;;  %v398_v31 = vadd.f32 1.0, %v707_v36  ;;  %v401_v33 = vmul.f32 -0.5, %v707_v36  ;;  %v356_v10 = vmul.f32 1.442695, %v327_v20 }
 0x122   :  { %v1038_v18 = vpop.eup %710  ;;  %563 = vst.msk [vmem:[%s1119_s4 + $0x40] sm:$0xff] %vm554_vm10, %v546_v15  ;;  %v541_v5 = vmul.f32 %v709_v4, %v863_v41  ;;  %v404_v24 = vand.u32 2147483647, %v707_v36  ;;  %vm495_vm11 = vcmp.lt.f32.partialorder %v494_v29, 0.0004427343 }
 0x123   :  { %v713_v37 = vpop.eup %712  ;;  %726 = vlog2.f32 %v398_v31  ;;  %v470_v16 = vadd.f32 1.0, %v1038_v18  ;;  %v473_v23 = vmul.f32 -0.5, %v1038_v18  ;;  %v402_v54 = vadd.f32 1.0, %v401_v33 }
 0x124   :  { %v715_v40 = vpop.eup %714  ;;  %558 = vst.msk [vmem:[%s1119_s4 + $0x18] sm:$0xff] %vm554_vm10, %v541_v5  ;;  %v549_v39 = vmul.f32 %v713_v37, %v866_v42  ;;  %vm405_vm12 = vcmp.lt.f32.partialorder %v404_v24, 0.0004427343  ;;  %v289_v31 = vmax.f32 %v910_v43, 0.0 }
 0x125   :  { %v717_v9 = vpop.eup %716  ;;  %v539_v22 = vmul.f32 %v715_v40, %v869_v45  ;;  %728 = vlog2.f32 %v470_v16  ;;  %v492_v45 = vadd.f32 1.0, %v491_v1  ;;  %v474_v51 = vadd.f32 1.0, %v473_v23 }
 0x126   :  { %v719_v41 = vpop.eup %718  ;;  %566 = vst.msk [vmem:[%s1119_s4 + $0x58] sm:$0xff] %vm554_vm10, %v549_v39  ;;  %v425_v56 = vadd.f32 1.0, %v717_v9  ;;  %730 = vpow2.f32 %v340_v32  ;;  %v428_v60 = vmul.f32 -0.5, %v717_v9  ;;  %v403_v28 = vmul.f32 %v707_v36, %v402_v54 }
 0x127   :  { %556 = vst.msk [vmem:[%s1119_s4 + $0x8] sm:$0xff] %vm554_vm10, %v539_v22  ;;  %v547_v42 = vmul.f32 %v719_v41, %v872_v46  ;;  %v721_v49 = vpop.eup %720  ;;  %v493_v19 = vmul.f32 %v703_v12, %v492_v45  ;;  %v475_v44 = vmul.f32 %v1038_v18, %v474_v51  ;;  %v431_v61 = vand.u32 2147483647, %v717_v9 }
 0x128   :  { %732 = vlog2.f32 %v425_v56  ;;  %v723_v11 = vpop.eup %722  ;;  %v544_v27 = vmul.f32 %v721_v49, %v880_v0  ;;  %v476_v0 = vand.u32 2147483647, %v1038_v18  ;;  %v429_v34 = vadd.f32 1.0, %v428_v60 }
 0x129   :  { %564 = vst.msk [vmem:[%s1119_s4 + $0x48] sm:$0xff] %vm554_vm10, %v547_v42  ;;  %v497_v63 = vadd.f32 1.0, %v723_v11  ;;  %734 = vpow2.f32 %v356_v10  ;;  %v500_v52 = vmul.f32 -0.5, %v723_v11  ;;  %v294_v12 = vmax.f32 %v904_v30, 0.0 }
 0x12a   :  { %561 = vst.msk [vmem:[%s1119_s4 + $0x30] sm:$0xff] %vm554_vm10, %v544_v27  ;;  %vm477_vm13 = vcmp.lt.f32.partialorder %v476_v0, 0.0004427343  ;;  %v430_v26 = vmul.f32 %v717_v9, %v429_v34  ;;  %vm432_vm14 = vcmp.lt.f32.partialorder %v431_v61, 0.0004427343  ;;  %v297_v9 = vmax.f32 %v993_v59, 0.0 }
 0x12b   :  { %v725_v46 = vpop.eup %724  ;;  %736 = vlog2.f32 %v497_v63  ;;  %v501_v4 = vadd.f32 1.0, %v500_v52  ;;  %v503_v7 = vand.u32 2147483647, %v723_v11  ;;  %v287_v54 = vmax.f32 %v1009_v47, 0.0 }
 0x12c   :  { %v490_v58 = vmul.f32 0.6931472, %v725_v46 }
 0x12d   :  { %v727_v2 = vpop.eup %726  ;;  %v502_v39 = vmul.f32 %v723_v11, %v501_v4  ;;  %vm504_vm15 = vcmp.lt.f32.partialorder %v503_v7, 0.0004427343 }
 0x12e   :  { %v496_v21 = vsel %vm495_vm11, %v493_v19, %v490_v58  ;;  %v400_v55 = vmul.f32 0.6931472, %v727_v2 }
 0x12f   :  { %v729_v48 = vpop.eup %728  ;;  %v520_v38 = vadd.f32 %v496_v21, %v296_v50 }
 0x130   :  { %v406_v53 = vsel %vm405_vm12, %v403_v28, %v400_v55  ;;  %v472_v35 = vmul.f32 0.6931472, %v729_v48  ;;  %v731_v8 = vpop.eup %730 }
 0x131   :  { %738 = vtanh.f32 %v520_v38  ;;  %v510_v13 = vadd.f32 %v406_v53, %v286_v62  ;;  %v407_v36 = vadd.f32 1.0, %v731_v8  ;;  %v410_v1 = vmul.f32 -0.5, %v731_v8 }
 0x132   :  { %v733_v25 = vpop.eup %732  ;;  %v478_v57 = vsel %vm477_vm13, %v475_v44, %v472_v35  ;;  %v413_v42 = vand.u32 2147483647, %v731_v8 }
 0x133   :  { %740 = vtanh.f32 %v510_v13  ;;  %v518_v15 = vadd.f32 %v478_v57, %v294_v12  ;;  %v427_v3 = vmul.f32 0.6931472, %v733_v25  ;;  %v735_v18 = vpop.eup %734  ;;  %v411_v33 = vadd.f32 1.0, %v410_v1 }
 0x134   :  { %742 = vlog2.f32 %v407_v36  ;;  %v479_v32 = vadd.f32 1.0, %v735_v18  ;;  %v482_v49 = vmul.f32 -0.5, %v735_v18  ;;  %vm414_vm0 = vcmp.lt.f32.partialorder %v413_v42, 0.0004427343 }
 0x135   :  { %744 = vtanh.f32 %v518_v15  ;;  %v433_v5 = vsel %vm432_vm14, %v430_v26, %v427_v3  ;;  %v737_v37 = vpop.eup %736  ;;  %v412_v29 = vmul.f32 %v731_v8, %v411_v33  ;;  %v485_v46 = vand.u32 2147483647, %v735_v18 }
 0x136   :  { %v513_v16 = vadd.f32 %v433_v5, %v289_v31  ;;  %v499_v40 = vmul.f32 0.6931472, %v737_v37  ;;  %v483_v60 = vadd.f32 1.0, %v482_v49 }
 0x137   :  { %vm486_vm1 = vcmp.lt.f32.partialorder %v485_v46, 0.0004427343 }
 0x138   :  { %746 = vtanh.f32 %v513_v16  ;;  %v505_v22 = vsel %vm504_vm15, %v502_v39, %v499_v40  ;;  %v484_v2 = vmul.f32 %v735_v18, %v483_v60 }
 0x139   :  { %748 = vlog2.f32 %v479_v32  ;;  %v521_v20 = vadd.f32 %v505_v22, %v297_v9 }
 0x13b   :  { %v739_v41 = vpop.eup %738  ;;  %750 = vtanh.f32 %v521_v20 }
 0x13c   :  { %v552_v56 = vmul.f32 %v739_v41, %v889_v14 }
 0x13d   :  { %v741_v45 = vpop.eup %740 }
 0x13e   :  { %v743_v23 = vpop.eup %742  ;;  %569 = vst.msk [vmem:[%s1119_s4 + $0x70] sm:$0xff] %vm554_vm10, %v552_v56  ;;  %v542_v10 = vmul.f32 %v741_v45, %v893_v17 }
 0x13f   :  { %v745_v11 = vpop.eup %744  ;;  %v409_v27 = vmul.f32 0.6931472, %v743_v23 }
 0x140   :  { %559 = vst.msk [vmem:[%s1119_s4 + $0x20] sm:$0xff] %vm554_vm10, %v542_v10  ;;  %v550_v14 = vmul.f32 %v745_v11, %v904_v30  ;;  %v295_v30 = vmax.f32 %v1021_v6, 0.0 }
 0x141   :  { %v415_v63 = vsel %vm414_vm0, %v412_v29, %v409_v27 }
 0x142   :  { %v747_v24 = vpop.eup %746  ;;  %567 = vst.msk [vmem:[%s1119_s4 + $0x60] sm:$0xff] %vm554_vm10, %v550_v14  ;;  %v511_v17 = vadd.f32 %v415_v63, %v287_v54 }
 0x143   :  { %v749_v58 = vpop.eup %748  ;;  %v545_v19 = vmul.f32 %v747_v24, %v910_v43 }
 0x144   :  { %752 = vtanh.f32 %v511_v17  ;;  %v481_v51 = vmul.f32 0.6931472, %v749_v58 }
 0x145   :  { %562 = vst.msk [vmem:[%s1119_s4 + $0x38] sm:$0xff] %vm554_vm10, %v545_v19  ;;  %v751_v50 = vpop.eup %750 }
 0x146   :  { %v487_v0 = vsel %vm486_vm1, %v484_v2, %v481_v51  ;;  %v553_v21 = vmul.f32 %v751_v50, %v993_v59 }
 0x147   :  { %v519_v55 = vadd.f32 %v487_v0, %v295_v30 }
 0x148   :  { %570 = vst.msk [vmem:[%s1119_s4 + $0x78] sm:$0xff] %vm554_vm10, %v553_v21 }
 0x149   :  { %754 = vtanh.f32 %v519_v55 }
 0x14e   :  { %v753_v43 = vpop.eup %752 }
 0x14f   :  { %v543_v28 = vmul.f32 %v753_v43, %v1009_v47 }
 0x151   :  { %560 = vst.msk [vmem:[%s1119_s4 + $0x28] sm:$0xff] %vm554_vm10, %v543_v28 }
 0x153   :  { %v755_v34 = vpop.eup %754 }
 0x154   :  { %v551_v48 = vmul.f32 %v755_v34, %v1021_v6 }
 0x156   :  { %568 = vst.msk [vmem:[%s1119_s4 + $0x68] sm:$0xff] %vm554_vm10, %v551_v48 }

// kernel: _lambda_.12
= control target key start
LH: loop header
LB: loop body
LE: loop exit
PB: predicated region body
PF: predicated region fallthrough
CT: control target
= control target key end

     0   :  { %vm82_vm0 = vcmask 130048   ;;  %vm522_vm10 = vcmask 64512   ;;  %s1043_s1 = inlined_call_operand.vmem [shape: bf16[16,8], index: 1, kind: input, shape index: {}]   ;;  %s1044_s0 = inlined_call_operand.vmem [shape: bf16[128,16], index: 0, kind: input, shape index: {}]   ;;  %s1045_s2 = inlined_call_operand.vmem [shape: f32[1,8], index: 2, kind: input, shape index: {}]   ;;  %s1046_s3 = inlined_call_operand.vmem [shape: f32[1,8], index: 3, kind: input, shape index: {}]   ;;  %s1047_s4 = inlined_call_operand.vmem [shape: f32[128,8], index: 4, kind: output, shape index: {}]  }
   0x1   :  { %v591_v0 = vld [vmem:[%s1043_s1] sm:$0xff]   ;;  %v594_v3 = vld [vmem:[%s1044_s0 + $0x8] sm:$0xff]   ;;  %v596_v5 = vld [vmem:[%s1044_s0 + $0x10] sm:$0xff]  }
   0x2   :  { %v592_v1 = vld [vmem:[%s1044_s0] sm:$0xff]   ;;  %571 = vmatprep.subr.bf16.mxu0 %v591_v0  ;;  %589 = vmatprep.subr.bf16.mxu1 %v591_v0  ;;  %v595_v4 = vld [vmem:[%s1044_s0 + $0x28] sm:$0xff]   ;;  %v597_v6 = vld [vmem:[%s1044_s0 + $0x30] sm:$0xff]  }
   0x3   :  { %v593_v2 = vld [vmem:[%s1044_s0 + $0x20] sm:$0xff]   ;;  %572 = vmatpush3.bf16.msra.mxu0 %v591_v0  ;;  %590 = vmatpush3.bf16.msra.mxu1 %v591_v0  ;;  %v598_v7 = vld [vmem:[%s1044_s0 + $0x18] sm:$0xff]  }
   0x4   :  { %573 = vmatprep.mubr.msk.bf16.mxu0 %vm82_vm0, %v592_v1  ;;  %581 = vmatprep.mubr.msk.bf16.mxu1 %vm82_vm0, %v593_v2  ;;  %v599_v8 = vld [vmem:[%s1044_s0 + $0x38] sm:$0xff]   ;;  %v759_v9 = vld [vmem:[%s1045_s2] ss:$0 sm:$0xff] }
   0x5   :  { %v764_v11 = vld [vmem:[%s1046_s3] ss:$0 sm:$0xff] }
   0x6   :  { %574 = vmatmul.mubr.msk.bf16.vlgmr.msra.gmra.mrb[0].mxu0 %vm82_vm0, %v594_v3  ;;  %582 = vmatmul.mubr.msk.bf16.vlgmr.msra.gmra.mrb[0].mxu1 %vm82_vm0, %v595_v4 }
   0x7   :  { %577 = vmatprep.mubr.msk.bf16.mxu0 %vm82_vm0, %v596_v5  ;;  %585 = vmatprep.mubr.msk.bf16.mxu1 %vm82_vm0, %v597_v6 }
   0xe   :  { %578 = vmatmul.mubr.msk.bf16.gmra.mrb[4].mxu0 %vm82_vm0, %v598_v7  ;;  %586 = vmatmul.mubr.msk.bf16.gmra.mrb[4].mxu1 %vm82_vm0, %v599_v8 }
  0xd9   :  { %v575_v10 = vpop.f32.mrb[0].mxu0  ;;  %v583_v12 = vpop.f32.mrb[0].mxu1 }
  0xda   :  { %v213_v13 = vmul.f32 %v575_v10, %v759_v9  ;;  %v221_v14 = vmul.f32 %v583_v12, %v759_v9  ;;  %v141_v15 = vpop.f32.mrb[1].mxu0  ;;  %v173_v16 = vpop.f32.mrb[1].mxu1 }
  0xdb   :  { %v211_v17 = vmul.f32 %v759_v9, %v141_v15  ;;  %v219_v18 = vmul.f32 %v759_v9, %v173_v16  ;;  %v576_v19 = vpop.f32.mrb[2].mxu0  ;;  %v584_v20 = vpop.f32.mrb[2].mxu1 }
  0xdc   :  { %v771_v21 = vadd.f32 %v764_v11, %v213_v13  ;;  %v774_v22 = vadd.f32 %v764_v11, %v221_v14  ;;  %v214_v23 = vmul.f32 %v576_v19, %v759_v9  ;;  %v222_v24 = vmul.f32 %v584_v20, %v759_v9  ;;  %v144_v25 = vpop.f32.mrb[3].mxu0  ;;  %v176_v26 = vpop.f32.mrb[3].mxu1 }
  0xdd   :  { %v779_v27 = vadd.f32 %v764_v11, %v211_v17  ;;  %v782_v28 = vadd.f32 %v764_v11, %v219_v18  ;;  %v212_v29 = vmul.f32 %v759_v9, %v144_v25  ;;  %v220_v30 = vmul.f32 %v759_v9, %v176_v26 }
  0xde   :  { %v268_v31 = vand.u32 2147483647, %v771_v21  ;;  %v276_v32 = vand.u32 2147483647, %v774_v22  ;;  %v791_v37 = vadd.f32 %v764_v11, %v214_v23  ;;  %v794_v38 = vadd.f32 %v764_v11, %v222_v24 }
  0xdf   :  { %v266_v33 = vand.u32 2147483647, %v779_v27  ;;  %v274_v34 = vand.u32 2147483647, %v782_v28  ;;  %v797_v41 = vadd.f32 %v764_v11, %v212_v29  ;;  %v800_v42 = vadd.f32 %v764_v11, %v220_v30 }
  0xe0   :  { %v284_v35 = vsub.f32 0.0, %v268_v31  ;;  %v292_v36 = vsub.f32 0.0, %v276_v32  ;;  %v269_v49 = vand.u32 2147483647, %v791_v37  ;;  %v277_v51 = vand.u32 2147483647, %v794_v38 }
  0xe1   :  { %v282_v39 = vsub.f32 0.0, %v266_v33  ;;  %v290_v40 = vsub.f32 0.0, %v274_v34  ;;  %v579_v43 = vpop.f32.mrb[4].mxu0  ;;  %v587_v44 = vpop.f32.mrb[4].mxu1  ;;  %v267_v52 = vand.u32 2147483647, %v797_v41 }
  0xe2   :  { %v302_v45 = vmul.f32 1.442695, %v284_v35  ;;  %v318_v46 = vmul.f32 1.442695, %v292_v36  ;;  %v217_v50 = vmul.f32 %v579_v43, %v759_v9  ;;  %v157_v53 = vpop.f32.mrb[5].mxu0  ;;  %v285_v54 = vsub.f32 0.0, %v269_v49 }
  0xe3   :  { %v298_v47 = vmul.f32 1.442695, %v282_v39  ;;  %v314_v48 = vmul.f32 1.442695, %v290_v40  ;;  %v275_v55 = vand.u32 2147483647, %v800_v42  ;;  %v225_v1 = vmul.f32 %v587_v44, %v759_v9 }
  0xe4   :  { %600 = vpow2.f32 %v302_v45  ;;  %v189_v56 = vpop.f32.mrb[5].mxu1  ;;  %v580_v57 = vpop.f32.mrb[6].mxu0  ;;  %v293_v58 = vsub.f32 0.0, %v277_v51  ;;  %v283_v59 = vsub.f32 0.0, %v267_v52  ;;  %v808_v60 = vadd.f32 %v764_v11, %v217_v50 }
  0xe5   :  { %602 = vpow2.f32 %v318_v46  ;;  %v588_v61 = vpop.f32.mrb[6].mxu1  ;;  %v160_v62 = vpop.f32.mrb[7].mxu0  ;;  %v304_v63 = vmul.f32 1.442695, %v285_v54  ;;  %v291_v0 = vsub.f32 0.0, %v275_v55  ;;  %v252_v3 = vmax.f32 %v771_v21, 0.0 }
  0xe6   :  { %604 = vpow2.f32 %v298_v47  ;;  %v811_v2 = vpop.f32.mrb[7].mxu1  ;;  %v320_v4 = vmul.f32 1.442695, %v293_v58  ;;  %v300_v5 = vmul.f32 1.442695, %v283_v59  ;;  %v215_v6 = vmul.f32 %v759_v9, %v157_v53 }
  0xe7   :  { %606 = vpow2.f32 %v314_v48  ;;  %v316_v7 = vmul.f32 1.442695, %v291_v0  ;;  %v272_v8 = vand.u32 2147483647, %v808_v60  ;;  %v817_v10 = vadd.f32 %v764_v11, %v225_v1 }
  0xe8   :  { %608 = vpow2.f32 %v304_v63  ;;  %v260_v12 = vmax.f32 %v774_v22, 0.0  ;;  %v821_v13 = vadd.f32 %v764_v11, %v215_v6  ;;  %v223_v14 = vmul.f32 %v759_v9, %v189_v56 }
  0xe9   :  { %610 = vpow2.f32 %v320_v4  ;;  %v288_v15 = vsub.f32 0.0, %v272_v8  ;;  %v280_v16 = vand.u32 2147483647, %v817_v10  ;;  %v218_v17 = vmul.f32 %v580_v57, %v759_v9 }
  0xea   :  { %612 = vpow2.f32 %v300_v5  ;;  %v250_v18 = vmax.f32 %v779_v27, 0.0  ;;  %v258_v19 = vmax.f32 %v782_v28, 0.0  ;;  %v253_v20 = vmax.f32 %v791_v37, 0.0 }
  0xeb   :  { %v270_v23 = vand.u32 2147483647, %v821_v13  ;;  %v261_v24 = vmax.f32 %v794_v38, 0.0  ;;  %614 = vpow2.f32 %v316_v7  ;;  %v310_v25 = vmul.f32 1.442695, %v288_v15 }
  0xec   :  { %v832_v26 = vadd.f32 %v764_v11, %v223_v14  ;;  %v251_v30 = vmax.f32 %v797_v41, 0.0  ;;  %v259_v31 = vmax.f32 %v800_v42, 0.0  ;;  %v256_v32 = vmax.f32 %v808_v60, 0.0 }
  0xed   :  { %v296_v33 = vsub.f32 0.0, %v280_v16  ;;  %616 = vpow2.f32 %v310_v25  ;;  %v838_v39 = vadd.f32 %v764_v11, %v218_v17  ;;  %v840_v45 = vsub.f32 0.0, %v270_v23 }
  0xee   :  { %v601_v29 = vpop.eup %600  ;;  %v843_v46 = vmul.f32 %v588_v61, %v759_v9  ;;  %v278_v50 = vand.u32 2147483647, %v832_v26  ;;  %v849_v57 = vmul.f32 %v759_v9, %v160_v62 }
  0xef   :  { %v603_v34 = vpop.eup %602  ;;  %v348_v35 = vadd.f32 1.0, %v601_v29  ;;  %v351_v36 = vmul.f32 -0.5, %v601_v29  ;;  %v354_v48 = vand.u32 2147483647, %v601_v29  ;;  %v846_v56 = vmul.f32 1.442695, %v296_v33 }
  0xf0   :  { %v605_v40 = vpop.eup %604  ;;  %v420_v43 = vadd.f32 1.0, %v603_v34  ;;  %v423_v44 = vmul.f32 -0.5, %v603_v34  ;;  %v426_v52 = vand.u32 2147483647, %v603_v34 }
  0xf1   :  { %v607_v47 = vpop.eup %606  ;;  %618 = vlog2.f32 %v348_v35  ;;  %v330_v49 = vadd.f32 1.0, %v605_v40  ;;  %v352_v51 = vadd.f32 1.0, %v351_v36  ;;  %v333_v53 = vmul.f32 -0.5, %v605_v40 }
  0xf2   :  { %620 = vlog2.f32 %v420_v43  ;;  %v609_v54 = vpop.eup %608  ;;  %v402_v55 = vadd.f32 1.0, %v607_v47  ;;  %v424_v59 = vadd.f32 1.0, %v423_v44  ;;  %v336_v63 = vand.u32 2147483647, %v605_v40 }
  0xf3   :  { %622 = vlog2.f32 %v330_v49  ;;  %v611_v58 = vpop.eup %610  ;;  %v334_v61 = vadd.f32 1.0, %v333_v53  ;;  %v405_v0 = vmul.f32 -0.5, %v607_v47  ;;  %vm851_vm1 = vcmp.lt.f32.partialorder %v354_v48, 0.0004427343 }
  0xf4   :  { %v613_v1 = vpop.eup %612  ;;  %624 = vlog2.f32 %v402_v55  ;;  %v408_v5 = vand.u32 2147483647, %v607_v47  ;;  %v357_v6 = vadd.f32 1.0, %v609_v54  ;;  %v360_v7 = vmul.f32 -0.5, %v609_v54 }
  0xf5   :  { %v353_v8 = vmul.f32 %v601_v29, %v352_v51  ;;  %vm855_vm2 = vcmp.lt.f32.partialorder %v426_v52, 0.0004427343  ;;  %v406_v62 = vadd.f32 1.0, %v405_v0  ;;  %v363_v15 = vand.u32 2147483647, %v609_v54  ;;  %v615_v16 = vpop.eup %614 }
  0xf6   :  { %626 = vlog2.f32 %v357_v6  ;;  %v361_v17 = vadd.f32 1.0, %v360_v7  ;;  %v429_v23 = vadd.f32 1.0, %v611_v58  ;;  %v432_v25 = vmul.f32 -0.5, %v611_v58 }
  0xf7   :  { %v425_v33 = vmul.f32 %v603_v34, %v424_v59  ;;  %v335_v35 = vmul.f32 %v605_v40, %v334_v61  ;;  %vm859_vm3 = vcmp.lt.f32.partialorder %v336_v63, 0.0004427343  ;;  %v339_v43 = vadd.f32 1.0, %v613_v1  ;;  %v863_v44 = vpop.eup %616 }
  0xf8   :  { %vm865_vm4 = vcmp.lt.f32.partialorder %v408_v5, 0.0004427343  ;;  %628 = vlog2.f32 %v429_v23  ;;  %v433_v48 = vadd.f32 1.0, %v432_v25  ;;  %v435_v49 = vand.u32 2147483647, %v611_v58 }
  0xf9   :  { %v342_v51 = vmul.f32 -0.5, %v613_v1  ;;  %v407_v52 = vmul.f32 %v607_v47, %v406_v62  ;;  %630 = vlog2.f32 %v339_v43  ;;  %v345_v53 = vand.u32 2147483647, %v613_v1 }
  0xfa   :  { %v411_v34 = vadd.f32 1.0, %v615_v16  ;;  %v362_v55 = vmul.f32 %v609_v54, %v361_v17  ;;  %vm869_vm5 = vcmp.lt.f32.partialorder %v363_v15, 0.0004427343  ;;  %v414_v63 = vmul.f32 -0.5, %v615_v16 }
  0xfb   :  { %v619_v40 = vpop.eup %618  ;;  %v343_v61 = vadd.f32 1.0, %v342_v51  ;;  %v417_v6 = vand.u32 2147483647, %v615_v16  ;;  %v384_v7 = vadd.f32 1.0, %v863_v44  ;;  %v434_v47 = vmul.f32 %v611_v58, %v433_v48 }
  0xfc   :  { %v621_v0 = vpop.eup %620  ;;  %v350_v5 = vmul.f32 0.6931472, %v619_v40  ;;  %632 = vlog2.f32 %v411_v34  ;;  %vm874_vm6 = vcmp.lt.f32.partialorder %v435_v49, 0.0004427343  ;;  %v415_v54 = vadd.f32 1.0, %v414_v63 }
  0xfd   :  { %v623_v23 = vpop.eup %622  ;;  %v422_v25 = vmul.f32 0.6931472, %v621_v0  ;;  %vm880_vm7 = vcmp.lt.f32.partialorder %v345_v53, 0.0004427343  ;;  %634 = vlog2.f32 %v384_v7  ;;  %v387_v51 = vmul.f32 -0.5, %v863_v44 }
  0xfe   :  { %v356_v15 = vsel %vm851_vm1, %v353_v8, %v350_v5  ;;  %v332_v17 = vmul.f32 0.6931472, %v623_v23  ;;  %v625_v34 = vpop.eup %624  ;;  %v344_v49 = vmul.f32 %v613_v1, %v343_v61  ;;  %v390_v40 = vand.u32 2147483647, %v863_v44 }
  0xff   :  { %v476_v58 = vadd.f32 %v356_v15, %v252_v3  ;;  %v428_v48 = vsel %vm855_vm2, %v425_v33, %v422_v25  ;;  %v404_v53 = vmul.f32 0.6931472, %v625_v34  ;;  %vm894_vm8 = vcmp.lt.f32.partialorder %v417_v6, 0.0004427343 }
 0x100   :  { %v484_v4 = vadd.f32 %v428_v48, %v260_v12  ;;  %v338_v8 = vsel %vm859_vm3, %v335_v35, %v332_v17  ;;  %v627_v0 = vpop.eup %626  ;;  %v416_v14 = vmul.f32 %v615_v16, %v415_v54  ;;  %v388_v1 = vadd.f32 1.0, %v387_v51 }
 0x101   :  { %636 = vtanh.f32 %v476_v58  ;;  %v474_v3 = vadd.f32 %v338_v8, %v250_v18  ;;  %v410_v33 = vsel %vm865_vm4, %v407_v52, %v404_v53  ;;  %v359_v12 = vmul.f32 0.6931472, %v627_v0 }
 0x102   :  { %638 = vtanh.f32 %v484_v4  ;;  %v306_v36 = vmul.f32 1.442695, %v840_v45  ;;  %v629_v35 = vpop.eup %628  ;;  %v482_v61 = vadd.f32 %v410_v33, %v258_v19  ;;  %vm905_vm9 = vcmp.lt.f32.partialorder %v390_v40, 0.0004427343 }
 0x103   :  { %640 = vtanh.f32 %v474_v3  ;;  %v294_v18 = vsub.f32 0.0, %v278_v50  ;;  %v631_v16 = vpop.eup %630  ;;  %v365_v29 = vsel %vm869_vm5, %v362_v55, %v359_v12  ;;  %v431_v52 = vmul.f32 0.6931472, %v629_v35 }
 0x104   :  { %642 = vpow2.f32 %v846_v56  ;;  %v273_v45 = vand.u32 2147483647, %v838_v39  ;;  %v477_v19 = vadd.f32 %v365_v29, %v253_v20  ;;  %v341_v6 = vmul.f32 0.6931472, %v631_v16 }
 0x105   :  { %644 = vtanh.f32 %v482_v61  ;;  %v322_v7 = vmul.f32 1.442695, %v294_v18  ;;  %v437_v25 = vsel %vm874_vm6, %v434_v47, %v431_v52  ;;  %v921_v55 = vadd.f32 %v764_v11, %v843_v46 }
 0x106   :  { %v633_v23 = vpop.eup %632  ;;  %646 = vpow2.f32 %v306_v36  ;;  %v289_v50 = vsub.f32 0.0, %v273_v45  ;;  %v485_v56 = vadd.f32 %v437_v25, %v261_v24  ;;  %v347_v59 = vsel %vm880_vm7, %v344_v49, %v341_v6 }
 0x107   :  { %648 = vtanh.f32 %v477_v19  ;;  %v413_v20 = vmul.f32 0.6931472, %v633_v23  ;;  %v635_v54 = vpop.eup %634  ;;  %v475_v15 = vadd.f32 %v347_v59, %v251_v30  ;;  %v389_v47 = vmul.f32 %v863_v44, %v388_v1 }
 0x108   :  { %650 = vpow2.f32 %v322_v7  ;;  %v312_v62 = vmul.f32 1.442695, %v289_v50  ;;  %v386_v17 = vmul.f32 0.6931472, %v635_v54  ;;  %v281_v51 = vand.u32 2147483647, %v921_v55 }
 0x109   :  { %652 = vtanh.f32 %v485_v56  ;;  %v419_v46 = vsel %vm894_vm8, %v416_v14, %v413_v20  ;;  %v937_v43 = vadd.f32 %v764_v11, %v849_v57  ;;  %v224_v30 = vmul.f32 %v759_v9, %v811_v2 }
 0x10a   :  { %654 = vtanh.f32 %v475_v15  ;;  %v483_v24 = vadd.f32 %v419_v46, %v259_v31  ;;  %v392_v34 = vsel %vm905_vm9, %v389_v47, %v386_v17  ;;  %v297_v58 = vsub.f32 0.0, %v281_v51 }
 0x10b   :  { %v637_v44 = vpop.eup %636  ;;  %656 = vpow2.f32 %v312_v62  ;;  %v480_v31 = vadd.f32 %v392_v34, %v256_v32  ;;  %v271_v9 = vand.u32 2147483647, %v937_v43  ;;  %v949_v2 = vadd.f32 %v764_v11, %v224_v30 }
 0x10c   :  { %v639_v48 = vpop.eup %638  ;;  %v508_v49 = vmul.f32 %v637_v44, %v771_v21  ;;  %658 = vtanh.f32 %v483_v24  ;;  %v328_v4 = vmul.f32 1.442695, %v297_v58  ;;  %v264_v46 = vmax.f32 %v817_v10, 0.0 }
 0x10d   :  { %v641_v40 = vpop.eup %640  ;;  %v516_v57 = vmul.f32 %v639_v48, %v774_v22  ;;  %660 = vtanh.f32 %v480_v31  ;;  %v287_v63 = vsub.f32 0.0, %v271_v9  ;;  %v279_v3 = vand.u32 2147483647, %v949_v2 }
 0x10e   :  { %v643_v8 = vpop.eup %642  ;;  %525 = vst.msk [vmem:[%s1047_s4 + $0x10] sm:$0xff] %vm522_vm10, %v508_v49  ;;  %v506_v21 = vmul.f32 %v641_v40, %v779_v27  ;;  %662 = vpow2.f32 %v328_v4  ;;  %v254_v58 = vmax.f32 %v821_v13, 0.0 }
 0x10f   :  { %v645_v53 = vpop.eup %644  ;;  %533 = vst.msk [vmem:[%s1047_s4 + $0x50] sm:$0xff] %vm522_vm10, %v516_v57  ;;  %v456_v22 = vadd.f32 1.0, %v643_v8  ;;  %v459_v61 = vmul.f32 -0.5, %v643_v8  ;;  %v295_v16 = vsub.f32 0.0, %v279_v3  ;;  %v462_v25 = vand.u32 2147483647, %v643_v8 }
 0x110   :  { %v647_v32 = vpop.eup %646  ;;  %523 = vst.msk [vmem:[%s1047_s4] sm:$0xff] %vm522_vm10, %v506_v21  ;;  %v514_v11 = vmul.f32 %v645_v53, %v782_v28  ;;  %v308_v28 = vmul.f32 1.442695, %v287_v63 }
 0x111   :  { %v649_v0 = vpop.eup %648  ;;  %664 = vlog2.f32 %v456_v22  ;;  %v366_v27 = vadd.f32 1.0, %v647_v32  ;;  %v369_v29 = vmul.f32 -0.5, %v647_v32  ;;  %v324_v6 = vmul.f32 1.442695, %v295_v16 }
 0x112   :  { %v966_v14 = vpop.eup %650  ;;  %531 = vst.msk [vmem:[%s1047_s4 + $0x40] sm:$0xff] %vm522_vm10, %v514_v11  ;;  %v509_v1 = vmul.f32 %v649_v0, %v791_v37  ;;  %v372_v20 = vand.u32 2147483647, %v647_v32  ;;  %vm463_vm11 = vcmp.lt.f32.partialorder %v462_v25, 0.0004427343 }
 0x113   :  { %v653_v33 = vpop.eup %652  ;;  %666 = vlog2.f32 %v366_v27  ;;  %v438_v12 = vadd.f32 1.0, %v966_v14  ;;  %v441_v19 = vmul.f32 -0.5, %v966_v14  ;;  %v370_v50 = vadd.f32 1.0, %v369_v29 }
 0x114   :  { %v655_v36 = vpop.eup %654  ;;  %526 = vst.msk [vmem:[%s1047_s4 + $0x18] sm:$0xff] %vm522_vm10, %v509_v1  ;;  %v517_v35 = vmul.f32 %v653_v33, %v794_v38  ;;  %vm373_vm12 = vcmp.lt.f32.partialorder %v372_v20, 0.0004427343  ;;  %v257_v27 = vmax.f32 %v838_v39, 0.0 }
 0x115   :  { %v657_v5 = vpop.eup %656  ;;  %v507_v18 = vmul.f32 %v655_v36, %v797_v41  ;;  %668 = vlog2.f32 %v438_v12  ;;  %v460_v41 = vadd.f32 1.0, %v459_v61  ;;  %v442_v47 = vadd.f32 1.0, %v441_v19 }
 0x116   :  { %v659_v37 = vpop.eup %658  ;;  %534 = vst.msk [vmem:[%s1047_s4 + $0x58] sm:$0xff] %vm522_vm10, %v517_v35  ;;  %v393_v52 = vadd.f32 1.0, %v657_v5  ;;  %670 = vpow2.f32 %v308_v28  ;;  %v396_v56 = vmul.f32 -0.5, %v657_v5  ;;  %v371_v24 = vmul.f32 %v647_v32, %v370_v50 }
 0x117   :  { %524 = vst.msk [vmem:[%s1047_s4 + $0x8] sm:$0xff] %vm522_vm10, %v507_v18  ;;  %v515_v38 = vmul.f32 %v659_v37, %v800_v42  ;;  %v661_v45 = vpop.eup %660  ;;  %v461_v15 = vmul.f32 %v643_v8, %v460_v41  ;;  %v443_v40 = vmul.f32 %v966_v14, %v442_v47  ;;  %v399_v57 = vand.u32 2147483647, %v657_v5 }
 0x118   :  { %672 = vlog2.f32 %v393_v52  ;;  %v663_v7 = vpop.eup %662  ;;  %v512_v23 = vmul.f32 %v661_v45, %v808_v60  ;;  %v444_v60 = vand.u32 2147483647, %v966_v14  ;;  %v397_v30 = vadd.f32 1.0, %v396_v56 }
 0x119   :  { %532 = vst.msk [vmem:[%s1047_s4 + $0x48] sm:$0xff] %vm522_vm10, %v515_v38  ;;  %v465_v59 = vadd.f32 1.0, %v663_v7  ;;  %674 = vpow2.f32 %v324_v6  ;;  %v468_v48 = vmul.f32 -0.5, %v663_v7  ;;  %v262_v8 = vmax.f32 %v832_v26, 0.0 }
 0x11a   :  { %529 = vst.msk [vmem:[%s1047_s4 + $0x30] sm:$0xff] %vm522_vm10, %v512_v23  ;;  %vm445_vm13 = vcmp.lt.f32.partialorder %v444_v60, 0.0004427343  ;;  %v398_v22 = vmul.f32 %v657_v5, %v397_v30  ;;  %vm400_vm14 = vcmp.lt.f32.partialorder %v399_v57, 0.0004427343  ;;  %v265_v5 = vmax.f32 %v921_v55, 0.0 }
 0x11b   :  { %v665_v42 = vpop.eup %664  ;;  %676 = vlog2.f32 %v465_v59  ;;  %v469_v0 = vadd.f32 1.0, %v468_v48  ;;  %v471_v3 = vand.u32 2147483647, %v663_v7  ;;  %v255_v50 = vmax.f32 %v937_v43, 0.0 }
 0x11c   :  { %v458_v54 = vmul.f32 0.6931472, %v665_v42 }
 0x11d   :  { %v667_v62 = vpop.eup %666  ;;  %v470_v35 = vmul.f32 %v663_v7, %v469_v0  ;;  %vm472_vm15 = vcmp.lt.f32.partialorder %v471_v3, 0.0004427343 }
 0x11e   :  { %v464_v17 = vsel %vm463_vm11, %v461_v15, %v458_v54  ;;  %v368_v51 = vmul.f32 0.6931472, %v667_v62 }
 0x11f   :  { %v669_v44 = vpop.eup %668  ;;  %v488_v34 = vadd.f32 %v464_v17, %v264_v46 }
 0x120   :  { %v374_v49 = vsel %vm373_vm12, %v371_v24, %v368_v51  ;;  %v440_v31 = vmul.f32 0.6931472, %v669_v44  ;;  %v671_v4 = vpop.eup %670 }
 0x121   :  { %678 = vtanh.f32 %v488_v34  ;;  %v478_v9 = vadd.f32 %v374_v49, %v254_v58  ;;  %v375_v32 = vadd.f32 1.0, %v671_v4  ;;  %v378_v61 = vmul.f32 -0.5, %v671_v4 }
 0x122   :  { %v673_v21 = vpop.eup %672  ;;  %v446_v53 = vsel %vm445_vm13, %v443_v40, %v440_v31  ;;  %v381_v38 = vand.u32 2147483647, %v671_v4 }
 0x123   :  { %680 = vtanh.f32 %v478_v9  ;;  %v486_v11 = vadd.f32 %v446_v53, %v262_v8  ;;  %v395_v63 = vmul.f32 0.6931472, %v673_v21  ;;  %v675_v14 = vpop.eup %674  ;;  %v379_v29 = vadd.f32 1.0, %v378_v61 }
 0x124   :  { %682 = vlog2.f32 %v375_v32  ;;  %v447_v28 = vadd.f32 1.0, %v675_v14  ;;  %v450_v45 = vmul.f32 -0.5, %v675_v14  ;;  %vm382_vm0 = vcmp.lt.f32.partialorder %v381_v38, 0.0004427343 }
 0x125   :  { %684 = vtanh.f32 %v486_v11  ;;  %v401_v1 = vsel %vm400_vm14, %v398_v22, %v395_v63  ;;  %v677_v33 = vpop.eup %676  ;;  %v380_v25 = vmul.f32 %v671_v4, %v379_v29  ;;  %v453_v42 = vand.u32 2147483647, %v675_v14 }
 0x126   :  { %v481_v12 = vadd.f32 %v401_v1, %v257_v27  ;;  %v467_v36 = vmul.f32 0.6931472, %v677_v33  ;;  %v451_v56 = vadd.f32 1.0, %v450_v45 }
 0x127   :  { %vm454_vm1 = vcmp.lt.f32.partialorder %v453_v42, 0.0004427343 }
 0x128   :  { %686 = vtanh.f32 %v481_v12  ;;  %v473_v18 = vsel %vm472_vm15, %v470_v35, %v467_v36  ;;  %v452_v62 = vmul.f32 %v675_v14, %v451_v56 }
 0x129   :  { %688 = vlog2.f32 %v447_v28  ;;  %v489_v16 = vadd.f32 %v473_v18, %v265_v5 }
 0x12b   :  { %v679_v37 = vpop.eup %678  ;;  %690 = vtanh.f32 %v489_v16 }
 0x12c   :  { %v520_v52 = vmul.f32 %v679_v37, %v817_v10 }
 0x12d   :  { %v681_v41 = vpop.eup %680 }
 0x12e   :  { %v683_v19 = vpop.eup %682  ;;  %537 = vst.msk [vmem:[%s1047_s4 + $0x70] sm:$0xff] %vm522_vm10, %v520_v52  ;;  %v510_v6 = vmul.f32 %v681_v41, %v821_v13 }
 0x12f   :  { %v685_v7 = vpop.eup %684  ;;  %v377_v23 = vmul.f32 0.6931472, %v683_v19 }
 0x130   :  { %527 = vst.msk [vmem:[%s1047_s4 + $0x20] sm:$0xff] %vm522_vm10, %v510_v6  ;;  %v518_v10 = vmul.f32 %v685_v7, %v832_v26  ;;  %v263_v26 = vmax.f32 %v949_v2, 0.0 }
 0x131   :  { %v383_v59 = vsel %vm382_vm0, %v380_v25, %v377_v23 }
 0x132   :  { %v687_v20 = vpop.eup %686  ;;  %535 = vst.msk [vmem:[%s1047_s4 + $0x60] sm:$0xff] %vm522_vm10, %v518_v10  ;;  %v479_v13 = vadd.f32 %v383_v59, %v255_v50 }
 0x133   :  { %v689_v54 = vpop.eup %688  ;;  %v513_v15 = vmul.f32 %v687_v20, %v838_v39 }
 0x134   :  { %692 = vtanh.f32 %v479_v13  ;;  %v449_v47 = vmul.f32 0.6931472, %v689_v54 }
 0x135   :  { %530 = vst.msk [vmem:[%s1047_s4 + $0x38] sm:$0xff] %vm522_vm10, %v513_v15  ;;  %v691_v46 = vpop.eup %690 }
 0x136   :  { %v455_v60 = vsel %vm454_vm1, %v452_v62, %v449_v47  ;;  %v521_v17 = vmul.f32 %v691_v46, %v921_v55 }
 0x137   :  { %v487_v51 = vadd.f32 %v455_v60, %v263_v26 }
 0x138   :  { %538 = vst.msk [vmem:[%s1047_s4 + $0x78] sm:$0xff] %vm522_vm10, %v521_v17 }
 0x139   :  { %694 = vtanh.f32 %v487_v51 }
 0x13e   :  { %v693_v39 = vpop.eup %692 }
 0x13f   :  { %v511_v24 = vmul.f32 %v693_v39, %v937_v43 }
 0x141   :  { %528 = vst.msk [vmem:[%s1047_s4 + $0x28] sm:$0xff] %vm522_vm10, %v511_v24 }
 0x143   :  { %v695_v30 = vpop.eup %694 }
 0x144   :  { %v519_v44 = vmul.f32 %v695_v30, %v949_v2 }
 0x146   :  { %536 = vst.msk [vmem:[%s1047_s4 + $0x68] sm:$0xff] %vm522_vm10, %v519_v44 }

// kernel: _lambda_.13
= control target key start
LH: loop header
LB: loop body
LE: loop exit
PB: predicated region body
PF: predicated region fallthrough
CT: control target
= control target key end

     0   :  { %vm114_vm0 = vcmask 654336   ;;  %vm282_vm1 = vcmask 146432   ;;  %s530_s1 = inlined_call_operand.vmem [shape: bf16[80,18], index: 1, kind: input, shape index: {}]   ;;  %s531_s0 = inlined_call_operand.vmem [shape: bf16[128,80], index: 0, kind: input, shape index: {}]   ;;  %s532_s2 = inlined_call_operand.vmem [shape: f32[1,18], index: 2, kind: input, shape index: {}]   ;;  %s533_s3 = inlined_call_operand.vmem [shape: f32[1,18], index: 3, kind: input, shape index: {}]   ;;  %s534_s4 = inlined_call_operand.vmem [shape: f32[128,18], index: 4, kind: output, shape index: {}]  }
   0x1   :  { %v375_v0 = vld [vmem:[%s530_s1] sm:$0xff]   ;;  %v376_v1 = vld [vmem:[%s530_s1 + $0x8] sm:$0xff]   ;;  %v377_v2 = vld [vmem:[%s530_s1 + $0x10] sm:$0xff]  }
   0x2   :  { %339 = vmatprep.subr.bf16.mxu0 %v375_v0  ;;  %365 = vmatprep.subr.bf16.mxu1 %v375_v0  ;;  %v380_v3 = vld [vmem:[%s531_s0] sm:$0xff]   ;;  %v378_v5 = vld [vmem:[%s530_s1 + $0x18] sm:$0xff]   ;;  %v382_v7 = vld [vmem:[%s531_s0 + $0x8] sm:$0xff]  }
   0x3   :  { %340 = vmatpush3.bf16.msra.mxu0 %v375_v0  ;;  %370 = vmatpush3.bf16.msra.mxu1 %v375_v0  ;;  %v381_v4 = vld [vmem:[%s531_s0 + $0x20] sm:$0xff]   ;;  %v383_v8 = vld [vmem:[%s531_s0 + $0x28] sm:$0xff]   ;;  %v384_v9 = vld [vmem:[%s531_s0 + $0x10] sm:$0xff]  }
   0x4   :  { %341 = vmatprep.subr.bf16.mxu0 %v376_v1  ;;  %366 = vmatprep.subr.bf16.mxu1 %v376_v1  ;;  %v379_v6 = vld [vmem:[%s530_s1 + $0x20] sm:$0xff]   ;;  %v385_v10 = vld [vmem:[%s531_s0 + $0x30] sm:$0xff]   ;;  %v386_v11 = vld [vmem:[%s531_s0 + $0x18] sm:$0xff]  }
   0x5   :  { %349 = vmatprep.mubr.msk.bf16.mxu0 %vm114_vm0, %v380_v3  ;;  %357 = vmatprep.mubr.msk.bf16.mxu1 %vm114_vm0, %v381_v4  ;;  %v387_v12 = vld [vmem:[%s531_s0 + $0x38] sm:$0xff]   ;;  %v324_v13 = vld [vmem:[%s532_s2] ss:$0 sm:$0xff] }
   0x6   :  { %v325_v15 = vld [vmem:[%s533_s3] ss:$0 sm:$0xff] }
   0x7   :  { %342 = vmatpush3.bf16.msra.mxu0 %v376_v1  ;;  %371 = vmatpush3.bf16.msra.mxu1 %v376_v1 }
   0x8   :  { %343 = vmatprep.subr.bf16.mxu0 %v377_v2  ;;  %367 = vmatprep.subr.bf16.mxu1 %v377_v2 }
   0xb   :  { %344 = vmatpush3.bf16.msra.mxu0 %v377_v2  ;;  %372 = vmatpush3.bf16.msra.mxu1 %v377_v2 }
   0xc   :  { %345 = vmatprep.subr.bf16.mxu0 %v378_v5  ;;  %368 = vmatprep.subr.bf16.mxu1 %v378_v5 }
   0xf   :  { %346 = vmatpush3.bf16.msra.mxu0 %v378_v5  ;;  %373 = vmatpush3.bf16.msra.mxu1 %v378_v5 }
  0x10   :  { %347 = vmatprep.subr.bf16.mxu0 %v379_v6  ;;  %369 = vmatprep.subr.bf16.mxu1 %v379_v6 }
  0x13   :  { %348 = vmatpush3.bf16.msra.mxu0 %v379_v6  ;;  %374 = vmatpush3.bf16.msra.mxu1 %v379_v6 }
  0x16   :  { %350 = vmatmul.mubr.msk.bf16.vlgmr.msra.gmra.mrb[0].mxu0 %vm114_vm0, %v382_v7  ;;  %358 = vmatmul.mubr.msk.bf16.vlgmr.msra.gmra.mrb[0].mxu1 %vm114_vm0, %v383_v8 }
  0x17   :  { %353 = vmatprep.mubr.msk.bf16.mxu0 %vm114_vm0, %v384_v9  ;;  %361 = vmatprep.mubr.msk.bf16.mxu1 %vm114_vm0, %v385_v10 }
  0x1e   :  { %354 = vmatmul.mubr.msk.bf16.gmra.mrb[4].mxu0 %vm114_vm0, %v386_v11  ;;  %362 = vmatmul.mubr.msk.bf16.gmra.mrb[4].mxu1 %vm114_vm0, %v387_v12 }
  0xe9   :  { %v351_v14 = vpop.f32.mrb[0].mxu0  ;;  %v359_v16 = vpop.f32.mrb[0].mxu1 }
  0xea   :  { %v245_v17 = vmul.f32 %v351_v14, %v324_v13  ;;  %v253_v18 = vmul.f32 %v359_v16, %v324_v13  ;;  %v173_v19 = vpop.f32.mrb[1].mxu0  ;;  %v205_v20 = vpop.f32.mrb[1].mxu1 }
  0xeb   :  { %v243_v21 = vmul.f32 %v324_v13, %v173_v19  ;;  %v251_v22 = vmul.f32 %v324_v13, %v205_v20  ;;  %v352_v23 = vpop.f32.mrb[2].mxu0  ;;  %v360_v24 = vpop.f32.mrb[2].mxu1 }
  0xec   :  { %v268_v25 = vadd.f32 %v325_v15, %v245_v17  ;;  %v276_v26 = vadd.f32 %v325_v15, %v253_v18  ;;  %v246_v27 = vmul.f32 %v352_v23, %v324_v13  ;;  %v254_v28 = vmul.f32 %v360_v24, %v324_v13  ;;  %v176_v29 = vpop.f32.mrb[3].mxu0  ;;  %v208_v30 = vpop.f32.mrb[3].mxu1 }
  0xed   :  { %v266_v31 = vadd.f32 %v325_v15, %v243_v21  ;;  %v274_v32 = vadd.f32 %v325_v15, %v251_v22  ;;  %v244_v33 = vmul.f32 %v324_v13, %v176_v29  ;;  %v252_v34 = vmul.f32 %v324_v13, %v208_v30 }
  0xee   :  { %285 = vst.msk [vmem:[%s534_s4 + $0x10] sm:$0xff] %vm282_vm1, %v268_v25  ;;  %293 = vst.msk [vmem:[%s534_s4 + $0x50] sm:$0xff] %vm282_vm1, %v276_v26  ;;  %v269_v35 = vadd.f32 %v325_v15, %v246_v27  ;;  %v277_v36 = vadd.f32 %v325_v15, %v254_v28 }
  0xef   :  { %283 = vst.msk [vmem:[%s534_s4] sm:$0xff] %vm282_vm1, %v266_v31  ;;  %291 = vst.msk [vmem:[%s534_s4 + $0x40] sm:$0xff] %vm282_vm1, %v274_v32  ;;  %v267_v37 = vadd.f32 %v325_v15, %v244_v33  ;;  %v275_v38 = vadd.f32 %v325_v15, %v252_v34 }
  0xf0   :  { %286 = vst.msk [vmem:[%s534_s4 + $0x18] sm:$0xff] %vm282_vm1, %v269_v35  ;;  %294 = vst.msk [vmem:[%s534_s4 + $0x58] sm:$0xff] %vm282_vm1, %v277_v36 }
  0xf1   :  { %284 = vst.msk [vmem:[%s534_s4 + $0x8] sm:$0xff] %vm282_vm1, %v267_v37  ;;  %292 = vst.msk [vmem:[%s534_s4 + $0x48] sm:$0xff] %vm282_vm1, %v275_v38  ;;  %v355_v39 = vpop.f32.mrb[4].mxu0  ;;  %v363_v40 = vpop.f32.mrb[4].mxu1 }
  0xf2   :  { %v249_v41 = vmul.f32 %v355_v39, %v324_v13  ;;  %v257_v42 = vmul.f32 %v363_v40, %v324_v13  ;;  %v189_v43 = vpop.f32.mrb[5].mxu0  ;;  %v221_v44 = vpop.f32.mrb[5].mxu1 }
  0xf3   :  { %v247_v45 = vmul.f32 %v324_v13, %v189_v43  ;;  %v255_v46 = vmul.f32 %v324_v13, %v221_v44  ;;  %v356_v47 = vpop.f32.mrb[6].mxu0  ;;  %v364_v48 = vpop.f32.mrb[6].mxu1 }
  0xf4   :  { %v272_v49 = vadd.f32 %v325_v15, %v249_v41  ;;  %v280_v50 = vadd.f32 %v325_v15, %v257_v42  ;;  %v250_v51 = vmul.f32 %v356_v47, %v324_v13  ;;  %v258_v52 = vmul.f32 %v364_v48, %v324_v13  ;;  %v192_v53 = vpop.f32.mrb[7].mxu0  ;;  %v224_v54 = vpop.f32.mrb[7].mxu1 }
  0xf5   :  { %v270_v55 = vadd.f32 %v325_v15, %v247_v45  ;;  %v278_v56 = vadd.f32 %v325_v15, %v255_v46  ;;  %v248_v57 = vmul.f32 %v324_v13, %v192_v53  ;;  %v256_v58 = vmul.f32 %v324_v13, %v224_v54 }
  0xf6   :  { %289 = vst.msk [vmem:[%s534_s4 + $0x30] sm:$0xff] %vm282_vm1, %v272_v49  ;;  %297 = vst.msk [vmem:[%s534_s4 + $0x70] sm:$0xff] %vm282_vm1, %v280_v50  ;;  %v273_v59 = vadd.f32 %v325_v15, %v250_v51  ;;  %v281_v60 = vadd.f32 %v325_v15, %v258_v52 }
  0xf7   :  { %287 = vst.msk [vmem:[%s534_s4 + $0x20] sm:$0xff] %vm282_vm1, %v270_v55  ;;  %295 = vst.msk [vmem:[%s534_s4 + $0x60] sm:$0xff] %vm282_vm1, %v278_v56  ;;  %v271_v61 = vadd.f32 %v325_v15, %v248_v57  ;;  %v279_v62 = vadd.f32 %v325_v15, %v256_v58 }
  0xf8   :  { %290 = vst.msk [vmem:[%s534_s4 + $0x38] sm:$0xff] %vm282_vm1, %v273_v59  ;;  %298 = vst.msk [vmem:[%s534_s4 + $0x78] sm:$0xff] %vm282_vm1, %v281_v60 }
  0xf9   :  { %288 = vst.msk [vmem:[%s534_s4 + $0x28] sm:$0xff] %vm282_vm1, %v271_v61  ;;  %296 = vst.msk [vmem:[%s534_s4 + $0x68] sm:$0xff] %vm282_vm1, %v279_v62 }

// kernel: _lambda_.14
= control target key start
LH: loop header
LB: loop body
LE: loop exit
PB: predicated region body
PF: predicated region fallthrough
CT: control target
= control target key end

     0   :  { %vm117_vm0 = vcmask 654336   ;;  %vm589_vm10 = vcmask 130048   ;;  %s1219_s1 = inlined_call_operand.vmem [shape: bf16[80,16], index: 1, kind: input, shape index: {}]   ;;  %s1220_s0 = inlined_call_operand.vmem [shape: bf16[128,80], index: 0, kind: input, shape index: {}]   ;;  %s1221_s2 = inlined_call_operand.vmem [shape: f32[1,16], index: 2, kind: input, shape index: {}]   ;;  %s1222_s3 = inlined_call_operand.vmem [shape: f32[1,16], index: 3, kind: input, shape index: {}]   ;;  %s1223_s4 = inlined_call_operand.vmem [shape: f32[128,16], index: 4, kind: input, shape index: {}]   ;;  %s1224_s5 = inlined_call_operand.vmem [shape: f32[128,16], index: 5, kind: output, shape index: {}]  }
   0x1   :  { %v682_v0 = vld [vmem:[%s1219_s1] sm:$0xff]   ;;  %v683_v1 = vld [vmem:[%s1219_s1 + $0x8] sm:$0xff]   ;;  %v684_v2 = vld [vmem:[%s1219_s1 + $0x10] sm:$0xff]  }
   0x2   :  { %646 = vmatprep.subr.bf16.mxu0 %v682_v0  ;;  %672 = vmatprep.subr.bf16.mxu1 %v682_v0  ;;  %v687_v3 = vld [vmem:[%s1220_s0] sm:$0xff]   ;;  %v685_v5 = vld [vmem:[%s1219_s1 + $0x18] sm:$0xff]   ;;  %v689_v7 = vld [vmem:[%s1220_s0 + $0x8] sm:$0xff]  }
   0x3   :  { %647 = vmatpush3.bf16.msra.mxu0 %v682_v0  ;;  %677 = vmatpush3.bf16.msra.mxu1 %v682_v0  ;;  %v688_v4 = vld [vmem:[%s1220_s0 + $0x20] sm:$0xff]   ;;  %v690_v8 = vld [vmem:[%s1220_s0 + $0x28] sm:$0xff]   ;;  %v691_v9 = vld [vmem:[%s1220_s0 + $0x10] sm:$0xff]  }
   0x4   :  { %648 = vmatprep.subr.bf16.mxu0 %v683_v1  ;;  %673 = vmatprep.subr.bf16.mxu1 %v683_v1  ;;  %v686_v6 = vld [vmem:[%s1219_s1 + $0x20] sm:$0xff]   ;;  %v692_v10 = vld [vmem:[%s1220_s0 + $0x30] sm:$0xff]   ;;  %v693_v11 = vld [vmem:[%s1220_s0 + $0x18] sm:$0xff]  }
   0x5   :  { %656 = vmatprep.mubr.msk.bf16.mxu0 %vm117_vm0, %v687_v3  ;;  %664 = vmatprep.mubr.msk.bf16.mxu1 %vm117_vm0, %v688_v4  ;;  %v694_v12 = vld [vmem:[%s1220_s0 + $0x38] sm:$0xff]   ;;  %v871_v13 = vld [vmem:[%s1221_s2] ss:$0 sm:$0xff] }
   0x6   :  { %v876_v15 = vld [vmem:[%s1222_s3] ss:$0 sm:$0xff] }
   0x7   :  { %649 = vmatpush3.bf16.msra.mxu0 %v683_v1  ;;  %678 = vmatpush3.bf16.msra.mxu1 %v683_v1 }
   0x8   :  { %650 = vmatprep.subr.bf16.mxu0 %v684_v2  ;;  %674 = vmatprep.subr.bf16.mxu1 %v684_v2 }
   0xb   :  { %651 = vmatpush3.bf16.msra.mxu0 %v684_v2  ;;  %679 = vmatpush3.bf16.msra.mxu1 %v684_v2 }
   0xc   :  { %652 = vmatprep.subr.bf16.mxu0 %v685_v5  ;;  %675 = vmatprep.subr.bf16.mxu1 %v685_v5 }
   0xf   :  { %653 = vmatpush3.bf16.msra.mxu0 %v685_v5  ;;  %680 = vmatpush3.bf16.msra.mxu1 %v685_v5 }
  0x10   :  { %654 = vmatprep.subr.bf16.mxu0 %v686_v6  ;;  %676 = vmatprep.subr.bf16.mxu1 %v686_v6 }
  0x13   :  { %655 = vmatpush3.bf16.msra.mxu0 %v686_v6  ;;  %681 = vmatpush3.bf16.msra.mxu1 %v686_v6 }
  0x16   :  { %657 = vmatmul.mubr.msk.bf16.vlgmr.msra.gmra.mrb[0].mxu0 %vm117_vm0, %v689_v7  ;;  %665 = vmatmul.mubr.msk.bf16.vlgmr.msra.gmra.mrb[0].mxu1 %vm117_vm0, %v690_v8 }
  0x17   :  { %660 = vmatprep.mubr.msk.bf16.mxu0 %vm117_vm0, %v691_v9  ;;  %668 = vmatprep.mubr.msk.bf16.mxu1 %vm117_vm0, %v692_v10 }
  0x1e   :  { %661 = vmatmul.mubr.msk.bf16.gmra.mrb[4].mxu0 %vm117_vm0, %v693_v11  ;;  %669 = vmatmul.mubr.msk.bf16.gmra.mrb[4].mxu1 %vm117_vm0, %v694_v12 }
  0xe9   :  { %v658_v14 = vpop.f32.mrb[0].mxu0  ;;  %v666_v16 = vpop.f32.mrb[0].mxu1 }
  0xea   :  { %v248_v17 = vmul.f32 %v658_v14, %v871_v13  ;;  %v256_v18 = vmul.f32 %v666_v16, %v871_v13  ;;  %v176_v19 = vpop.f32.mrb[1].mxu0  ;;  %v208_v20 = vpop.f32.mrb[1].mxu1 }
  0xeb   :  { %v246_v21 = vmul.f32 %v871_v13, %v176_v19  ;;  %v254_v22 = vmul.f32 %v871_v13, %v208_v20  ;;  %v659_v23 = vpop.f32.mrb[2].mxu0  ;;  %v667_v24 = vpop.f32.mrb[2].mxu1 }
  0xec   :  { %v883_v25 = vadd.f32 %v876_v15, %v248_v17  ;;  %v886_v26 = vadd.f32 %v876_v15, %v256_v18  ;;  %v249_v27 = vmul.f32 %v659_v23, %v871_v13  ;;  %v257_v28 = vmul.f32 %v667_v24, %v871_v13  ;;  %v179_v29 = vpop.f32.mrb[3].mxu0  ;;  %v211_v30 = vpop.f32.mrb[3].mxu1 }
  0xed   :  { %v891_v31 = vadd.f32 %v876_v15, %v246_v21  ;;  %v894_v32 = vadd.f32 %v876_v15, %v254_v22  ;;  %v247_v33 = vmul.f32 %v871_v13, %v179_v29  ;;  %v255_v34 = vmul.f32 %v871_v13, %v211_v30 }
  0xee   :  { %v303_v35 = vand.u32 2147483647, %v883_v25  ;;  %v311_v36 = vand.u32 2147483647, %v886_v26  ;;  %v903_v41 = vadd.f32 %v876_v15, %v249_v27  ;;  %v906_v42 = vadd.f32 %v876_v15, %v257_v28 }
  0xef   :  { %v301_v37 = vand.u32 2147483647, %v891_v31  ;;  %v309_v38 = vand.u32 2147483647, %v894_v32  ;;  %v909_v45 = vadd.f32 %v876_v15, %v247_v33  ;;  %v912_v46 = vadd.f32 %v876_v15, %v255_v34 }
  0xf0   :  { %v319_v39 = vsub.f32 0.0, %v303_v35  ;;  %v327_v40 = vsub.f32 0.0, %v311_v36  ;;  %v304_v53 = vand.u32 2147483647, %v903_v41  ;;  %v312_v55 = vand.u32 2147483647, %v906_v42 }
  0xf1   :  { %v317_v43 = vsub.f32 0.0, %v301_v37  ;;  %v325_v44 = vsub.f32 0.0, %v309_v38  ;;  %v662_v47 = vpop.f32.mrb[4].mxu0  ;;  %v670_v48 = vpop.f32.mrb[4].mxu1  ;;  %v302_v56 = vand.u32 2147483647, %v909_v45 }
  0xf2   :  { %v337_v49 = vmul.f32 1.442695, %v319_v39  ;;  %v353_v50 = vmul.f32 1.442695, %v327_v40  ;;  %v252_v54 = vmul.f32 %v662_v47, %v871_v13  ;;  %v192_v57 = vpop.f32.mrb[5].mxu0  ;;  %v320_v58 = vsub.f32 0.0, %v304_v53 }
  0xf3   :  { %v333_v51 = vmul.f32 1.442695, %v317_v43  ;;  %v349_v52 = vmul.f32 1.442695, %v325_v44  ;;  %v310_v59 = vand.u32 2147483647, %v912_v46  ;;  %v260_v5 = vmul.f32 %v670_v48, %v871_v13 }
  0xf4   :  { %695 = vpow2.f32 %v337_v49  ;;  %v224_v60 = vpop.f32.mrb[5].mxu1  ;;  %v663_v61 = vpop.f32.mrb[6].mxu0  ;;  %v328_v62 = vsub.f32 0.0, %v312_v55  ;;  %v318_v63 = vsub.f32 0.0, %v302_v56  ;;  %v920_v0 = vadd.f32 %v876_v15, %v252_v54 }
  0xf5   :  { %697 = vpow2.f32 %v353_v50  ;;  %v671_v1 = vpop.f32.mrb[6].mxu1  ;;  %v195_v2 = vpop.f32.mrb[7].mxu0  ;;  %v339_v3 = vmul.f32 1.442695, %v320_v58  ;;  %v326_v4 = vsub.f32 0.0, %v310_v59  ;;  %v250_v9 = vmul.f32 %v871_v13, %v192_v57 }
  0xf6   :  { %699 = vpow2.f32 %v333_v51  ;;  %v923_v6 = vpop.f32.mrb[7].mxu1  ;;  %v355_v7 = vmul.f32 1.442695, %v328_v62  ;;  %v335_v8 = vmul.f32 1.442695, %v318_v63  ;;  %v928_v12 = vadd.f32 %v876_v15, %v260_v5 }
  0xf7   :  { %701 = vpow2.f32 %v349_v52  ;;  %v351_v10 = vmul.f32 1.442695, %v326_v4  ;;  %v307_v11 = vand.u32 2147483647, %v920_v0  ;;  %v287_v14 = vmax.f32 %v883_v25, 0.0 }
  0xf8   :  { %703 = vpow2.f32 %v339_v3  ;;  %v932_v16 = vadd.f32 %v876_v15, %v250_v9  ;;  %v258_v17 = vmul.f32 %v871_v13, %v224_v60  ;;  %v315_v19 = vand.u32 2147483647, %v928_v12 }
  0xf9   :  { %705 = vpow2.f32 %v355_v7  ;;  %v323_v18 = vsub.f32 0.0, %v307_v11  ;;  %v253_v20 = vmul.f32 %v663_v61, %v871_v13  ;;  %v295_v21 = vmax.f32 %v886_v26, 0.0 }
  0xfa   :  { %707 = vpow2.f32 %v335_v8  ;;  %v285_v22 = vmax.f32 %v891_v31, 0.0  ;;  %v293_v23 = vmax.f32 %v894_v32, 0.0  ;;  %v305_v24 = vand.u32 2147483647, %v932_v16 }
  0xfb   :  { %v288_v27 = vmax.f32 %v903_v41, 0.0  ;;  %709 = vpow2.f32 %v351_v10  ;;  %v345_v28 = vmul.f32 1.442695, %v323_v18  ;;  %v943_v29 = vadd.f32 %v876_v15, %v258_v17 }
  0xfc   :  { %v296_v33 = vmax.f32 %v906_v42, 0.0  ;;  %v286_v34 = vmax.f32 %v909_v45, 0.0  ;;  %v294_v35 = vmax.f32 %v912_v46, 0.0  ;;  %v331_v36 = vsub.f32 0.0, %v315_v19 }
  0xfd   :  { %711 = vpow2.f32 %v345_v28  ;;  %v949_v40 = vadd.f32 %v876_v15, %v253_v20  ;;  %v951_v48 = vsub.f32 0.0, %v305_v24  ;;  %v954_v49 = vmul.f32 %v671_v1, %v871_v13 }
  0xfe   :  { %v696_v30 = vpop.eup %695  ;;  %v313_v53 = vand.u32 2147483647, %v943_v29  ;;  %v957_v59 = vmul.f32 1.442695, %v331_v36  ;;  %v960_v60 = vmul.f32 %v871_v13, %v195_v2 }
  0xff   :  { %v698_v37 = vpop.eup %697  ;;  %v383_v38 = vadd.f32 1.0, %v696_v30  ;;  %v386_v39 = vmul.f32 -0.5, %v696_v30  ;;  %v389_v51 = vand.u32 2147483647, %v696_v30 }
 0x100   :  { %v700_v43 = vpop.eup %699  ;;  %v455_v44 = vadd.f32 1.0, %v698_v37  ;;  %v458_v47 = vmul.f32 -0.5, %v698_v37  ;;  %v461_v55 = vand.u32 2147483647, %v698_v37 }
 0x101   :  { %v702_v50 = vpop.eup %701  ;;  %713 = vlog2.f32 %v383_v38  ;;  %v365_v52 = vadd.f32 1.0, %v700_v43  ;;  %v387_v54 = vadd.f32 1.0, %v386_v39  ;;  %v368_v56 = vmul.f32 -0.5, %v700_v43 }
 0x102   :  { %715 = vlog2.f32 %v455_v44  ;;  %v704_v57 = vpop.eup %703  ;;  %v437_v58 = vadd.f32 1.0, %v702_v50  ;;  %v459_v62 = vadd.f32 1.0, %v458_v47  ;;  %v371_v1 = vand.u32 2147483647, %v700_v43 }
 0x103   :  { %717 = vlog2.f32 %v365_v52  ;;  %v706_v61 = vpop.eup %705  ;;  %v369_v63 = vadd.f32 1.0, %v368_v56  ;;  %v440_v3 = vmul.f32 -0.5, %v702_v50  ;;  %vm962_vm1 = vcmp.lt.f32.partialorder %v389_v51, 0.0004427343 }
 0x104   :  { %v708_v4 = vpop.eup %707  ;;  %719 = vlog2.f32 %v437_v58  ;;  %v443_v7 = vand.u32 2147483647, %v702_v50  ;;  %v392_v8 = vadd.f32 1.0, %v704_v57  ;;  %v395_v9 = vmul.f32 -0.5, %v704_v57 }
 0x105   :  { %v388_v10 = vmul.f32 %v696_v30, %v387_v54  ;;  %vm966_vm2 = vcmp.lt.f32.partialorder %v461_v55, 0.0004427343  ;;  %v441_v2 = vadd.f32 1.0, %v440_v3  ;;  %v398_v17 = vand.u32 2147483647, %v704_v57  ;;  %v710_v18 = vpop.eup %709 }
 0x106   :  { %721 = vlog2.f32 %v392_v8  ;;  %v396_v19 = vadd.f32 1.0, %v395_v9  ;;  %v464_v20 = vadd.f32 1.0, %v706_v61  ;;  %v467_v24 = vmul.f32 -0.5, %v706_v61 }
 0x107   :  { %v460_v28 = vmul.f32 %v698_v37, %v459_v62  ;;  %v370_v36 = vmul.f32 %v700_v43, %v369_v63  ;;  %vm970_vm3 = vcmp.lt.f32.partialorder %v371_v1, 0.0004427343  ;;  %v374_v39 = vadd.f32 1.0, %v708_v4  ;;  %v974_v44 = vpop.eup %711 }
 0x108   :  { %vm976_vm4 = vcmp.lt.f32.partialorder %v443_v7, 0.0004427343  ;;  %723 = vlog2.f32 %v464_v20  ;;  %v468_v47 = vadd.f32 1.0, %v467_v24  ;;  %v470_v51 = vand.u32 2147483647, %v706_v61 }
 0x109   :  { %v377_v52 = vmul.f32 -0.5, %v708_v4  ;;  %v442_v54 = vmul.f32 %v702_v50, %v441_v2  ;;  %725 = vlog2.f32 %v374_v39  ;;  %v380_v55 = vand.u32 2147483647, %v708_v4 }
 0x10a   :  { %v446_v37 = vadd.f32 1.0, %v710_v18  ;;  %v397_v56 = vmul.f32 %v704_v57, %v396_v19  ;;  %vm980_vm5 = vcmp.lt.f32.partialorder %v398_v17, 0.0004427343  ;;  %v449_v63 = vmul.f32 -0.5, %v710_v18 }
 0x10b   :  { %v714_v43 = vpop.eup %713  ;;  %v378_v62 = vadd.f32 1.0, %v377_v52  ;;  %v452_v7 = vand.u32 2147483647, %v710_v18  ;;  %v419_v8 = vadd.f32 1.0, %v974_v44  ;;  %v469_v50 = vmul.f32 %v706_v61, %v468_v47 }
 0x10c   :  { %v716_v1 = vpop.eup %715  ;;  %v385_v3 = vmul.f32 0.6931472, %v714_v43  ;;  %727 = vlog2.f32 %v446_v37  ;;  %vm985_vm6 = vcmp.lt.f32.partialorder %v470_v51, 0.0004427343  ;;  %v450_v57 = vadd.f32 1.0, %v449_v63 }
 0x10d   :  { %v718_v9 = vpop.eup %717  ;;  %v457_v20 = vmul.f32 0.6931472, %v716_v1  ;;  %vm991_vm7 = vcmp.lt.f32.partialorder %v380_v55, 0.0004427343  ;;  %729 = vlog2.f32 %v419_v8  ;;  %v379_v47 = vmul.f32 %v708_v4, %v378_v62 }
 0x10e   :  { %v391_v17 = vsel %vm962_vm1, %v388_v10, %v385_v3  ;;  %v367_v19 = vmul.f32 0.6931472, %v718_v9  ;;  %v720_v39 = vpop.eup %719  ;;  %v422_v51 = vmul.f32 -0.5, %v974_v44  ;;  %vm1004_vm8 = vcmp.lt.f32.partialorder %v452_v7, 0.0004427343 }
 0x10f   :  { %v511_v52 = vadd.f32 %v391_v17, %v287_v14  ;;  %v463_v61 = vsel %vm966_vm2, %v460_v28, %v457_v20  ;;  %v439_v55 = vmul.f32 0.6931472, %v720_v39  ;;  %v451_v11 = vmul.f32 %v710_v18, %v450_v57 }
 0x110   :  { %v519_v5 = vadd.f32 %v463_v61, %v295_v21  ;;  %v373_v10 = vsel %vm970_vm3, %v370_v36, %v367_v19  ;;  %v722_v43 = vpop.eup %721  ;;  %v425_v4 = vand.u32 2147483647, %v974_v44  ;;  %v341_v36 = vmul.f32 1.442695, %v951_v48 }
 0x111   :  { %731 = vtanh.f32 %v511_v52  ;;  %v509_v14 = vadd.f32 %v373_v10, %v285_v22  ;;  %v445_v21 = vsel %vm976_vm4, %v442_v54, %v439_v55  ;;  %v394_v28 = vmul.f32 0.6931472, %v722_v43  ;;  %v557_v55 = vld [vmem:[%s1223_s4] sm:$0xff] }
 0x112   :  { %733 = vtanh.f32 %v519_v5  ;;  %v724_v38 = vpop.eup %723  ;;  %v517_v62 = vadd.f32 %v445_v21, %v293_v23  ;;  %v423_v63 = vadd.f32 1.0, %v422_v51  ;;  %v329_v1 = vsub.f32 0.0, %v313_v53 }
 0x113   :  { %735 = vtanh.f32 %v509_v14  ;;  %v726_v22 = vpop.eup %725  ;;  %v400_v18 = vsel %vm980_vm5, %v397_v56, %v394_v28  ;;  %v466_v3 = vmul.f32 0.6931472, %v724_v38  ;;  %v308_v30 = vand.u32 2147483647, %v949_v40 }
 0x114   :  { %737 = vpow2.f32 %v957_v59  ;;  %v512_v48 = vadd.f32 %v400_v18, %v288_v27  ;;  %v376_v54 = vmul.f32 0.6931472, %v726_v22  ;;  %v357_v7 = vmul.f32 1.442695, %v329_v1 }
 0x115   :  { %739 = vtanh.f32 %v517_v62  ;;  %v472_v8 = vsel %vm985_vm6, %v469_v50, %v466_v3  ;;  %v324_v53 = vsub.f32 0.0, %v308_v30  ;;  %v1028_v56 = vadd.f32 %v876_v15, %v954_v49  ;;  %v560_v62 = vld [vmem:[%s1223_s4 + $0x18] sm:$0xff] }
 0x116   :  { %v728_v23 = vpop.eup %727  ;;  %741 = vpow2.f32 %v341_v36  ;;  %v520_v59 = vadd.f32 %v472_v8, %v296_v33  ;;  %v382_v58 = vsel %vm991_vm7, %v379_v47, %v376_v54  ;;  %v424_v50 = vmul.f32 %v974_v44, %v423_v63  ;;  %v567_v47 = vld [vmem:[%s1223_s4 + $0x50] sm:$0xff]  ;;  %v568_v30 = vld [vmem:[%s1223_s4 + $0x58] sm:$0xff] }
 0x117   :  { %743 = vtanh.f32 %v512_v48  ;;  %v448_v27 = vmul.f32 0.6931472, %v728_v23  ;;  %v730_v9 = vpop.eup %729  ;;  %v510_v20 = vadd.f32 %v382_v58, %v286_v34  ;;  %v347_v2 = vmul.f32 1.442695, %v324_v53  ;;  %v559_v34 = vld [vmem:[%s1223_s4 + $0x10] sm:$0xff] }
 0x118   :  { %745 = vpow2.f32 %v357_v7  ;;  %v421_v57 = vmul.f32 0.6931472, %v730_v9  ;;  %v316_v17 = vand.u32 2147483647, %v1028_v56  ;;  %v291_v19 = vmax.f32 %v920_v0, 0.0 }
 0x119   :  { %747 = vtanh.f32 %v520_v59  ;;  %v454_v49 = vsel %vm1004_vm8, %v451_v11, %v448_v27  ;;  %vm426_vm9 = vcmp.lt.f32.partialorder %v425_v4, 0.0004427343  ;;  %v1052_v51 = vadd.f32 %v876_v15, %v960_v60  ;;  %v565_v60 = vld [vmem:[%s1223_s4 + $0x40] sm:$0xff]  ;;  %v566_v27 = vld [vmem:[%s1223_s4 + $0x48] sm:$0xff] }
 0x11a   :  { %749 = vtanh.f32 %v510_v20  ;;  %v518_v33 = vadd.f32 %v454_v49, %v294_v35  ;;  %v427_v44 = vsel %vm426_vm9, %v424_v50, %v421_v57  ;;  %v332_v39 = vsub.f32 0.0, %v316_v17  ;;  %v563_v49 = vld [vmem:[%s1223_s4 + $0x30] sm:$0xff] }
 0x11b   :  { %v732_v24 = vpop.eup %731  ;;  %751 = vpow2.f32 %v347_v2  ;;  %v515_v35 = vadd.f32 %v427_v44, %v291_v19  ;;  %v259_v1 = vmul.f32 %v871_v13, %v923_v6 }
 0x11c   :  { %v734_v52 = vpop.eup %733  ;;  %v543_v61 = vmul.f32 %v732_v24, %v883_v25  ;;  %753 = vtanh.f32 %v518_v33  ;;  %v363_v37 = vmul.f32 1.442695, %v332_v39  ;;  %v299_v39 = vmax.f32 %v928_v12, 0.0 }
 0x11d   :  { %v736_v5 = vpop.eup %735  ;;  %v551_v10 = vmul.f32 %v734_v52, %v886_v26  ;;  %755 = vtanh.f32 %v515_v35  ;;  %v1107_v59 = vadd.f32 %v876_v15, %v259_v1 }
 0x11e   :  { %v1058_v25 = vpop.eup %737  ;;  %v575_v43 = vadd.f32 %v559_v34, %v543_v61  ;;  %v541_v14 = vmul.f32 %v736_v5, %v891_v31  ;;  %757 = vpow2.f32 %v363_v37  ;;  %v306_v31 = vand.u32 2147483647, %v1052_v51 }
 0x11f   :  { %v740_v11 = vpop.eup %739  ;;  %v583_v4 = vadd.f32 %v567_v47, %v551_v10  ;;  %v491_v21 = vadd.f32 1.0, %v1058_v25  ;;  %v494_v7 = vmul.f32 -0.5, %v1058_v25  ;;  %v497_v17 = vand.u32 2147483647, %v1058_v25 }
 0x120   :  { %v1065_v26 = vpop.eup %741  ;;  %592 = vst.msk [vmem:[%s1224_s5 + $0x10] sm:$0xff] %vm589_vm10, %v575_v43  ;;  %v573_v28 = vadd.f32 %v557_v55, %v541_v14  ;;  %v549_v36 = vmul.f32 %v740_v11, %v894_v32  ;;  %v322_v23 = vsub.f32 0.0, %v306_v31  ;;  %v314_v34 = vand.u32 2147483647, %v1107_v59 }
 0x121   :  { %v744_v38 = vpop.eup %743  ;;  %600 = vst.msk [vmem:[%s1224_s5 + $0x50] sm:$0xff] %vm589_vm10, %v583_v4  ;;  %759 = vlog2.f32 %v491_v21  ;;  %v401_v63 = vadd.f32 1.0, %v1065_v26  ;;  %v404_v9 = vmul.f32 -0.5, %v1065_v26  ;;  %v495_v57 = vadd.f32 1.0, %v494_v7 }
 0x122   :  { %v1083_v32 = vpop.eup %745  ;;  %590 = vst.msk [vmem:[%s1224_s5] sm:$0xff] %vm589_vm10, %v573_v28  ;;  %v581_v22 = vadd.f32 %v565_v60, %v549_v36  ;;  %v544_v18 = vmul.f32 %v744_v38, %v903_v41  ;;  %v558_v41 = vld [vmem:[%s1223_s4 + $0x8] sm:$0xff]  ;;  %v343_v33 = vmul.f32 1.442695, %v322_v23  ;;  %v407_v24 = vand.u32 2147483647, %v1065_v26 }
 0x123   :  { %v748_v3 = vpop.eup %747  ;;  %761 = vlog2.f32 %v401_v63  ;;  %v473_v48 = vadd.f32 1.0, %v1083_v32  ;;  %v476_v15 = vmul.f32 -0.5, %v1083_v32  ;;  %v405_v52 = vadd.f32 1.0, %v404_v9 }
 0x124   :  { %v750_v54 = vpop.eup %749  ;;  %598 = vst.msk [vmem:[%s1224_s5 + $0x40] sm:$0xff] %vm589_vm10, %v581_v22  ;;  %v576_v13 = vadd.f32 %v560_v62, %v544_v18  ;;  %v552_v6 = vmul.f32 %v748_v3, %v906_v42  ;;  %v496_v55 = vmul.f32 %v1058_v25, %v495_v57  ;;  %v289_v37 = vmax.f32 %v932_v16, 0.0 }
 0x125   :  { %v1103_v8 = vpop.eup %751  ;;  %v542_v53 = vmul.f32 %v750_v54, %v909_v45  ;;  %763 = vlog2.f32 %v473_v48  ;;  %v477_v35 = vadd.f32 1.0, %v476_v15  ;;  %v330_v43 = vsub.f32 0.0, %v314_v34 }
 0x126   :  { %v754_v58 = vpop.eup %753  ;;  %593 = vst.msk [vmem:[%s1224_s5 + $0x18] sm:$0xff] %vm589_vm10, %v576_v13  ;;  %v584_v42 = vadd.f32 %v568_v30, %v552_v6  ;;  %v428_v20 = vadd.f32 1.0, %v1103_v8  ;;  %v431_v5 = vmul.f32 -0.5, %v1103_v8  ;;  %vm498_vm11 = vcmp.lt.f32.partialorder %v497_v17, 0.0004427343 }
 0x127   :  { %v574_v45 = vadd.f32 %v558_v41, %v542_v53  ;;  %v550_v50 = vmul.f32 %v754_v58, %v912_v46  ;;  %v756_v2 = vpop.eup %755  ;;  %vm1147_vm12 = vcmp.lt.f32.partialorder %v407_v24, 0.0004427343  ;;  %v479_v4 = vand.u32 2147483647, %v1083_v32 }
 0x128   :  { %601 = vst.msk [vmem:[%s1224_s5 + $0x58] sm:$0xff] %vm589_vm10, %v584_v42  ;;  %765 = vlog2.f32 %v428_v20  ;;  %v547_v19 = vmul.f32 %v756_v2, %v920_v0  ;;  %v758_v44 = vpop.eup %757  ;;  %v406_v25 = vmul.f32 %v1065_v26, %v405_v52  ;;  %v359_v28 = vmul.f32 1.442695, %v330_v43  ;;  %v569_v52 = vld [vmem:[%s1223_s4 + $0x60] sm:$0xff] }
 0x129   :  { %591 = vst.msk [vmem:[%s1224_s5 + $0x8] sm:$0xff] %vm589_vm10, %v574_v45  ;;  %v582_v46 = vadd.f32 %v566_v27, %v550_v50  ;;  %767 = vpow2.f32 %v343_v33  ;;  %v500_v0 = vadd.f32 1.0, %v758_v44  ;;  %v478_v38 = vmul.f32 %v1083_v32, %v477_v35 }
 0x12a   :  { %v579_v47 = vadd.f32 %v563_v49, %v547_v19  ;;  %v432_v62 = vadd.f32 1.0, %v431_v5  ;;  %v434_v63 = vand.u32 2147483647, %v1103_v8  ;;  %v503_v18 = vmul.f32 -0.5, %v758_v44  ;;  %v571_v49 = vld [vmem:[%s1223_s4 + $0x70] sm:$0xff]  ;;  %v561_v19 = vld [vmem:[%s1223_s4 + $0x20] sm:$0xff] }
 0x12b   :  { %v760_v61 = vpop.eup %759  ;;  %599 = vst.msk [vmem:[%s1224_s5 + $0x48] sm:$0xff] %vm589_vm10, %v582_v46  ;;  %769 = vlog2.f32 %v500_v0  ;;  %v297_v30 = vmax.f32 %v943_v29, 0.0  ;;  %vm480_vm13 = vcmp.lt.f32.partialorder %v479_v4, 0.0004427343  ;;  %v292_v41 = vmax.f32 %v949_v40, 0.0 }
 0x12c   :  { %v493_v10 = vmul.f32 0.6931472, %v760_v61  ;;  %596 = vst.msk [vmem:[%s1224_s5 + $0x30] sm:$0xff] %vm589_vm10, %v579_v47  ;;  %771 = vpow2.f32 %v359_v28  ;;  %v433_v32 = vmul.f32 %v1103_v8, %v432_v62  ;;  %vm435_vm14 = vcmp.lt.f32.partialorder %v434_v63, 0.0004427343 }
 0x12d   :  { %v762_v14 = vpop.eup %761  ;;  %v504_v7 = vadd.f32 1.0, %v503_v18  ;;  %v506_v53 = vand.u32 2147483647, %v758_v44  ;;  %v300_v45 = vmax.f32 %v1028_v56, 0.0  ;;  %v298_v63 = vmax.f32 %v1107_v59, 0.0 }
 0x12e   :  { %v499_v60 = vsel %vm498_vm11, %v496_v55, %v493_v10  ;;  %v403_v21 = vmul.f32 0.6931472, %v762_v14  ;;  %v564_v10 = vld [vmem:[%s1223_s4 + $0x38] sm:$0xff]  ;;  %v290_v14 = vmax.f32 %v1052_v51, 0.0 }
 0x12f   :  { %v764_v36 = vpop.eup %763  ;;  %v523_v31 = vadd.f32 %v499_v60, %v299_v39  ;;  %v505_v20 = vmul.f32 %v758_v44, %v504_v7  ;;  %vm507_vm15 = vcmp.lt.f32.partialorder %v506_v53, 0.0004427343 }
 0x130   :  { %v409_v1 = vsel %vm1147_vm12, %v406_v25, %v403_v21  ;;  %v475_v22 = vmul.f32 0.6931472, %v764_v36 }
 0x131   :  { %773 = vtanh.f32 %v523_v31  ;;  %v513_v3 = vadd.f32 %v409_v1, %v289_v37 }
 0x132   :  { %v766_v26 = vpop.eup %765  ;;  %v481_v48 = vsel %vm480_vm13, %v478_v38, %v475_v22 }
 0x133   :  { %775 = vtanh.f32 %v513_v3  ;;  %v521_v54 = vadd.f32 %v481_v48, %v297_v30  ;;  %v430_v13 = vmul.f32 0.6931472, %v766_v26  ;;  %v768_v6 = vpop.eup %767  ;;  %v562_v3 = vld [vmem:[%s1223_s4 + $0x28] sm:$0xff] }
 0x134   :  { %v410_v58 = vadd.f32 1.0, %v768_v6  ;;  %v413_v15 = vmul.f32 -0.5, %v768_v6  ;;  %v416_v61 = vand.u32 2147483647, %v768_v6  ;;  %v570_v48 = vld [vmem:[%s1223_s4 + $0x68] sm:$0xff] }
 0x135   :  { %777 = vtanh.f32 %v521_v54  ;;  %v436_v23 = vsel %vm435_vm14, %v433_v32, %v430_v13  ;;  %v770_v27 = vpop.eup %769 }
 0x136   :  { %v516_v42 = vadd.f32 %v436_v23, %v292_v41  ;;  %779 = vlog2.f32 %v410_v58  ;;  %v502_v9 = vmul.f32 0.6931472, %v770_v27  ;;  %v772_v50 = vpop.eup %771  ;;  %v414_v44 = vadd.f32 1.0, %v413_v15 }
 0x137   :  { %v482_v17 = vadd.f32 1.0, %v772_v50  ;;  %v485_v5 = vmul.f32 -0.5, %v772_v50  ;;  %vm417_vm0 = vcmp.lt.f32.partialorder %v416_v61, 0.0004427343  ;;  %v488_v21 = vand.u32 2147483647, %v772_v50 }
 0x138   :  { %781 = vtanh.f32 %v516_v42  ;;  %v508_v8 = vsel %vm507_vm15, %v505_v20, %v502_v9  ;;  %v415_v37 = vmul.f32 %v768_v6, %v414_v44 }
 0x139   :  { %v524_v57 = vadd.f32 %v508_v8, %v300_v45  ;;  %v486_v60 = vadd.f32 1.0, %v485_v5  ;;  %vm489_vm1 = vcmp.lt.f32.partialorder %v488_v21, 0.0004427343 }
 0x13b   :  { %v774_v2 = vpop.eup %773  ;;  %783 = vtanh.f32 %v524_v57  ;;  %v487_v38 = vmul.f32 %v772_v50, %v486_v60 }
 0x13c   :  { %v555_v33 = vmul.f32 %v774_v2, %v928_v12  ;;  %785 = vlog2.f32 %v482_v17 }
 0x13d   :  { %v776_v46 = vpop.eup %775 }
 0x13e   :  { %v587_v24 = vadd.f32 %v571_v49, %v555_v33  ;;  %v545_v34 = vmul.f32 %v776_v46, %v932_v16 }
 0x13f   :  { %v778_v39 = vpop.eup %777 }
 0x140   :  { %604 = vst.msk [vmem:[%s1224_s5 + $0x70] sm:$0xff] %vm589_vm10, %v587_v24  ;;  %v577_v12 = vadd.f32 %v561_v19, %v545_v34  ;;  %v553_v47 = vmul.f32 %v778_v39, %v943_v29  ;;  %v780_v35 = vpop.eup %779 }
 0x141   :  { %v412_v55 = vmul.f32 0.6931472, %v780_v35 }
 0x142   :  { %v782_v0 = vpop.eup %781  ;;  %594 = vst.msk [vmem:[%s1224_s5 + $0x20] sm:$0xff] %vm589_vm10, %v577_v12  ;;  %v585_v16 = vadd.f32 %v569_v52, %v553_v47 }
 0x143   :  { %v548_v43 = vmul.f32 %v782_v0, %v949_v40  ;;  %v418_v29 = vsel %vm417_vm0, %v415_v37, %v412_v55  ;;  %v572_v40 = vld [vmem:[%s1223_s4 + $0x78] sm:$0xff] }
 0x144   :  { %602 = vst.msk [vmem:[%s1224_s5 + $0x60] sm:$0xff] %vm589_vm10, %v585_v16  ;;  %v514_v4 = vadd.f32 %v418_v29, %v290_v14 }
 0x145   :  { %v580_v11 = vadd.f32 %v564_v10, %v548_v43  ;;  %v784_v25 = vpop.eup %783 }
 0x146   :  { %787 = vtanh.f32 %v514_v4  ;;  %v786_v28 = vpop.eup %785  ;;  %v556_v36 = vmul.f32 %v784_v25, %v1028_v56 }
 0x147   :  { %597 = vst.msk [vmem:[%s1224_s5 + $0x38] sm:$0xff] %vm589_vm10, %v580_v11  ;;  %v484_v31 = vmul.f32 0.6931472, %v786_v28 }
 0x148   :  { %v588_v62 = vadd.f32 %v572_v40, %v556_v36 }
 0x149   :  { %v490_v1 = vsel %vm489_vm1, %v487_v38, %v484_v31 }
 0x14a   :  { %605 = vst.msk [vmem:[%s1224_s5 + $0x78] sm:$0xff] %vm589_vm10, %v588_v62  ;;  %v522_v22 = vadd.f32 %v490_v1, %v298_v63 }
 0x14c   :  { %789 = vtanh.f32 %v522_v22 }
 0x150   :  { %v788_v18 = vpop.eup %787 }
 0x151   :  { %v546_v56 = vmul.f32 %v788_v18, %v1052_v51 }
 0x153   :  { %v578_v30 = vadd.f32 %v562_v3, %v546_v56 }
 0x155   :  { %595 = vst.msk [vmem:[%s1224_s5 + $0x28] sm:$0xff] %vm589_vm10, %v578_v30 }
 0x156   :  { %v790_v26 = vpop.eup %789 }
 0x157   :  { %v554_v54 = vmul.f32 %v790_v26, %v1107_v59 }
 0x159   :  { %v586_v13 = vadd.f32 %v570_v48, %v554_v54 }
 0x15b   :  { %603 = vst.msk [vmem:[%s1224_s5 + $0x68] sm:$0xff] %vm589_vm10, %v586_v13 }

// kernel: _lambda_.15
= control target key start
LH: loop header
LB: loop body
LE: loop exit
PB: predicated region body
PF: predicated region fallthrough
CT: control target
= control target key end

     0   :  { %v262_v0 = vmov 0   ;;  %vm112_vm0 = vcmask 130048   ;;  %vm202_vm1 = vcmask 261120   ;;  %s349_s1 = inlined_call_operand.vmem [shape: bf16[144,32], index: 1, kind: input, shape index: {}]   ;;  %s350_s0 = inlined_call_operand.vmem [shape: bf16[32,144], index: 0, kind: input, shape index: {}]   ;;  %s351_s2 = inlined_call_operand.vmem [shape: f32[1,32], index: 2, kind: input, shape index: {}]   ;;  %s352_s3 = inlined_call_operand.vmem [shape: f32[1,32], index: 3, kind: input, shape index: {}]   ;;  %s353_s4 = inlined_call_operand.vmem [shape: f32[32,32], index: 4, kind: output, shape index: {}]  }
   0x1   :  { %119 = vmatprep.subr.bf16.mxu0 %v262_v0  ;;  %228 = vmatprep.subr.bf16.mxu1 %v262_v0  ;;  %v247_v1 = vld [vmem:[%s349_s1] sm:$0xff]   ;;  %v248_v2 = vld [vmem:[%s349_s1 + $0x8] sm:$0xff]   ;;  %v249_v3 = vld [vmem:[%s349_s1 + $0x10] sm:$0xff]  }
   0x2   :  { %120 = vmatpush1.bf16.msra.mxu0 %v247_v1  ;;  %237 = vmatpush1.bf16.msra.mxu1 %v247_v1  ;;  %v250_v4 = vld [vmem:[%s349_s1 + $0x18] sm:$0xff]   ;;  %v258_v5 = vld [vmem:[%s350_s0 + $0x4] ss:$8 sps:$4 sm:$0xff]   ;;  %v253_v9 = vld [vmem:[%s349_s1 + $0x30] sm:$0xff]  }
   0x3   :  { %121 = vmatprep.subr.bf16.mxu0 %v262_v0  ;;  %229 = vmatprep.subr.bf16.mxu1 %v262_v0  ;;  %v261_v6 = vld [vmem:[%s350_s0 + $0x14] ss:$8 sps:$4 sm:$0xff]   ;;  %v251_v7 = vld [vmem:[%s349_s1 + $0x20] sm:$0xff]   ;;  %v252_v8 = vld [vmem:[%s349_s1 + $0x28] sm:$0xff]  }
   0x4   :  { %224 = vmatprep.mubr.msk.bf16.mxu0 %vm112_vm0, %v258_v5  ;;  %225 = vmatprep.mubr.msk.bf16.mxu1 %vm112_vm0, %v261_v6  ;;  %v254_v10 = vld [vmem:[%s349_s1 + $0x38] sm:$0xff]   ;;  %v255_v11 = vld [vmem:[%s349_s1 + $0x40] sm:$0xff]  }
   0x5   :  { %v256_v12 = vld [vmem:[%s350_s0] ss:$8 sps:$4 sm:$0xff]   ;;  %v259_v13 = vld [vmem:[%s350_s0 + $0x10] ss:$8 sps:$4 sm:$0xff]  }
   0x6   :  { %122 = vmatpush1.bf16.msra.mxu0 %v248_v2  ;;  %238 = vmatpush1.bf16.msra.mxu1 %v248_v2  ;;  %v226_v14 = vld [vmem:[%s351_s2] ss:$0 sm:$0xff] }
   0x7   :  { %123 = vmatprep.subr.bf16.mxu0 %v262_v0  ;;  %230 = vmatprep.subr.bf16.mxu1 %v262_v0  ;;  %v227_v16 = vld [vmem:[%s352_s3] ss:$0 sm:$0xff] }
   0xa   :  { %124 = vmatpush1.bf16.msra.mxu0 %v249_v3  ;;  %239 = vmatpush1.bf16.msra.mxu1 %v249_v3 }
   0xb   :  { %125 = vmatprep.subr.bf16.mxu0 %v262_v0  ;;  %231 = vmatprep.subr.bf16.mxu1 %v262_v0 }
   0xe   :  { %126 = vmatpush1.bf16.msra.mxu0 %v250_v4  ;;  %240 = vmatpush1.bf16.msra.mxu1 %v250_v4 }
   0xf   :  { %127 = vmatprep.subr.bf16.mxu0 %v262_v0  ;;  %232 = vmatprep.subr.bf16.mxu1 %v262_v0 }
  0x12   :  { %128 = vmatpush1.bf16.msra.mxu0 %v251_v7  ;;  %241 = vmatpush1.bf16.msra.mxu1 %v251_v7 }
  0x13   :  { %129 = vmatprep.subr.bf16.mxu0 %v262_v0  ;;  %233 = vmatprep.subr.bf16.mxu1 %v262_v0 }
  0x16   :  { %130 = vmatpush1.bf16.msra.mxu0 %v252_v8  ;;  %242 = vmatpush1.bf16.msra.mxu1 %v252_v8 }
  0x17   :  { %131 = vmatprep.subr.bf16.mxu0 %v262_v0  ;;  %234 = vmatprep.subr.bf16.mxu1 %v262_v0 }
  0x1a   :  { %132 = vmatpush1.bf16.msra.mxu0 %v253_v9  ;;  %243 = vmatpush1.bf16.msra.mxu1 %v253_v9 }
  0x1b   :  { %133 = vmatprep.subr.bf16.mxu0 %v262_v0  ;;  %235 = vmatprep.subr.bf16.mxu1 %v262_v0 }
  0x1e   :  { %134 = vmatpush1.bf16.msra.mxu0 %v254_v10  ;;  %244 = vmatpush1.bf16.msra.mxu1 %v254_v10 }
  0x1f   :  { %135 = vmatprep.subr.bf16.mxu0 %v262_v0  ;;  %236 = vmatprep.subr.bf16.mxu1 %v262_v0 }
  0x22   :  { %136 = vmatpush1.bf16.msra.mxu0 %v255_v11  ;;  %245 = vmatpush1.bf16.msra.mxu1 %v255_v11 }
  0x25   :  { %152 = vmatmul.mubr.bf16.vlgmr.msra.gmra.mrb[0].mxu0 %v256_v12  ;;  %160 = vmatmul.mubr.bf16.vlgmr.msra.gmra.mrb[0].mxu1 %v259_v13 }
  0xf8   :  { %v153_v15 = vpop.f32.mrb[0].mxu0  ;;  %v161_v17 = vpop.f32.mrb[0].mxu1 }
  0xf9   :  { %v175_v18 = vmul.f32 %v226_v14, %v153_v15  ;;  %v177_v19 = vmul.f32 %v226_v14, %v161_v17  ;;  %v155_v20 = vpop.f32.mrb[1].mxu0  ;;  %v163_v21 = vpop.f32.mrb[1].mxu1 }
  0xfa   :  { %v156_v22 = vpop.f32.mrb[2].mxu0  ;;  %v164_v23 = vpop.f32.mrb[2].mxu1 }
  0xfb   :  { %v186_v24 = vadd.f32 %v227_v16, %v175_v18  ;;  %v188_v25 = vadd.f32 %v227_v16, %v177_v19  ;;  %v176_v26 = vmul.f32 %v226_v14, %v156_v22  ;;  %v178_v27 = vmul.f32 %v226_v14, %v164_v23  ;;  %v158_v28 = vpop.f32.mrb[3].mxu0  ;;  %v166_v29 = vpop.f32.mrb[3].mxu1 }
  0xfd   :  { %vm190_vm2 = vcmp.gt.f32.partialorder %v186_v24, 0.0  ;;  %v194_v30 = vmul.f32 0.01, %v186_v24  ;;  %vm192_vm3 = vcmp.gt.f32.partialorder %v188_v25, 0.0  ;;  %v196_v31 = vmul.f32 0.01, %v188_v25 }
  0xfe   :  { %v187_v32 = vadd.f32 %v227_v16, %v176_v26  ;;  %v189_v33 = vadd.f32 %v227_v16, %v178_v27 }
  0xff   :  { %v198_v34 = vsel %vm190_vm2, %v186_v24, %v194_v30  ;;  %v200_v35 = vsel %vm192_vm3, %v188_v25, %v196_v31 }
 0x100   :  { %203 = vst.msk [vmem:[%s353_s4] sm:$0xff] %vm202_vm1, %v198_v34  ;;  %205 = vst.msk [vmem:[%s353_s4 + $0x10] sm:$0xff] %vm202_vm1, %v200_v35  ;;  %vm191_vm4 = vcmp.gt.f32.partialorder %v187_v32, 0.0  ;;  %v195_v36 = vmul.f32 0.01, %v187_v32  ;;  %vm193_vm5 = vcmp.gt.f32.partialorder %v189_v33, 0.0 }
 0x101   :  { %v197_v37 = vmul.f32 0.01, %v189_v33 }
 0x102   :  { %v199_v38 = vsel %vm191_vm4, %v187_v32, %v195_v36 }
 0x103   :  { %v201_v39 = vsel %vm193_vm5, %v189_v33, %v197_v37  ;;  %204 = vst.msk [vmem:[%s353_s4 + $0x8] sm:$0xff] %vm202_vm1, %v199_v38 }
 0x104   :  { %206 = vst.msk [vmem:[%s353_s4 + $0x18] sm:$0xff] %vm202_vm1, %v201_v39 }

// kernel: _lambda_.16
= control target key start
LH: loop header
LB: loop body
LE: loop exit
PB: predicated region body
PF: predicated region fallthrough
CT: control target
= control target key end

     0   :  { %vm48_vm0 = vcmask 261120   ;;  %vm138_vm2 = vcmask 130048   ;;  %s230_s1 = inlined_call_operand.vmem [shape: bf16[32,16], index: 1, kind: input, shape index: {}]   ;;  %s231_s0 = inlined_call_operand.vmem [shape: bf16[32,32], index: 0, kind: input, shape index: {}]   ;;  %s232_s2 = inlined_call_operand.vmem [shape: f32[1,16], index: 2, kind: input, shape index: {}]   ;;  %s233_s3 = inlined_call_operand.vmem [shape: f32[1,16], index: 3, kind: input, shape index: {}]   ;;  %s234_s4 = inlined_call_operand.vmem [shape: f32[32,16], index: 4, kind: output, shape index: {}]  }
   0x1   :  { %v167_v0 = vld [vmem:[%s230_s1] sm:$0xff]   ;;  %v168_v1 = vld [vmem:[%s230_s1 + $0x8] sm:$0xff]  }
   0x2   :  { %159 = vmatprep.subr.bf16.mxu0 %v167_v0  ;;  %v169_v2 = vld [vmem:[%s231_s0] sm:$0xff]   ;;  %v170_v3 = vld [vmem:[%s231_s0 + $0x8] sm:$0xff]  }
   0x3   :  { %160 = vmatpush3.bf16.msra.mxu0 %v167_v0  ;;  %163 = vmatprep.mubr.msk.bf16.mxu0 %vm48_vm0, %v169_v2  ;;  %v153_v4 = vld [vmem:[%s232_s2] ss:$0 sm:$0xff] }
   0x4   :  { %161 = vmatprep.subr.bf16.mxu0 %v168_v1  ;;  %v154_v6 = vld [vmem:[%s233_s3] ss:$0 sm:$0xff] }
   0x7   :  { %162 = vmatpush3.bf16.msra.mxu0 %v168_v1 }
   0xa   :  { %164 = vmatmul.mubr.msk.bf16.vlgmr.msra.gmra.mrb[0].mxu0 %vm48_vm0, %v170_v3 }
  0xdd   :  { %v165_v5 = vpop.f32.mrb[0].mxu0 }
  0xde   :  { %v113_v7 = vmul.f32 %v165_v5, %v153_v4  ;;  %v89_v8 = vpop.f32.mrb[1].mxu0 }
  0xdf   :  { %v111_v9 = vmul.f32 %v153_v4, %v89_v8  ;;  %v166_v10 = vpop.f32.mrb[2].mxu0 }
  0xe0   :  { %v124_v11 = vadd.f32 %v154_v6, %v113_v7  ;;  %v114_v12 = vmul.f32 %v166_v10, %v153_v4  ;;  %v92_v13 = vpop.f32.mrb[3].mxu0 }
  0xe1   :  { %v122_v14 = vadd.f32 %v154_v6, %v111_v9  ;;  %v112_v15 = vmul.f32 %v153_v4, %v92_v13 }
  0xe2   :  { %vm128_vm1 = vcmp.gt.f32.partialorder %v124_v11, 0.0  ;;  %v132_v16 = vmul.f32 0.01, %v124_v11  ;;  %v125_v17 = vadd.f32 %v154_v6, %v114_v12 }
  0xe3   :  { %vm126_vm3 = vcmp.gt.f32.partialorder %v122_v14, 0.0  ;;  %v130_v18 = vmul.f32 0.01, %v122_v14  ;;  %v123_v19 = vadd.f32 %v154_v6, %v112_v15 }
  0xe4   :  { %v136_v20 = vsel %vm128_vm1, %v124_v11, %v132_v16  ;;  %vm129_vm4 = vcmp.gt.f32.partialorder %v125_v17, 0.0  ;;  %v133_v21 = vmul.f32 0.01, %v125_v17 }
  0xe5   :  { %141 = vst.msk [vmem:[%s234_s4 + $0x10] sm:$0xff] %vm138_vm2, %v136_v20  ;;  %v134_v22 = vsel %vm126_vm3, %v122_v14, %v130_v18  ;;  %vm127_vm5 = vcmp.gt.f32.partialorder %v123_v19, 0.0  ;;  %v131_v23 = vmul.f32 0.01, %v123_v19 }
  0xe6   :  { %139 = vst.msk [vmem:[%s234_s4] sm:$0xff] %vm138_vm2, %v134_v22  ;;  %v137_v24 = vsel %vm129_vm4, %v125_v17, %v133_v21 }
  0xe7   :  { %142 = vst.msk [vmem:[%s234_s4 + $0x18] sm:$0xff] %vm138_vm2, %v137_v24  ;;  %v135_v25 = vsel %vm127_vm5, %v123_v19, %v131_v23 }
  0xe8   :  { %140 = vst.msk [vmem:[%s234_s4 + $0x8] sm:$0xff] %vm138_vm2, %v135_v25 }

// kernel: _lambda_.17
= control target key start
LH: loop header
LB: loop body
LE: loop exit
PB: predicated region body
PF: predicated region fallthrough
CT: control target
= control target key end

     0   :  { %v250_v0 = vmov 0   ;;  %vm112_vm0 = vcmask 130048   ;;  %vm190_vm1 = vcmask 146432   ;;  %s333_s1 = inlined_call_operand.vmem [shape: bf16[144,18], index: 1, kind: input, shape index: {}]   ;;  %s334_s0 = inlined_call_operand.vmem [shape: bf16[32,144], index: 0, kind: input, shape index: {}]   ;;  %s335_s2 = inlined_call_operand.vmem [shape: f32[1,18], index: 2, kind: input, shape index: {}]   ;;  %s336_s3 = inlined_call_operand.vmem [shape: f32[1,18], index: 3, kind: input, shape index: {}]   ;;  %s337_s4 = inlined_call_operand.vmem [shape: f32[32,18], index: 4, kind: output, shape index: {}]  }
   0x1   :  { %119 = vmatprep.subr.bf16.mxu0 %v250_v0  ;;  %216 = vmatprep.subr.bf16.mxu1 %v250_v0  ;;  %v235_v1 = vld [vmem:[%s333_s1] sm:$0xff]   ;;  %v236_v2 = vld [vmem:[%s333_s1 + $0x8] sm:$0xff]   ;;  %v237_v3 = vld [vmem:[%s333_s1 + $0x10] sm:$0xff]  }
   0x2   :  { %120 = vmatpush1.bf16.msra.mxu0 %v235_v1  ;;  %225 = vmatpush1.bf16.msra.mxu1 %v235_v1  ;;  %v238_v4 = vld [vmem:[%s333_s1 + $0x18] sm:$0xff]   ;;  %v246_v5 = vld [vmem:[%s334_s0 + $0x4] ss:$8 sps:$4 sm:$0xff]   ;;  %v241_v9 = vld [vmem:[%s333_s1 + $0x30] sm:$0xff]  }
   0x3   :  { %121 = vmatprep.subr.bf16.mxu0 %v250_v0  ;;  %217 = vmatprep.subr.bf16.mxu1 %v250_v0  ;;  %v249_v6 = vld [vmem:[%s334_s0 + $0x14] ss:$8 sps:$4 sm:$0xff]   ;;  %v239_v7 = vld [vmem:[%s333_s1 + $0x20] sm:$0xff]   ;;  %v240_v8 = vld [vmem:[%s333_s1 + $0x28] sm:$0xff]  }
   0x4   :  { %212 = vmatprep.mubr.msk.bf16.mxu0 %vm112_vm0, %v246_v5  ;;  %213 = vmatprep.mubr.msk.bf16.mxu1 %vm112_vm0, %v249_v6  ;;  %v242_v10 = vld [vmem:[%s333_s1 + $0x38] sm:$0xff]   ;;  %v243_v11 = vld [vmem:[%s333_s1 + $0x40] sm:$0xff]  }
   0x5   :  { %v244_v12 = vld [vmem:[%s334_s0] ss:$8 sps:$4 sm:$0xff]   ;;  %v247_v13 = vld [vmem:[%s334_s0 + $0x10] ss:$8 sps:$4 sm:$0xff]  }
   0x6   :  { %122 = vmatpush1.bf16.msra.mxu0 %v236_v2  ;;  %226 = vmatpush1.bf16.msra.mxu1 %v236_v2  ;;  %v214_v14 = vld [vmem:[%s335_s2] ss:$0 sm:$0xff] }
   0x7   :  { %123 = vmatprep.subr.bf16.mxu0 %v250_v0  ;;  %218 = vmatprep.subr.bf16.mxu1 %v250_v0  ;;  %v215_v16 = vld [vmem:[%s336_s3] ss:$0 sm:$0xff] }
   0xa   :  { %124 = vmatpush1.bf16.msra.mxu0 %v237_v3  ;;  %227 = vmatpush1.bf16.msra.mxu1 %v237_v3 }
   0xb   :  { %125 = vmatprep.subr.bf16.mxu0 %v250_v0  ;;  %219 = vmatprep.subr.bf16.mxu1 %v250_v0 }
   0xe   :  { %126 = vmatpush1.bf16.msra.mxu0 %v238_v4  ;;  %228 = vmatpush1.bf16.msra.mxu1 %v238_v4 }
   0xf   :  { %127 = vmatprep.subr.bf16.mxu0 %v250_v0  ;;  %220 = vmatprep.subr.bf16.mxu1 %v250_v0 }
  0x12   :  { %128 = vmatpush1.bf16.msra.mxu0 %v239_v7  ;;  %229 = vmatpush1.bf16.msra.mxu1 %v239_v7 }
  0x13   :  { %129 = vmatprep.subr.bf16.mxu0 %v250_v0  ;;  %221 = vmatprep.subr.bf16.mxu1 %v250_v0 }
  0x16   :  { %130 = vmatpush1.bf16.msra.mxu0 %v240_v8  ;;  %230 = vmatpush1.bf16.msra.mxu1 %v240_v8 }
  0x17   :  { %131 = vmatprep.subr.bf16.mxu0 %v250_v0  ;;  %222 = vmatprep.subr.bf16.mxu1 %v250_v0 }
  0x1a   :  { %132 = vmatpush1.bf16.msra.mxu0 %v241_v9  ;;  %231 = vmatpush1.bf16.msra.mxu1 %v241_v9 }
  0x1b   :  { %133 = vmatprep.subr.bf16.mxu0 %v250_v0  ;;  %223 = vmatprep.subr.bf16.mxu1 %v250_v0 }
  0x1e   :  { %134 = vmatpush1.bf16.msra.mxu0 %v242_v10  ;;  %232 = vmatpush1.bf16.msra.mxu1 %v242_v10 }
  0x1f   :  { %135 = vmatprep.subr.bf16.mxu0 %v250_v0  ;;  %224 = vmatprep.subr.bf16.mxu1 %v250_v0 }
  0x22   :  { %136 = vmatpush1.bf16.msra.mxu0 %v243_v11  ;;  %233 = vmatpush1.bf16.msra.mxu1 %v243_v11 }
  0x25   :  { %152 = vmatmul.mubr.bf16.vlgmr.msra.gmra.mrb[0].mxu0 %v244_v12  ;;  %160 = vmatmul.mubr.bf16.vlgmr.msra.gmra.mrb[0].mxu1 %v247_v13 }
  0xf8   :  { %v153_v15 = vpop.f32.mrb[0].mxu0  ;;  %v161_v17 = vpop.f32.mrb[0].mxu1 }
  0xf9   :  { %v175_v18 = vmul.f32 %v214_v14, %v153_v15  ;;  %v177_v19 = vmul.f32 %v214_v14, %v161_v17  ;;  %v155_v20 = vpop.f32.mrb[1].mxu0  ;;  %v163_v21 = vpop.f32.mrb[1].mxu1 }
  0xfa   :  { %v156_v22 = vpop.f32.mrb[2].mxu0  ;;  %v164_v23 = vpop.f32.mrb[2].mxu1 }
  0xfb   :  { %v186_v24 = vadd.f32 %v215_v16, %v175_v18  ;;  %v188_v25 = vadd.f32 %v215_v16, %v177_v19  ;;  %v176_v26 = vmul.f32 %v214_v14, %v156_v22  ;;  %v178_v27 = vmul.f32 %v214_v14, %v164_v23  ;;  %v158_v28 = vpop.f32.mrb[3].mxu0  ;;  %v166_v29 = vpop.f32.mrb[3].mxu1 }
  0xfd   :  { %191 = vst.msk [vmem:[%s337_s4] sm:$0xff] %vm190_vm1, %v186_v24  ;;  %193 = vst.msk [vmem:[%s337_s4 + $0x10] sm:$0xff] %vm190_vm1, %v188_v25  ;;  %v187_v30 = vadd.f32 %v215_v16, %v176_v26  ;;  %v189_v31 = vadd.f32 %v215_v16, %v178_v27 }
  0xff   :  { %192 = vst.msk [vmem:[%s337_s4 + $0x8] sm:$0xff] %vm190_vm1, %v187_v30  ;;  %194 = vst.msk [vmem:[%s337_s4 + $0x18] sm:$0xff] %vm190_vm1, %v189_v31 }

// kernel: _lambda_.18
= control target key start
LH: loop header
LB: loop body
LE: loop exit
PB: predicated region body
PF: predicated region fallthrough
CT: control target
= control target key end

     0   :  { %v273_v0 = vmov 0   ;;  %vm115_vm0 = vcmask 130048   ;;  %vm213_vm3 = vcmask 261120   ;;  %s377_s1 = inlined_call_operand.vmem [shape: bf16[144,32], index: 1, kind: input, shape index: {}]   ;;  %s378_s0 = inlined_call_operand.vmem [shape: bf16[32,144], index: 0, kind: input, shape index: {}]   ;;  %s379_s2 = inlined_call_operand.vmem [shape: f32[1,32], index: 2, kind: input, shape index: {}]   ;;  %s380_s3 = inlined_call_operand.vmem [shape: f32[1,32], index: 3, kind: input, shape index: {}]   ;;  %s381_s4 = inlined_call_operand.vmem [shape: f32[32,32], index: 4, kind: input, shape index: {}]   ;;  %s382_s5 = inlined_call_operand.vmem [shape: f32[32,32], index: 5, kind: output, shape index: {}]  }
   0x1   :  { %122 = vmatprep.subr.bf16.mxu0 %v273_v0  ;;  %239 = vmatprep.subr.bf16.mxu1 %v273_v0  ;;  %v258_v1 = vld [vmem:[%s377_s1] sm:$0xff]   ;;  %v259_v2 = vld [vmem:[%s377_s1 + $0x8] sm:$0xff]   ;;  %v260_v3 = vld [vmem:[%s377_s1 + $0x10] sm:$0xff]  }
   0x2   :  { %123 = vmatpush1.bf16.msra.mxu0 %v258_v1  ;;  %248 = vmatpush1.bf16.msra.mxu1 %v258_v1  ;;  %v261_v4 = vld [vmem:[%s377_s1 + $0x18] sm:$0xff]   ;;  %v269_v5 = vld [vmem:[%s378_s0 + $0x4] ss:$8 sps:$4 sm:$0xff]   ;;  %v264_v9 = vld [vmem:[%s377_s1 + $0x30] sm:$0xff]  }
   0x3   :  { %124 = vmatprep.subr.bf16.mxu0 %v273_v0  ;;  %240 = vmatprep.subr.bf16.mxu1 %v273_v0  ;;  %v272_v6 = vld [vmem:[%s378_s0 + $0x14] ss:$8 sps:$4 sm:$0xff]   ;;  %v262_v7 = vld [vmem:[%s377_s1 + $0x20] sm:$0xff]   ;;  %v263_v8 = vld [vmem:[%s377_s1 + $0x28] sm:$0xff]  }
   0x4   :  { %235 = vmatprep.mubr.msk.bf16.mxu0 %vm115_vm0, %v269_v5  ;;  %236 = vmatprep.mubr.msk.bf16.mxu1 %vm115_vm0, %v272_v6  ;;  %v265_v10 = vld [vmem:[%s377_s1 + $0x38] sm:$0xff]   ;;  %v266_v11 = vld [vmem:[%s377_s1 + $0x40] sm:$0xff]   ;;  %v207_v31 = vld [vmem:[%s381_s4 + $0x10] sm:$0xff] }
   0x5   :  { %v267_v12 = vld [vmem:[%s378_s0] ss:$8 sps:$4 sm:$0xff]   ;;  %v270_v13 = vld [vmem:[%s378_s0 + $0x10] ss:$8 sps:$4 sm:$0xff]  }
   0x6   :  { %125 = vmatpush1.bf16.msra.mxu0 %v259_v2  ;;  %249 = vmatpush1.bf16.msra.mxu1 %v259_v2  ;;  %v237_v14 = vld [vmem:[%s379_s2] ss:$0 sm:$0xff]  ;;  %v206_v41 = vld [vmem:[%s381_s4 + $0x8] sm:$0xff]  ;;  %v208_v43 = vld [vmem:[%s381_s4 + $0x18] sm:$0xff] }
   0x7   :  { %126 = vmatprep.subr.bf16.mxu0 %v273_v0  ;;  %241 = vmatprep.subr.bf16.mxu1 %v273_v0  ;;  %v238_v16 = vld [vmem:[%s380_s3] ss:$0 sm:$0xff] }
   0x8   :  { %v205_v30 = vld [vmem:[%s381_s4] sm:$0xff] }
   0xa   :  { %127 = vmatpush1.bf16.msra.mxu0 %v260_v3  ;;  %250 = vmatpush1.bf16.msra.mxu1 %v260_v3 }
   0xb   :  { %128 = vmatprep.subr.bf16.mxu0 %v273_v0  ;;  %242 = vmatprep.subr.bf16.mxu1 %v273_v0 }
   0xe   :  { %129 = vmatpush1.bf16.msra.mxu0 %v261_v4  ;;  %251 = vmatpush1.bf16.msra.mxu1 %v261_v4 }
   0xf   :  { %130 = vmatprep.subr.bf16.mxu0 %v273_v0  ;;  %243 = vmatprep.subr.bf16.mxu1 %v273_v0 }
  0x12   :  { %131 = vmatpush1.bf16.msra.mxu0 %v262_v7  ;;  %252 = vmatpush1.bf16.msra.mxu1 %v262_v7 }
  0x13   :  { %132 = vmatprep.subr.bf16.mxu0 %v273_v0  ;;  %244 = vmatprep.subr.bf16.mxu1 %v273_v0 }
  0x16   :  { %133 = vmatpush1.bf16.msra.mxu0 %v263_v8  ;;  %253 = vmatpush1.bf16.msra.mxu1 %v263_v8 }
  0x17   :  { %134 = vmatprep.subr.bf16.mxu0 %v273_v0  ;;  %245 = vmatprep.subr.bf16.mxu1 %v273_v0 }
  0x1a   :  { %135 = vmatpush1.bf16.msra.mxu0 %v264_v9  ;;  %254 = vmatpush1.bf16.msra.mxu1 %v264_v9 }
  0x1b   :  { %136 = vmatprep.subr.bf16.mxu0 %v273_v0  ;;  %246 = vmatprep.subr.bf16.mxu1 %v273_v0 }
  0x1e   :  { %137 = vmatpush1.bf16.msra.mxu0 %v265_v10  ;;  %255 = vmatpush1.bf16.msra.mxu1 %v265_v10 }
  0x1f   :  { %138 = vmatprep.subr.bf16.mxu0 %v273_v0  ;;  %247 = vmatprep.subr.bf16.mxu1 %v273_v0 }
  0x22   :  { %139 = vmatpush1.bf16.msra.mxu0 %v266_v11  ;;  %256 = vmatpush1.bf16.msra.mxu1 %v266_v11 }
  0x25   :  { %155 = vmatmul.mubr.bf16.vlgmr.msra.gmra.mrb[0].mxu0 %v267_v12  ;;  %163 = vmatmul.mubr.bf16.vlgmr.msra.gmra.mrb[0].mxu1 %v270_v13 }
  0xf8   :  { %v156_v15 = vpop.f32.mrb[0].mxu0  ;;  %v164_v17 = vpop.f32.mrb[0].mxu1 }
  0xf9   :  { %v178_v18 = vmul.f32 %v237_v14, %v156_v15  ;;  %v180_v19 = vmul.f32 %v237_v14, %v164_v17  ;;  %v158_v20 = vpop.f32.mrb[1].mxu0  ;;  %v166_v21 = vpop.f32.mrb[1].mxu1 }
  0xfa   :  { %v159_v22 = vpop.f32.mrb[2].mxu0  ;;  %v167_v23 = vpop.f32.mrb[2].mxu1 }
  0xfb   :  { %v189_v24 = vadd.f32 %v238_v16, %v178_v18  ;;  %v191_v25 = vadd.f32 %v238_v16, %v180_v19  ;;  %v179_v26 = vmul.f32 %v237_v14, %v159_v22  ;;  %v181_v27 = vmul.f32 %v237_v14, %v167_v23  ;;  %v161_v28 = vpop.f32.mrb[3].mxu0  ;;  %v169_v29 = vpop.f32.mrb[3].mxu1 }
  0xfd   :  { %vm193_vm1 = vcmp.gt.f32.partialorder %v189_v24, 0.0  ;;  %v197_v32 = vmul.f32 0.01, %v189_v24  ;;  %vm195_vm2 = vcmp.gt.f32.partialorder %v191_v25, 0.0  ;;  %v199_v33 = vmul.f32 0.01, %v191_v25 }
  0xfe   :  { %v190_v34 = vadd.f32 %v238_v16, %v179_v26  ;;  %v192_v35 = vadd.f32 %v238_v16, %v181_v27 }
  0xff   :  { %v201_v36 = vsel %vm193_vm1, %v189_v24, %v197_v32  ;;  %v203_v37 = vsel %vm195_vm2, %v191_v25, %v199_v33 }
 0x100   :  { %v209_v38 = vadd.f32 %v205_v30, %v201_v36  ;;  %v211_v39 = vadd.f32 %v207_v31, %v203_v37  ;;  %vm194_vm4 = vcmp.gt.f32.partialorder %v190_v34, 0.0  ;;  %v198_v40 = vmul.f32 0.01, %v190_v34 }
 0x101   :  { %vm196_vm5 = vcmp.gt.f32.partialorder %v192_v35, 0.0  ;;  %v200_v42 = vmul.f32 0.01, %v192_v35 }
 0x102   :  { %214 = vst.msk [vmem:[%s382_s5] sm:$0xff] %vm213_vm3, %v209_v38  ;;  %216 = vst.msk [vmem:[%s382_s5 + $0x10] sm:$0xff] %vm213_vm3, %v211_v39  ;;  %v202_v44 = vsel %vm194_vm4, %v190_v34, %v198_v40 }
 0x103   :  { %v210_v45 = vadd.f32 %v206_v41, %v202_v44  ;;  %v204_v46 = vsel %vm196_vm5, %v192_v35, %v200_v42 }
 0x104   :  { %v212_v47 = vadd.f32 %v208_v43, %v204_v46 }
 0x105   :  { %215 = vst.msk [vmem:[%s382_s5 + $0x8] sm:$0xff] %vm213_vm3, %v210_v45 }
 0x106   :  { %217 = vst.msk [vmem:[%s382_s5 + $0x18] sm:$0xff] %vm213_vm3, %v212_v47 }

// kernel: _lambda_.19
= control target key start
LH: loop header
LB: loop body
LE: loop exit
PB: predicated region body
PF: predicated region fallthrough
CT: control target
= control target key end

     0   :  { %6 = vsyncpa [#allocation3], 0  ;;  %s421_s0 = inlined_call_operand.vmem [shape: f32[2,16,32], index: 0, kind: input, shape index: {}]   ;;  %s422_s1 = inlined_call_operand.hbm [shape: f32[2,1,32], index: 1, kind: output, shape index: {}]  }
   0x1   :  { %8 = vsyncpa [#allocation3 + $0x1], 0  ;;  %s321_s6 = smov 0   ;;  %s323_s7 = smov 0  }
   0x2   :  { %s325_s8 = smov 0   ;;  %s327_s9 = smov 0  }
   0x3 LB: > { %s342_s10 = sadd.s32 4294967295, %s308_s9   ;;  %s197_s11 = sadd.s32 4294967294, %s308_s9   ;;  %s308_s9 = sphi %s327_s9, %s428_s9   ;;  %s304_s8 = sphi %s325_s8, %s427_s8   ;;  %s300_s7 = sphi %s323_s7, %s426_s7   ;;  %s296_s6 = sphi %s321_s6, %s425_s6  }
   0x4   : > { %s346_s12 = sadd.s32 1, %s308_s9   ;;  %s47_s13 = sadd.s32 1, %s304_s8 }
   0x5   : > { %s44_s14 = ssub.s32 %s308_s9, %s346_s12  ;;  %p57_p0 = scmp.ne.s32.totalorder %s304_s8, %s300_s7 }
   0x6   : > { %p45_p1 = scmp.eq.s32.totalorder %s44_s14, 0  ;;  %p58_p2 = scmp.eq.s32.totalorder %s342_s10, 1 }
   0x7   : > { %p63_p3 = scmp.ne.s32.totalorder %s300_s7, %s296_s6  ;;  %p64_p4 = scmp.eq.s32.totalorder %s197_s11, 1 }
   0x8   : > { %s357_s15 = scalar_select %p45_p1, %s304_s8, %s47_s13  }
   0x9   : > { %p359_p5 = por %p58_p2, %p57_p0  ;;  %p363_p6 = por %p64_p4, %p63_p3 }
   0xa   : > { %p200_p7 = scmp.ge.s32.totalorder %s308_s9, 1  ;;  %p90_p8 = scmp.lt.s32.totalorder %s308_s9, 3 }
   0xc   : > { %p91_p9 = pnand %p200_p7, %p90_p8 }
   0xd   : > { %p109_p10 = scmp.lt.s32.totalorder (!%p91_p9), %s342_s10, 1  ;;  %vm116_vm0 = vcmask (!%p91_p9), 261120   ;;  %s107_s23 = sand.u32 (!%p91_p9), 1, %s300_s7   ;;  %vm127_vm1 = vcmask (!%p91_p9), 253952  }
   0xe   : > { %94 = sbr.rel (%p91_p9) target bundleno = 57 (0x39), region = 24  ;;  %s108_s24 = scalar_lea.vmem (!%p91_p9), [#allocation2], %s107_s23 }
   0xf   : > { %s142_s25 = sshll.u32 (!%p91_p9), %s108_s24, 4  ;;  %s203_s26 = sshll.u32 (!%p91_p9), %s342_s10, 4  ;;  %s376_s25 = int_to_ptr.vmem [resolvable:$true] %s142_s25 }
  0x10   : > { %s381_s29 = scalar_lea.hbm (!%p91_p9), %s422_s1, %s203_s26  ;;  %s130_s30 = scalar_lea.sflag (!%p91_p9), [#allocation3], %s107_s23 }
  0x11   : > { %s246_s2 = scalar_lea.vmem (!%p91_p9), %s376_s25, 16  ;;  %s310_s3 = smov (!%p91_p9), [#allocation2]  }
  0x12   : > { %p247_p11 = scmp.ne.s32.totalorder (!%p91_p9), %s376_s25, %s246_s2  ;;  %s250_s4 = sshll.u32 (!%p91_p9), %s310_s3, 4  ;;  %s251_s4 = int_to_ptr.vmem [resolvable:$false] %s250_s4 }
  0x13   : > { %s252_s5 = scalar_lea.vmem (!%p91_p9), %s251_s4, 32  ;;  %p253_p0 = scmp.lt.s32.totalorder (!%p91_p9), %s376_s25, %s251_s4 }
  0x14   : > { %p248_p12 = pnand (!%p91_p9), %p247_p11, %p359_p5  ;;  %p254_p1 = scmp.lt.s32.totalorder (!%p91_p9), %s252_s5, %s246_s2 }
  0x15   : > { %s110_s18 = scalar_select %p109_p10, %s342_s10, 1 }
  0x16   : > { %p249_p13 = pneg %p248_p12  ;;  %p255_p2 = por %p254_p1, %p253_p0 }
  0x17   : > { %s206_s19 = sshll.u32 %s110_s18, 4 }
  0x18   : > { %s113_s22 = scalar_lea.vmem %s421_s0, %s206_s19  ;;  %p256_p3 = pnand %p255_p2, %p249_p13 }
  0x19   : > { %v114_v0 = vld [vmem:[%s113_s22] sm:$0xff]  ;;  %v115_v1 = vld [vmem:[%s113_s22 + $0x8] sm:$0xff] }
  0x1a   : > { %v117_v2 = vsel %vm116_vm0, %v114_v0, 0.0  ;;  %v118_v3 = vsel %vm116_vm0, %v115_v1, 0.0 }
  0x1b   : > { %v119_v4 = vadd.f32 %v118_v3, %v117_v2 }
  0x1d   : > { %v120_v5 = vrot.slane %v119_v4, 4 }
  0x1f   : > { %v121_v6 = vadd.f32 %v120_v5, %v119_v4 }
  0x21   : > { %v122_v7 = vrot.slane %v121_v6, 2 }
  0x23   : > { %v123_v8 = vadd.f32 %v122_v7, %v121_v6 }
  0x25   : > { %v124_v9 = vrot.slane %v123_v8, 1 }
  0x27   : > { %v125_v10 = vadd.f32 %v124_v9, %v123_v8 }
  0x29   : > { %v126_v11 = vmul.f32 0.0625, %v125_v10 }
  0x2b   : > { %128 = vst.msk [vmem:[%s108_s24] sm:$0x1] %vm127_vm1, %v126_v11 }
  0x2c   : > { %259 = shalt.err (!%p256_p3)
}
  0x2d   : > { %s260_s10 = scalar_lea.hbm %s381_s29, 16  ;;  %s264_s14 = scalar_lea.hbm %s422_s1, 32 }
  0x2e   : > { %p261_p4 = scmp.ne.s32.totalorder %s381_s29, %s260_s10  ;;  %p265_p9 = scmp.lt.u32.totalorder %s381_s29, %s422_s1 }
  0x2f   : > { %p266_p10 = scmp.lt.u32.totalorder %s264_s14, %s260_s10  ;;  %p268_p12 = scmp.lt.u32.totalorder %s260_s10, %s381_s29 }
  0x30   : > { %p262_p7 = pnand %p261_p4, %p359_p5 }
  0x31   : > { %p267_p11 = por %p266_p10, %p265_p9 }
  0x32   : > { %p263_p8 = pneg %p262_p7 }
  0x33   : > { %p269_p13 = por %p268_p12, %p267_p11 }
  0x35   : > { %p270_p0 = pnand %p269_p13, %p263_p8 }
  0x37   : > { %273 = shalt.err (!%p270_p0)
}
  0x38   : > { %207 = dma.vmem_to_hbm [thread:$0]  (%p359_p5), %s376_s25, 16, %s381_s29, %s130_s30  }
  0x39 PF: > { %p213_p1 = scmp.ge.s32.totalorder %s308_s9, 2  ;;  %s154_s20 = sand.u32 1, %s296_s6  }
  0x3a   : > { %s155_s21 = scalar_lea.sflag [#allocation3], %s154_s20 }
  0x3b   : > { %p210_p2 = pnand %p213_p1, %p363_p6 }
  0x3d   : > { %291 = dma.done.wait (!%p210_p2), %s155_s21, 16  }
  0x3e   : > { %293 = vsyncadd (!%p210_p2), %s155_s21, 4294967280  ;;  %p11_p3 = scmp.ge.s32.totalorder %s346_s12, 4   ;;  %s425_s6 = smov %s300_s7 }
  0x3f   : > { %s426_s7 = smov %s304_s8  ;;  %s427_s8 = smov %s357_s15 }
  0x40   : > { %s428_s9 = smov %s346_s12  ;;  %13 = sbr.rel (!%p11_p3) target bundleno = 3 (0x3), region = 59 }
  0x47   :  { %159 = vsyncpa [#allocation3], 1 }
  0x48   :  { %161 = vsyncpa [#allocation3 + $0x1], 1 }

</bundles_post_ra>
